<compile_context>
chip_gen: v5e
topology: v5e:2x2
jax: 0.10.0
libtpu: 0.0.40
codegen_flags: <defaults>
</compile_context>

<pallas_src>
import functools

import jax
import jax.numpy as jnp
from jax.experimental import pallas as pl
from jax.experimental.pallas import tpu as pltpu

K_E = 3                    # ECA Conv1d kernel size (over the channel dim)
PAD_E = K_E // 2
K_S = 7                    # SpatialAttention Conv2d kernel size
PAD_S = K_S // 2
LEAKY_SLOPE = 0.01         # torch.nn.LeakyReLU default negative_slope


def _leaky(v):
    return jnp.where(v >= 0.0, v, LEAKY_SLOPE * v)


def _ecbam_kernel(eca_w_ref, sa_w_ref, x_ref, o_ref, pad_ref, cpad_ref, saf_ref,
                  *, H, W):
    # eca_w_ref : SMEM (K_E,)         flat Conv1d weight, w[j]
    # sa_w_ref  : SMEM (2*K_S*K_S,)   flat Conv2d weight, w[p,dy,dx] -> p*K*K+dy*K+dx
    # x_ref     : VMEM (1, C, H*W)    lane-dense input block for this batch element
    # o_ref     : VMEM (1, C, H*W)    lane-dense output block
    # pad_ref   : VMEM (2, H+6, W+6)  zero-padded mean/max planes (2-D conv domain)
    # cpad_ref  : VMEM (C+2, 2)       zero-padded channel descriptors (ECA conv)
    # saf_ref   : VMEM (1, H*W)       flattened spatial-attention map bridge
    C = x_ref.shape[1]
    HW = H * W

    xf = x_ref[0].astype(jnp.float32)                         # (C, HW), lane-dense

    # ---------------- ECA: channel attention ----------------
    avg_c = jnp.sum(xf, axis=1, keepdims=True) * (1.0 / HW)   # (C, 1)
    max_c = jnp.max(xf, axis=1, keepdims=True)                # (C, 1)

    # Tiny padded descriptor scratch; only the pad rows are re-zeroed (interior is
    # fully overwritten below).  Conv1d over channels = K_E sublane-offset slices.
    cpad_ref[0:PAD_E, :] = jnp.zeros((PAD_E, 2), jnp.float32)
    cpad_ref[PAD_E + C:, :] = jnp.zeros((PAD_E, 2), jnp.float32)
    cpad_ref[PAD_E:PAD_E + C, 0:1] = avg_c
    cpad_ref[PAD_E:PAD_E + C, 1:2] = max_c

    w_e = [eca_w_ref[j] for j in range(K_E)]                  # hoisted SMEM scalars
    acc_e = w_e[0] * cpad_ref[0:C, :]
    for j in range(1, K_E):
        acc_e = acc_e + w_e[j] * cpad_ref[j:j + C, :]
    acc_e = _leaky(acc_e)                                     # LeakyReLU per branch
    ca = jax.nn.sigmoid(acc_e[:, 0:1] + acc_e[:, 1:2])        # (C, 1)

    # ------------- Spatial attention on x1 = ca * x -------------
    # Vectorized channel reduction (no Python per-channel walk); x1f is transient
    # and dies right after the two reductions.
    x1f = xf * ca                                             # (C, HW)
    mean_plane = jnp.sum(x1f, axis=0, keepdims=True) * (1.0 / C)   # (1, HW)
    max_plane = jnp.max(x1f, axis=0, keepdims=True)                # (1, HW)

    Hp = H + 2 * PAD_S
    Wp = W + 2 * PAD_S
    # Zero only the border frame each step; the interior is overwritten below.
    pad_ref[:, 0:PAD_S, :] = jnp.zeros((2, PAD_S, Wp), jnp.float32)
    pad_ref[:, PAD_S + H:Hp, :] = jnp.zeros((2, PAD_S, Wp), jnp.float32)
    pad_ref[:, PAD_S:PAD_S + H, 0:PAD_S] = jnp.zeros((2, H, PAD_S), jnp.float32)
    pad_ref[:, PAD_S:PAD_S + H, PAD_S + W:Wp] = jnp.zeros((2, H, PAD_S), jnp.float32)

    # Bridge the lane-dense (1, HW) planes into the 2-D padded conv domain, one
    # W-wide row at a time (small: 2*H tiny stores, independent of C).
    for r in range(H):
        rows = slice(PAD_S + r, PAD_S + r + 1)
        seg = slice(r * W, (r + 1) * W)
        pad_ref[0, rows, PAD_S:PAD_S + W] = mean_plane[:, seg]
        pad_ref[1, rows, PAD_S:PAD_S + W] = max_plane[:, seg]

    # 7x7 conv: one lane-offset column load per (plane, dx) = 14 total; the dy
    # loop uses only sublane-offset slices of that column.
    w_s = [sa_w_ref[i] for i in range(2 * K_S * K_S)]         # hoisted SMEM scalars
    acc = jnp.zeros((H, W), jnp.float32)
    for p in range(2):
        for dx in range(K_S):
            col = pad_ref[p, :, dx:dx + W]                    # (H + 2*PAD_S, W)
            for dy in range(K_S):
                acc = acc + w_s[p * K_S * K_S + dy * K_S + dx] * col[dy:dy + H, :]
    sa2d = jax.nn.sigmoid(_leaky(acc))                        # (H, W)

    # Bridge sa back to a lane-dense (1, HW) row for the streaming output pass.
    for r in range(H):
        saf_ref[0:1, r * W:(r + 1) * W] = sa2d[r:r + 1, :]
    sa_flat = saf_ref[0:1, :]                                 # (1, HW)

    # Single streaming write pass: out = (x * ca) * sa, lane-dense store.
    o_ref[0] = (x_ref[0].astype(jnp.float32) * ca * sa_flat).astype(o_ref.dtype)


def _vmem_limit_bytes(C, H, W, itemsize):
    """Right-size the scoped VMEM limit from actual per-step usage."""
    hw = H * W
    blk = C * hw * itemsize                                   # one (1, C, HW) block
    scratch = (2 * (H + 2 * PAD_S) * (W + 2 * PAD_S)
               + (C + 2 * PAD_E) * 2 + hw) * 4
    interm = 2 * C * hw * 4                                   # xf + x1f f32 peak
    needed = 2 * blk + 2 * blk + scratch + interm + (2 << 20)  # 2x dbl-buffered in+out
    try:
        cap = int(pltpu.get_tpu_info().vmem_capacity_bytes) * 3 // 4
    except Exception:
        cap = 48 * 1024 * 1024        # safe on v7x (64 MiB/TC); v5e/v6e have 128 MiB
    return int(min(max(needed, 16 * 1024 * 1024), cap))


def ecbam(x, eca_weight, sa_weight):
    """ECBAM forward.

    x          : (N, C, H, W) float32
    eca_weight : (1, 1, K_E)       torch Conv1d(1, 1, K_E, bias=False) weight
    sa_weight  : (1, 2, K_S, K_S)  torch Conv2d(2, 1, K_S, bias=False) weight
    returns    : (N, C, H, W)
    """
    N, C, H, W = x.shape
    assert eca_weight.shape == (1, 1, K_E)
    assert sa_weight.shape == (1, 2, K_S, K_S)
    eca_flat = eca_weight.reshape(-1).astype(jnp.float32)     # (K_E,)       -> SMEM
    sa_flat = sa_weight.reshape(-1).astype(jnp.float32)       # (2*K_S*K_S,) -> SMEM

    HW = H * W
    # Free XLA metadata reshape: stream the kernel on a lane-dense (N, C, H*W) view.
    x_flat = x.reshape(N, C, HW)

    kernel = functools.partial(_ecbam_kernel, H=H, W=W)

    out_flat = pl.pallas_call(
        kernel,
        out_shape=jax.ShapeDtypeStruct((N, C, HW), x.dtype),
        grid_spec=pltpu.PrefetchScalarGridSpec(
            num_scalar_prefetch=0,
            grid=(N,),
            in_specs=[
                pl.BlockSpec(memory_space=pltpu.MemorySpace.SMEM),   # ECA weights
                pl.BlockSpec(memory_space=pltpu.MemorySpace.SMEM),   # spatial weights
                pl.BlockSpec((1, C, HW), lambda n: (n, 0, 0)),       # x block
            ],
            out_specs=pl.BlockSpec((1, C, HW), lambda n: (n, 0, 0)),
            scratch_shapes=[
                pltpu.VMEM((2, H + 2 * PAD_S, W + 2 * PAD_S), jnp.float32),
                pltpu.VMEM((C + 2 * PAD_E, 2), jnp.float32),
                pltpu.VMEM((1, HW), jnp.float32),
            ],
        ),
        compiler_params=pltpu.CompilerParams(
            # Independent batch axis -> split across the 2 TensorCores on v7x.
            dimension_semantics=("parallel",),
            vmem_limit_bytes=_vmem_limit_bytes(C, H, W, x.dtype.itemsize),
        ),
    )(eca_flat, sa_flat, x_flat)

    return out_flat.reshape(N, C, H, W)


def ecbam_reference(x, eca_weight, sa_weight):
    """Pure-JAX reference mirroring the PyTorch ECBAM.forward."""
    def leaky(v):
        return jnp.where(v >= 0.0, v, LEAKY_SLOPE * v)

    # --- ECA layer ---
    avg = jnp.mean(x, axis=(2, 3))                  # (N, C)
    mx = jnp.max(x, axis=(2, 3))                    # (N, C)

    def conv1d_c(v):                                # (N, C) -> (N, C)
        out = jax.lax.conv_general_dilated(
            v[:, None, :], eca_weight, window_strides=(1,),
            padding=[(PAD_E, PAD_E)],
            dimension_numbers=("NCH", "OIH", "NCH"),
            precision=jax.lax.Precision.HIGHEST)
        return out[:, 0, :]

    ca = jax.nn.sigmoid(leaky(conv1d_c(avg)) + leaky(conv1d_c(mx)))   # (N, C)
    x1 = x * ca[:, :, None, None]

    # --- Spatial attention ---
    cat = jnp.concatenate(
        [jnp.mean(x1, axis=1, keepdims=True), jnp.max(x1, axis=1, keepdims=True)],
        axis=1)
    conv = jax.lax.conv_general_dilated(
        cat, sa_weight, window_strides=(1, 1),
        padding=[(PAD_S, PAD_S), (PAD_S, PAD_S)],
        dimension_numbers=("NCHW", "OIHW", "NCHW"),
        precision=jax.lax.Precision.HIGHEST)
    sa = jax.nn.sigmoid(leaky(conv))                # (N, 1, H, W)
    return x1 * sa


if __name__ == "__main__":
    key = jax.random.PRNGKey(0)
    kx, ke, ks = jax.random.split(key, 3)

    N, C, H, W = 2, 4, 16, 16
    x = jax.random.normal(kx, (N, C, H, W), dtype=jnp.float32)
    # Deterministic synthetic weights with the PyTorch module's shapes.
    eca_weight = 0.3 * jax.random.normal(ke, (1, 1, K_E), dtype=jnp.float32)
    sa_weight = 0.1 * jax.random.normal(ks, (1, 2, K_S, K_S), dtype=jnp.float32)

    out = ecbam(x, eca_weight, sa_weight)
    out = jax.block_until_ready(out)

    ref = ecbam_reference(x, eca_weight, sa_weight)
    assert out.shape == (N, C, H, W), out.shape
    max_err = float(jnp.max(jnp.abs(out - ref)))
    assert max_err < 2e-4, max_err
    print("KERNEL_OK")
</pallas_src>

<mosaic_0001>
module attributes {stable_mosaic.version = 11 : i64} {
  func.func @_ecbam_kernel(%arg0: i32, %arg1: memref<3xf32, #tpu.memory_space<smem>>, %arg2: memref<98xf32, #tpu.memory_space<smem>>, %arg3: memref<1x4x256xf32, #tpu.memory_space<vmem>>, %arg4: memref<1x4x256xf32, #tpu.memory_space<vmem>>, %arg5: memref<2x22x22xf32, #tpu.memory_space<vmem>>, %arg6: memref<6x2xf32, #tpu.memory_space<vmem>>, %arg7: memref<1x256xf32, #tpu.memory_space<vmem>>) attributes {dimension_semantics = [#tpu.dimension_semantics<parallel>], iteration_bounds = array<i64: 2>, scalar_prefetch = 0 : i64, scratch_operands = 3 : i64, tpu.core_type = #tpu.core_type<tc>, window_params = [{transform_indices = @transform_0, window_bounds = array<i64: 3>}, {transform_indices = @transform_1, window_bounds = array<i64: 98>}, {transform_indices = @transform_2, window_bounds = array<i64: 1, 4, 256>}, {transform_indices = @transform_3, window_bounds = array<i64: 1, 4, 256>}]} {
    %c0 = arith.constant 0 : index
    %c0_0 = arith.constant 0 : index
    %c0_1 = arith.constant 0 : index
    %0 = vector.load %arg3[%c0, %c0_0, %c0_1] : memref<1x4x256xf32, #tpu.memory_space<vmem>>, vector<1x4x256xf32>
    %1 = vector.shape_cast %0 : vector<1x4x256xf32> to vector<4x256xf32>
    %cst = arith.constant dense<0.000000e+00> : vector<4xf32>
    %2 = vector.multi_reduction <add>, %1, %cst [1] : vector<4x256xf32> to vector<4xf32>
    %3 = vector.shape_cast %2 : vector<4xf32> to vector<4x1xf32>
    %cst_2 = arith.constant 3.906250e-03 : f32
    %4 = vector.broadcast %cst_2 : f32 to vector<4x1xf32>
    %5 = arith.mulf %3, %4 : vector<4x1xf32>
    %cst_3 = arith.constant dense<0xFF800000> : vector<4xf32>
    %6 = vector.multi_reduction <maximumf>, %1, %cst_3 [1] : vector<4x256xf32> to vector<4xf32>
    %7 = vector.shape_cast %6 : vector<4xf32> to vector<4x1xf32>
    %cst_4 = arith.constant 0.000000e+00 : f32
    %8 = vector.broadcast %cst_4 : f32 to vector<1x2xf32>
    %c0_5 = arith.constant 0 : index
    %c0_6 = arith.constant 0 : index
    %9 = vector.load %arg6[%c0_5, %c0_6] : memref<6x2xf32, #tpu.memory_space<vmem>>, vector<1x2xf32>
    tpu.vector_store %arg6[%c0_5, %c0_6], %8 {strides = array<i32>} : memref<6x2xf32, #tpu.memory_space<vmem>>, vector<1x2xf32>,
    %cst_7 = arith.constant 0.000000e+00 : f32
    %10 = vector.broadcast %cst_7 : f32 to vector<1x2xf32>
    %c5 = arith.constant 5 : index
    %c0_8 = arith.constant 0 : index
    %11 = vector.load %arg6[%c5, %c0_8] : memref<6x2xf32, #tpu.memory_space<vmem>>, vector<1x2xf32>
    tpu.vector_store %arg6[%c5, %c0_8], %10 {strides = array<i32>} : memref<6x2xf32, #tpu.memory_space<vmem>>, vector<1x2xf32>,
    %c1 = arith.constant 1 : index
    %c0_9 = arith.constant 0 : index
    %12 = vector.load %arg6[%c1, %c0_9] : memref<6x2xf32, #tpu.memory_space<vmem>>, vector<4x1xf32>
    tpu.vector_store %arg6[%c1, %c0_9], %5 {strides = array<i32>} : memref<6x2xf32, #tpu.memory_space<vmem>>, vector<4x1xf32>,
    %c1_10 = arith.constant 1 : index
    %c1_11 = arith.constant 1 : index
    %13 = vector.load %arg6[%c1_10, %c1_11] : memref<6x2xf32, #tpu.memory_space<vmem>>, vector<4x1xf32>
    tpu.vector_store %arg6[%c1_10, %c1_11], %7 {strides = array<i32>} : memref<6x2xf32, #tpu.memory_space<vmem>>, vector<4x1xf32>,
    %c0_12 = arith.constant 0 : index
    %14 = memref.load %arg1[%c0_12] : memref<3xf32, #tpu.memory_space<smem>>
    %c1_13 = arith.constant 1 : index
    %15 = memref.load %arg1[%c1_13] : memref<3xf32, #tpu.memory_space<smem>>
    %c2 = arith.constant 2 : index
    %16 = memref.load %arg1[%c2] : memref<3xf32, #tpu.memory_space<smem>>
    %c0_14 = arith.constant 0 : index
    %c0_15 = arith.constant 0 : index
    %17 = vector.load %arg6[%c0_14, %c0_15] : memref<6x2xf32, #tpu.memory_space<vmem>>, vector<4x2xf32>
    %18 = vector.broadcast %14 : f32 to vector<4x2xf32>
    %19 = arith.mulf %18, %17 : vector<4x2xf32>
    %c1_16 = arith.constant 1 : index
    %c0_17 = arith.constant 0 : index
    %20 = vector.load %arg6[%c1_16, %c0_17] : memref<6x2xf32, #tpu.memory_space<vmem>>, vector<4x2xf32>
    %21 = vector.broadcast %15 : f32 to vector<4x2xf32>
    %22 = arith.mulf %21, %20 : vector<4x2xf32>
    %23 = arith.addf %19, %22 : vector<4x2xf32>
    %c2_18 = arith.constant 2 : index
    %c0_19 = arith.constant 0 : index
    %24 = vector.load %arg6[%c2_18, %c0_19] : memref<6x2xf32, #tpu.memory_space<vmem>>, vector<4x2xf32>
    %25 = vector.broadcast %16 : f32 to vector<4x2xf32>
    %26 = arith.mulf %25, %24 : vector<4x2xf32>
    %27 = arith.addf %23, %26 : vector<4x2xf32>
    %cst_20 = arith.constant 0.000000e+00 : f32
    %28 = vector.broadcast %cst_20 : f32 to vector<4x2xf32>
    %29 = arith.cmpf oge, %27, %28 : vector<4x2xf32>
    %cst_21 = arith.constant 0.00999999977 : f32
    %30 = vector.broadcast %cst_21 : f32 to vector<4x2xf32>
    %31 = arith.mulf %30, %27 : vector<4x2xf32>
    %32 = arith.select %29, %27, %31 : vector<4x2xi1>, vector<4x2xf32>
    %33 = vector.extract_strided_slice %32 {offsets = [0, 0], sizes = [4, 1], strides = [1, 1]} : vector<4x2xf32> to vector<4x1xf32>
    %34 = vector.extract_strided_slice %32 {offsets = [0, 1], sizes = [4, 1], strides = [1, 1]} : vector<4x2xf32> to vector<4x1xf32>
    %35 = arith.addf %33, %34 : vector<4x1xf32>
    %36 = arith.negf %35 : vector<4x1xf32>
    %37 = math.exp %36 : vector<4x1xf32>
    %cst_22 = arith.constant 1.000000e+00 : f32
    %38 = vector.broadcast %cst_22 : f32 to vector<4x1xf32>
    %39 = arith.addf %38, %37 : vector<4x1xf32>
    %40 = arith.divf %38, %39 : vector<4x1xf32>
    %41 = vector.broadcast %40 : vector<4x1xf32> to vector<4x256xf32>
    %42 = arith.mulf %1, %41 : vector<4x256xf32>
    %cst_23 = arith.constant dense<0.000000e+00> : vector<256xf32>
    %43 = vector.multi_reduction <add>, %42, %cst_23 [0] : vector<4x256xf32> to vector<256xf32>
    %44 = vector.shape_cast %43 : vector<256xf32> to vector<1x256xf32>
    %cst_24 = arith.constant 2.500000e-01 : f32
    %45 = vector.broadcast %cst_24 : f32 to vector<1x256xf32>
    %46 = arith.mulf %44, %45 : vector<1x256xf32>
    %cst_25 = arith.constant dense<0xFF800000> : vector<256xf32>
    %47 = vector.multi_reduction <maximumf>, %42, %cst_25 [0] : vector<4x256xf32> to vector<256xf32>
    %48 = vector.shape_cast %47 : vector<256xf32> to vector<1x256xf32>
    %cst_26 = arith.constant 0.000000e+00 : f32
    %49 = vector.broadcast %cst_26 : f32 to vector<2x3x22xf32>
    %c0_27 = arith.constant 0 : index
    %c0_28 = arith.constant 0 : index
    %c0_29 = arith.constant 0 : index
    %50 = vector.load %arg5[%c0_27, %c0_28, %c0_29] : memref<2x22x22xf32, #tpu.memory_space<vmem>>, vector<2x3x22xf32>
    tpu.vector_store %arg5[%c0_27, %c0_28, %c0_29], %49 {strides = array<i32>} : memref<2x22x22xf32, #tpu.memory_space<vmem>>, vector<2x3x22xf32>,
    %cst_30 = arith.constant 0.000000e+00 : f32
    %51 = vector.broadcast %cst_30 : f32 to vector<2x3x22xf32>
    %c0_31 = arith.constant 0 : index
    %c19 = arith.constant 19 : index
    %c0_32 = arith.constant 0 : index
    %52 = vector.load %arg5[%c0_31, %c19, %c0_32] : memref<2x22x22xf32, #tpu.memory_space<vmem>>, vector<2x3x22xf32>
    tpu.vector_store %arg5[%c0_31, %c19, %c0_32], %51 {strides = array<i32>} : memref<2x22x22xf32, #tpu.memory_space<vmem>>, vector<2x3x22xf32>,
    %cst_33 = arith.constant 0.000000e+00 : f32
    %53 = vector.broadcast %cst_33 : f32 to vector<2x16x3xf32>
    %c0_34 = arith.constant 0 : index
    %c3 = arith.constant 3 : index
    %c0_35 = arith.constant 0 : index
    %54 = vector.load %arg5[%c0_34, %c3, %c0_35] : memref<2x22x22xf32, #tpu.memory_space<vmem>>, vector<2x16x3xf32>
    tpu.vector_store %arg5[%c0_34, %c3, %c0_35], %53 {strides = array<i32>} : memref<2x22x22xf32, #tpu.memory_space<vmem>>, vector<2x16x3xf32>,
    %cst_36 = arith.constant 0.000000e+00 : f32
    %55 = vector.broadcast %cst_36 : f32 to vector<2x16x3xf32>
    %c0_37 = arith.constant 0 : index
    %c3_38 = arith.constant 3 : index
    %c19_39 = arith.constant 19 : index
    %56 = vector.load %arg5[%c0_37, %c3_38, %c19_39] : memref<2x22x22xf32, #tpu.memory_space<vmem>>, vector<2x16x3xf32>
    tpu.vector_store %arg5[%c0_37, %c3_38, %c19_39], %55 {strides = array<i32>} : memref<2x22x22xf32, #tpu.memory_space<vmem>>, vector<2x16x3xf32>,
    %57 = vector.extract_strided_slice %46 {offsets = [0, 0], sizes = [1, 16], strides = [1, 1]} : vector<1x256xf32> to vector<1x16xf32>
    %c0_40 = arith.constant 0 : index
    %c3_41 = arith.constant 3 : index
    %c3_42 = arith.constant 3 : index
    %58 = vector.load %arg5[%c0_40, %c3_41, %c3_42] : memref<2x22x22xf32, #tpu.memory_space<vmem>>, vector<1x1x16xf32>
    %59 = vector.shape_cast %58 : vector<1x1x16xf32> to vector<1x16xf32>
    %60 = vector.shape_cast %57 : vector<1x16xf32> to vector<1x1x16xf32>
    tpu.vector_store %arg5[%c0_40, %c3_41, %c3_42], %60 {strides = array<i32>} : memref<2x22x22xf32, #tpu.memory_space<vmem>>, vector<1x1x16xf32>,
    %61 = vector.extract_strided_slice %48 {offsets = [0, 0], sizes = [1, 16], strides = [1, 1]} : vector<1x256xf32> to vector<1x16xf32>
    %c1_43 = arith.constant 1 : index
    %c3_44 = arith.constant 3 : index
    %c3_45 = arith.constant 3 : index
    %62 = vector.load %arg5[%c1_43, %c3_44, %c3_45] : memref<2x22x22xf32, #tpu.memory_space<vmem>>, vector<1x1x16xf32>
    %63 = vector.shape_cast %62 : vector<1x1x16xf32> to vector<1x16xf32>
    %64 = vector.shape_cast %61 : vector<1x16xf32> to vector<1x1x16xf32>
    tpu.vector_store %arg5[%c1_43, %c3_44, %c3_45], %64 {strides = array<i32>} : memref<2x22x22xf32, #tpu.memory_space<vmem>>, vector<1x1x16xf32>,
    %65 = vector.extract_strided_slice %46 {offsets = [0, 16], sizes = [1, 16], strides = [1, 1]} : vector<1x256xf32> to vector<1x16xf32>
    %c0_46 = arith.constant 0 : index
    %c4 = arith.constant 4 : index
    %c3_47 = arith.constant 3 : index
    %66 = vector.load %arg5[%c0_46, %c4, %c3_47] : memref<2x22x22xf32, #tpu.memory_space<vmem>>, vector<1x1x16xf32>
    %67 = vector.shape_cast %66 : vector<1x1x16xf32> to vector<1x16xf32>
    %68 = vector.shape_cast %65 : vector<1x16xf32> to vector<1x1x16xf32>
    tpu.vector_store %arg5[%c0_46, %c4, %c3_47], %68 {strides = array<i32>} : memref<2x22x22xf32, #tpu.memory_space<vmem>>, vector<1x1x16xf32>,
    %69 = vector.extract_strided_slice %48 {offsets = [0, 16], sizes = [1, 16], strides = [1, 1]} : vector<1x256xf32> to vector<1x16xf32>
    %c1_48 = arith.constant 1 : index
    %c4_49 = arith.constant 4 : index
    %c3_50 = arith.constant 3 : index
    %70 = vector.load %arg5[%c1_48, %c4_49, %c3_50] : memref<2x22x22xf32, #tpu.memory_space<vmem>>, vector<1x1x16xf32>
    %71 = vector.shape_cast %70 : vector<1x1x16xf32> to vector<1x16xf32>
    %72 = vector.shape_cast %69 : vector<1x16xf32> to vector<1x1x16xf32>
    tpu.vector_store %arg5[%c1_48, %c4_49, %c3_50], %72 {strides = array<i32>} : memref<2x22x22xf32, #tpu.memory_space<vmem>>, vector<1x1x16xf32>,
    %73 = vector.extract_strided_slice %46 {offsets = [0, 32], sizes = [1, 16], strides = [1, 1]} : vector<1x256xf32> to vector<1x16xf32>
    %c0_51 = arith.constant 0 : index
    %c5_52 = arith.constant 5 : index
    %c3_53 = arith.constant 3 : index
    %74 = vector.load %arg5[%c0_51, %c5_52, %c3_53] : memref<2x22x22xf32, #tpu.memory_space<vmem>>, vector<1x1x16xf32>
    %75 = vector.shape_cast %74 : vector<1x1x16xf32> to vector<1x16xf32>
    %76 = vector.shape_cast %73 : vector<1x16xf32> to vector<1x1x16xf32>
    tpu.vector_store %arg5[%c0_51, %c5_52, %c3_53], %76 {strides = array<i32>} : memref<2x22x22xf32, #tpu.memory_space<vmem>>, vector<1x1x16xf32>,
    %77 = vector.extract_strided_slice %48 {offsets = [0, 32], sizes = [1, 16], strides = [1, 1]} : vector<1x256xf32> to vector<1x16xf32>
    %c1_54 = arith.constant 1 : index
    %c5_55 = arith.constant 5 : index
    %c3_56 = arith.constant 3 : index
    %78 = vector.load %arg5[%c1_54, %c5_55, %c3_56] : memref<2x22x22xf32, #tpu.memory_space<vmem>>, vector<1x1x16xf32>
    %79 = vector.shape_cast %78 : vector<1x1x16xf32> to vector<1x16xf32>
    %80 = vector.shape_cast %77 : vector<1x16xf32> to vector<1x1x16xf32>
    tpu.vector_store %arg5[%c1_54, %c5_55, %c3_56], %80 {strides = array<i32>} : memref<2x22x22xf32, #tpu.memory_space<vmem>>, vector<1x1x16xf32>,
    %81 = vector.extract_strided_slice %46 {offsets = [0, 48], sizes = [1, 16], strides = [1, 1]} : vector<1x256xf32> to vector<1x16xf32>
    %c0_57 = arith.constant 0 : index
    %c6 = arith.constant 6 : index
    %c3_58 = arith.constant 3 : index
    %82 = vector.load %arg5[%c0_57, %c6, %c3_58] : memref<2x22x22xf32, #tpu.memory_space<vmem>>, vector<1x1x16xf32>
    %83 = vector.shape_cast %82 : vector<1x1x16xf32> to vector<1x16xf32>
    %84 = vector.shape_cast %81 : vector<1x16xf32> to vector<1x1x16xf32>
    tpu.vector_store %arg5[%c0_57, %c6, %c3_58], %84 {strides = array<i32>} : memref<2x22x22xf32, #tpu.memory_space<vmem>>, vector<1x1x16xf32>,
    %85 = vector.extract_strided_slice %48 {offsets = [0, 48], sizes = [1, 16], strides = [1, 1]} : vector<1x256xf32> to vector<1x16xf32>
    %c1_59 = arith.constant 1 : index
    %c6_60 = arith.constant 6 : index
    %c3_61 = arith.constant 3 : index
    %86 = vector.load %arg5[%c1_59, %c6_60, %c3_61] : memref<2x22x22xf32, #tpu.memory_space<vmem>>, vector<1x1x16xf32>
    %87 = vector.shape_cast %86 : vector<1x1x16xf32> to vector<1x16xf32>
    %88 = vector.shape_cast %85 : vector<1x16xf32> to vector<1x1x16xf32>
    tpu.vector_store %arg5[%c1_59, %c6_60, %c3_61], %88 {strides = array<i32>} : memref<2x22x22xf32, #tpu.memory_space<vmem>>, vector<1x1x16xf32>,
    %89 = vector.extract_strided_slice %46 {offsets = [0, 64], sizes = [1, 16], strides = [1, 1]} : vector<1x256xf32> to vector<1x16xf32>
    %c0_62 = arith.constant 0 : index
    %c7 = arith.constant 7 : index
    %c3_63 = arith.constant 3 : index
    %90 = vector.load %arg5[%c0_62, %c7, %c3_63] : memref<2x22x22xf32, #tpu.memory_space<vmem>>, vector<1x1x16xf32>
    %91 = vector.shape_cast %90 : vector<1x1x16xf32> to vector<1x16xf32>
    %92 = vector.shape_cast %89 : vector<1x16xf32> to vector<1x1x16xf32>
    tpu.vector_store %arg5[%c0_62, %c7, %c3_63], %92 {strides = array<i32>} : memref<2x22x22xf32, #tpu.memory_space<vmem>>, vector<1x1x16xf32>,
    %93 = vector.extract_strided_slice %48 {offsets = [0, 64], sizes = [1, 16], strides = [1, 1]} : vector<1x256xf32> to vector<1x16xf32>
    %c1_64 = arith.constant 1 : index
    %c7_65 = arith.constant 7 : index
    %c3_66 = arith.constant 3 : index
    %94 = vector.load %arg5[%c1_64, %c7_65, %c3_66] : memref<2x22x22xf32, #tpu.memory_space<vmem>>, vector<1x1x16xf32>
    %95 = vector.shape_cast %94 : vector<1x1x16xf32> to vector<1x16xf32>
    %96 = vector.shape_cast %93 : vector<1x16xf32> to vector<1x1x16xf32>
    tpu.vector_store %arg5[%c1_64, %c7_65, %c3_66], %96 {strides = array<i32>} : memref<2x22x22xf32, #tpu.memory_space<vmem>>, vector<1x1x16xf32>,
    %97 = vector.extract_strided_slice %46 {offsets = [0, 80], sizes = [1, 16], strides = [1, 1]} : vector<1x256xf32> to vector<1x16xf32>
    %c0_67 = arith.constant 0 : index
    %c8 = arith.constant 8 : index
    %c3_68 = arith.constant 3 : index
    %98 = vector.load %arg5[%c0_67, %c8, %c3_68] : memref<2x22x22xf32, #tpu.memory_space<vmem>>, vector<1x1x16xf32>
    %99 = vector.shape_cast %98 : vector<1x1x16xf32> to vector<1x16xf32>
    %100 = vector.shape_cast %97 : vector<1x16xf32> to vector<1x1x16xf32>
    tpu.vector_store %arg5[%c0_67, %c8, %c3_68], %100 {strides = array<i32>} : memref<2x22x22xf32, #tpu.memory_space<vmem>>, vector<1x1x16xf32>,
    %101 = vector.extract_strided_slice %48 {offsets = [0, 80], sizes = [1, 16], strides = [1, 1]} : vector<1x256xf32> to vector<1x16xf32>
    %c1_69 = arith.constant 1 : index
    %c8_70 = arith.constant 8 : index
    %c3_71 = arith.constant 3 : index
    %102 = vector.load %arg5[%c1_69, %c8_70, %c3_71] : memref<2x22x22xf32, #tpu.memory_space<vmem>>, vector<1x1x16xf32>
    %103 = vector.shape_cast %102 : vector<1x1x16xf32> to vector<1x16xf32>
    %104 = vector.shape_cast %101 : vector<1x16xf32> to vector<1x1x16xf32>
    tpu.vector_store %arg5[%c1_69, %c8_70, %c3_71], %104 {strides = array<i32>} : memref<2x22x22xf32, #tpu.memory_space<vmem>>, vector<1x1x16xf32>,
    %105 = vector.extract_strided_slice %46 {offsets = [0, 96], sizes = [1, 16], strides = [1, 1]} : vector<1x256xf32> to vector<1x16xf32>
    %c0_72 = arith.constant 0 : index
    %c9 = arith.constant 9 : index
    %c3_73 = arith.constant 3 : index
    %106 = vector.load %arg5[%c0_72, %c9, %c3_73] : memref<2x22x22xf32, #tpu.memory_space<vmem>>, vector<1x1x16xf32>
    %107 = vector.shape_cast %106 : vector<1x1x16xf32> to vector<1x16xf32>
    %108 = vector.shape_cast %105 : vector<1x16xf32> to vector<1x1x16xf32>
    tpu.vector_store %arg5[%c0_72, %c9, %c3_73], %108 {strides = array<i32>} : memref<2x22x22xf32, #tpu.memory_space<vmem>>, vector<1x1x16xf32>,
    %109 = vector.extract_strided_slice %48 {offsets = [0, 96], sizes = [1, 16], strides = [1, 1]} : vector<1x256xf32> to vector<1x16xf32>
    %c1_74 = arith.constant 1 : index
    %c9_75 = arith.constant 9 : index
    %c3_76 = arith.constant 3 : index
    %110 = vector.load %arg5[%c1_74, %c9_75, %c3_76] : memref<2x22x22xf32, #tpu.memory_space<vmem>>, vector<1x1x16xf32>
    %111 = vector.shape_cast %110 : vector<1x1x16xf32> to vector<1x16xf32>
    %112 = vector.shape_cast %109 : vector<1x16xf32> to vector<1x1x16xf32>
    tpu.vector_store %arg5[%c1_74, %c9_75, %c3_76], %112 {strides = array<i32>} : memref<2x22x22xf32, #tpu.memory_space<vmem>>, vector<1x1x16xf32>,
    %113 = vector.extract_strided_slice %46 {offsets = [0, 112], sizes = [1, 16], strides = [1, 1]} : vector<1x256xf32> to vector<1x16xf32>
    %c0_77 = arith.constant 0 : index
    %c10 = arith.constant 10 : index
    %c3_78 = arith.constant 3 : index
    %114 = vector.load %arg5[%c0_77, %c10, %c3_78] : memref<2x22x22xf32, #tpu.memory_space<vmem>>, vector<1x1x16xf32>
    %115 = vector.shape_cast %114 : vector<1x1x16xf32> to vector<1x16xf32>
    %116 = vector.shape_cast %113 : vector<1x16xf32> to vector<1x1x16xf32>
    tpu.vector_store %arg5[%c0_77, %c10, %c3_78], %116 {strides = array<i32>} : memref<2x22x22xf32, #tpu.memory_space<vmem>>, vector<1x1x16xf32>,
    %117 = vector.extract_strided_slice %48 {offsets = [0, 112], sizes = [1, 16], strides = [1, 1]} : vector<1x256xf32> to vector<1x16xf32>
    %c1_79 = arith.constant 1 : index
    %c10_80 = arith.constant 10 : index
    %c3_81 = arith.constant 3 : index
    %118 = vector.load %arg5[%c1_79, %c10_80, %c3_81] : memref<2x22x22xf32, #tpu.memory_space<vmem>>, vector<1x1x16xf32>
    %119 = vector.shape_cast %118 : vector<1x1x16xf32> to vector<1x16xf32>
    %120 = vector.shape_cast %117 : vector<1x16xf32> to vector<1x1x16xf32>
    tpu.vector_store %arg5[%c1_79, %c10_80, %c3_81], %120 {strides = array<i32>} : memref<2x22x22xf32, #tpu.memory_space<vmem>>, vector<1x1x16xf32>,
    %121 = vector.extract_strided_slice %46 {offsets = [0, 128], sizes = [1, 16], strides = [1, 1]} : vector<1x256xf32> to vector<1x16xf32>
    %c0_82 = arith.constant 0 : index
    %c11 = arith.constant 11 : index
    %c3_83 = arith.constant 3 : index
    %122 = vector.load %arg5[%c0_82, %c11, %c3_83] : memref<2x22x22xf32, #tpu.memory_space<vmem>>, vector<1x1x16xf32>
    %123 = vector.shape_cast %122 : vector<1x1x16xf32> to vector<1x16xf32>
    %124 = vector.shape_cast %121 : vector<1x16xf32> to vector<1x1x16xf32>
    tpu.vector_store %arg5[%c0_82, %c11, %c3_83], %124 {strides = array<i32>} : memref<2x22x22xf32, #tpu.memory_space<vmem>>, vector<1x1x16xf32>,
    %125 = vector.extract_strided_slice %48 {offsets = [0, 128], sizes = [1, 16], strides = [1, 1]} : vector<1x256xf32> to vector<1x16xf32>
    %c1_84 = arith.constant 1 : index
    %c11_85 = arith.constant 11 : index
    %c3_86 = arith.constant 3 : index
    %126 = vector.load %arg5[%c1_84, %c11_85, %c3_86] : memref<2x22x22xf32, #tpu.memory_space<vmem>>, vector<1x1x16xf32>
    %127 = vector.shape_cast %126 : vector<1x1x16xf32> to vector<1x16xf32>
    %128 = vector.shape_cast %125 : vector<1x16xf32> to vector<1x1x16xf32>
    tpu.vector_store %arg5[%c1_84, %c11_85, %c3_86], %128 {strides = array<i32>} : memref<2x22x22xf32, #tpu.memory_space<vmem>>, vector<1x1x16xf32>,
    %129 = vector.extract_strided_slice %46 {offsets = [0, 144], sizes = [1, 16], strides = [1, 1]} : vector<1x256xf32> to vector<1x16xf32>
    %c0_87 = arith.constant 0 : index
    %c12 = arith.constant 12 : index
    %c3_88 = arith.constant 3 : index
    %130 = vector.load %arg5[%c0_87, %c12, %c3_88] : memref<2x22x22xf32, #tpu.memory_space<vmem>>, vector<1x1x16xf32>
    %131 = vector.shape_cast %130 : vector<1x1x16xf32> to vector<1x16xf32>
    %132 = vector.shape_cast %129 : vector<1x16xf32> to vector<1x1x16xf32>
    tpu.vector_store %arg5[%c0_87, %c12, %c3_88], %132 {strides = array<i32>} : memref<2x22x22xf32, #tpu.memory_space<vmem>>, vector<1x1x16xf32>,
    %133 = vector.extract_strided_slice %48 {offsets = [0, 144], sizes = [1, 16], strides = [1, 1]} : vector<1x256xf32> to vector<1x16xf32>
    %c1_89 = arith.constant 1 : index
    %c12_90 = arith.constant 12 : index
    %c3_91 = arith.constant 3 : index
    %134 = vector.load %arg5[%c1_89, %c12_90, %c3_91] : memref<2x22x22xf32, #tpu.memory_space<vmem>>, vector<1x1x16xf32>
    %135 = vector.shape_cast %134 : vector<1x1x16xf32> to vector<1x16xf32>
    %136 = vector.shape_cast %133 : vector<1x16xf32> to vector<1x1x16xf32>
    tpu.vector_store %arg5[%c1_89, %c12_90, %c3_91], %136 {strides = array<i32>} : memref<2x22x22xf32, #tpu.memory_space<vmem>>, vector<1x1x16xf32>,
    %137 = vector.extract_strided_slice %46 {offsets = [0, 160], sizes = [1, 16], strides = [1, 1]} : vector<1x256xf32> to vector<1x16xf32>
    %c0_92 = arith.constant 0 : index
    %c13 = arith.constant 13 : index
    %c3_93 = arith.constant 3 : index
    %138 = vector.load %arg5[%c0_92, %c13, %c3_93] : memref<2x22x22xf32, #tpu.memory_space<vmem>>, vector<1x1x16xf32>
    %139 = vector.shape_cast %138 : vector<1x1x16xf32> to vector<1x16xf32>
    %140 = vector.shape_cast %137 : vector<1x16xf32> to vector<1x1x16xf32>
    tpu.vector_store %arg5[%c0_92, %c13, %c3_93], %140 {strides = array<i32>} : memref<2x22x22xf32, #tpu.memory_space<vmem>>, vector<1x1x16xf32>,
    %141 = vector.extract_strided_slice %48 {offsets = [0, 160], sizes = [1, 16], strides = [1, 1]} : vector<1x256xf32> to vector<1x16xf32>
    %c1_94 = arith.constant 1 : index
    %c13_95 = arith.constant 13 : index
    %c3_96 = arith.constant 3 : index
    %142 = vector.load %arg5[%c1_94, %c13_95, %c3_96] : memref<2x22x22xf32, #tpu.memory_space<vmem>>, vector<1x1x16xf32>
    %143 = vector.shape_cast %142 : vector<1x1x16xf32> to vector<1x16xf32>
    %144 = vector.shape_cast %141 : vector<1x16xf32> to vector<1x1x16xf32>
    tpu.vector_store %arg5[%c1_94, %c13_95, %c3_96], %144 {strides = array<i32>} : memref<2x22x22xf32, #tpu.memory_space<vmem>>, vector<1x1x16xf32>,
    %145 = vector.extract_strided_slice %46 {offsets = [0, 176], sizes = [1, 16], strides = [1, 1]} : vector<1x256xf32> to vector<1x16xf32>
    %c0_97 = arith.constant 0 : index
    %c14 = arith.constant 14 : index
    %c3_98 = arith.constant 3 : index
    %146 = vector.load %arg5[%c0_97, %c14, %c3_98] : memref<2x22x22xf32, #tpu.memory_space<vmem>>, vector<1x1x16xf32>
    %147 = vector.shape_cast %146 : vector<1x1x16xf32> to vector<1x16xf32>
    %148 = vector.shape_cast %145 : vector<1x16xf32> to vector<1x1x16xf32>
    tpu.vector_store %arg5[%c0_97, %c14, %c3_98], %148 {strides = array<i32>} : memref<2x22x22xf32, #tpu.memory_space<vmem>>, vector<1x1x16xf32>,
    %149 = vector.extract_strided_slice %48 {offsets = [0, 176], sizes = [1, 16], strides = [1, 1]} : vector<1x256xf32> to vector<1x16xf32>
    %c1_99 = arith.constant 1 : index
    %c14_100 = arith.constant 14 : index
    %c3_101 = arith.constant 3 : index
    %150 = vector.load %arg5[%c1_99, %c14_100, %c3_101] : memref<2x22x22xf32, #tpu.memory_space<vmem>>, vector<1x1x16xf32>
    %151 = vector.shape_cast %150 : vector<1x1x16xf32> to vector<1x16xf32>
    %152 = vector.shape_cast %149 : vector<1x16xf32> to vector<1x1x16xf32>
    tpu.vector_store %arg5[%c1_99, %c14_100, %c3_101], %152 {strides = array<i32>} : memref<2x22x22xf32, #tpu.memory_space<vmem>>, vector<1x1x16xf32>,
    %153 = vector.extract_strided_slice %46 {offsets = [0, 192], sizes = [1, 16], strides = [1, 1]} : vector<1x256xf32> to vector<1x16xf32>
    %c0_102 = arith.constant 0 : index
    %c15 = arith.constant 15 : index
    %c3_103 = arith.constant 3 : index
    %154 = vector.load %arg5[%c0_102, %c15, %c3_103] : memref<2x22x22xf32, #tpu.memory_space<vmem>>, vector<1x1x16xf32>
    %155 = vector.shape_cast %154 : vector<1x1x16xf32> to vector<1x16xf32>
    %156 = vector.shape_cast %153 : vector<1x16xf32> to vector<1x1x16xf32>
    tpu.vector_store %arg5[%c0_102, %c15, %c3_103], %156 {strides = array<i32>} : memref<2x22x22xf32, #tpu.memory_space<vmem>>, vector<1x1x16xf32>,
    %157 = vector.extract_strided_slice %48 {offsets = [0, 192], sizes = [1, 16], strides = [1, 1]} : vector<1x256xf32> to vector<1x16xf32>
    %c1_104 = arith.constant 1 : index
    %c15_105 = arith.constant 15 : index
    %c3_106 = arith.constant 3 : index
    %158 = vector.load %arg5[%c1_104, %c15_105, %c3_106] : memref<2x22x22xf32, #tpu.memory_space<vmem>>, vector<1x1x16xf32>
    %159 = vector.shape_cast %158 : vector<1x1x16xf32> to vector<1x16xf32>
    %160 = vector.shape_cast %157 : vector<1x16xf32> to vector<1x1x16xf32>
    tpu.vector_store %arg5[%c1_104, %c15_105, %c3_106], %160 {strides = array<i32>} : memref<2x22x22xf32, #tpu.memory_space<vmem>>, vector<1x1x16xf32>,
    %161 = vector.extract_strided_slice %46 {offsets = [0, 208], sizes = [1, 16], strides = [1, 1]} : vector<1x256xf32> to vector<1x16xf32>
    %c0_107 = arith.constant 0 : index
    %c16 = arith.constant 16 : index
    %c3_108 = arith.constant 3 : index
    %162 = vector.load %arg5[%c0_107, %c16, %c3_108] : memref<2x22x22xf32, #tpu.memory_space<vmem>>, vector<1x1x16xf32>
    %163 = vector.shape_cast %162 : vector<1x1x16xf32> to vector<1x16xf32>
    %164 = vector.shape_cast %161 : vector<1x16xf32> to vector<1x1x16xf32>
    tpu.vector_store %arg5[%c0_107, %c16, %c3_108], %164 {strides = array<i32>} : memref<2x22x22xf32, #tpu.memory_space<vmem>>, vector<1x1x16xf32>,
    %165 = vector.extract_strided_slice %48 {offsets = [0, 208], sizes = [1, 16], strides = [1, 1]} : vector<1x256xf32> to vector<1x16xf32>
    %c1_109 = arith.constant 1 : index
    %c16_110 = arith.constant 16 : index
    %c3_111 = arith.constant 3 : index
    %166 = vector.load %arg5[%c1_109, %c16_110, %c3_111] : memref<2x22x22xf32, #tpu.memory_space<vmem>>, vector<1x1x16xf32>
    %167 = vector.shape_cast %166 : vector<1x1x16xf32> to vector<1x16xf32>
    %168 = vector.shape_cast %165 : vector<1x16xf32> to vector<1x1x16xf32>
    tpu.vector_store %arg5[%c1_109, %c16_110, %c3_111], %168 {strides = array<i32>} : memref<2x22x22xf32, #tpu.memory_space<vmem>>, vector<1x1x16xf32>,
    %169 = vector.extract_strided_slice %46 {offsets = [0, 224], sizes = [1, 16], strides = [1, 1]} : vector<1x256xf32> to vector<1x16xf32>
    %c0_112 = arith.constant 0 : index
    %c17 = arith.constant 17 : index
    %c3_113 = arith.constant 3 : index
    %170 = vector.load %arg5[%c0_112, %c17, %c3_113] : memref<2x22x22xf32, #tpu.memory_space<vmem>>, vector<1x1x16xf32>
    %171 = vector.shape_cast %170 : vector<1x1x16xf32> to vector<1x16xf32>
    %172 = vector.shape_cast %169 : vector<1x16xf32> to vector<1x1x16xf32>
    tpu.vector_store %arg5[%c0_112, %c17, %c3_113], %172 {strides = array<i32>} : memref<2x22x22xf32, #tpu.memory_space<vmem>>, vector<1x1x16xf32>,
    %173 = vector.extract_strided_slice %48 {offsets = [0, 224], sizes = [1, 16], strides = [1, 1]} : vector<1x256xf32> to vector<1x16xf32>
    %c1_114 = arith.constant 1 : index
    %c17_115 = arith.constant 17 : index
    %c3_116 = arith.constant 3 : index
    %174 = vector.load %arg5[%c1_114, %c17_115, %c3_116] : memref<2x22x22xf32, #tpu.memory_space<vmem>>, vector<1x1x16xf32>
    %175 = vector.shape_cast %174 : vector<1x1x16xf32> to vector<1x16xf32>
    %176 = vector.shape_cast %173 : vector<1x16xf32> to vector<1x1x16xf32>
    tpu.vector_store %arg5[%c1_114, %c17_115, %c3_116], %176 {strides = array<i32>} : memref<2x22x22xf32, #tpu.memory_space<vmem>>, vector<1x1x16xf32>,
    %177 = vector.extract_strided_slice %46 {offsets = [0, 240], sizes = [1, 16], strides = [1, 1]} : vector<1x256xf32> to vector<1x16xf32>
    %c0_117 = arith.constant 0 : index
    %c18 = arith.constant 18 : index
    %c3_118 = arith.constant 3 : index
    %178 = vector.load %arg5[%c0_117, %c18, %c3_118] : memref<2x22x22xf32, #tpu.memory_space<vmem>>, vector<1x1x16xf32>
    %179 = vector.shape_cast %178 : vector<1x1x16xf32> to vector<1x16xf32>
    %180 = vector.shape_cast %177 : vector<1x16xf32> to vector<1x1x16xf32>
    tpu.vector_store %arg5[%c0_117, %c18, %c3_118], %180 {strides = array<i32>} : memref<2x22x22xf32, #tpu.memory_space<vmem>>, vector<1x1x16xf32>,
    %181 = vector.extract_strided_slice %48 {offsets = [0, 240], sizes = [1, 16], strides = [1, 1]} : vector<1x256xf32> to vector<1x16xf32>
    %c1_119 = arith.constant 1 : index
    %c18_120 = arith.constant 18 : index
    %c3_121 = arith.constant 3 : index
    %182 = vector.load %arg5[%c1_119, %c18_120, %c3_121] : memref<2x22x22xf32, #tpu.memory_space<vmem>>, vector<1x1x16xf32>
    %183 = vector.shape_cast %182 : vector<1x1x16xf32> to vector<1x16xf32>
    %184 = vector.shape_cast %181 : vector<1x16xf32> to vector<1x1x16xf32>
    tpu.vector_store %arg5[%c1_119, %c18_120, %c3_121], %184 {strides = array<i32>} : memref<2x22x22xf32, #tpu.memory_space<vmem>>, vector<1x1x16xf32>,
    %c0_122 = arith.constant 0 : index
    %185 = memref.load %arg2[%c0_122] : memref<98xf32, #tpu.memory_space<smem>>
    %c1_123 = arith.constant 1 : index
    %186 = memref.load %arg2[%c1_123] : memref<98xf32, #tpu.memory_space<smem>>
    %c2_124 = arith.constant 2 : index
    %187 = memref.load %arg2[%c2_124] : memref<98xf32, #tpu.memory_space<smem>>
    %c3_125 = arith.constant 3 : index
    %188 = memref.load %arg2[%c3_125] : memref<98xf32, #tpu.memory_space<smem>>
    %c4_126 = arith.constant 4 : index
    %189 = memref.load %arg2[%c4_126] : memref<98xf32, #tpu.memory_space<smem>>
    %c5_127 = arith.constant 5 : index
    %190 = memref.load %arg2[%c5_127] : memref<98xf32, #tpu.memory_space<smem>>
    %c6_128 = arith.constant 6 : index
    %191 = memref.load %arg2[%c6_128] : memref<98xf32, #tpu.memory_space<smem>>
    %c7_129 = arith.constant 7 : index
    %192 = memref.load %arg2[%c7_129] : memref<98xf32, #tpu.memory_space<smem>>
    %c8_130 = arith.constant 8 : index
    %193 = memref.load %arg2[%c8_130] : memref<98xf32, #tpu.memory_space<smem>>
    %c9_131 = arith.constant 9 : index
    %194 = memref.load %arg2[%c9_131] : memref<98xf32, #tpu.memory_space<smem>>
    %c10_132 = arith.constant 10 : index
    %195 = memref.load %arg2[%c10_132] : memref<98xf32, #tpu.memory_space<smem>>
    %c11_133 = arith.constant 11 : index
    %196 = memref.load %arg2[%c11_133] : memref<98xf32, #tpu.memory_space<smem>>
    %c12_134 = arith.constant 12 : index
    %197 = memref.load %arg2[%c12_134] : memref<98xf32, #tpu.memory_space<smem>>
    %c13_135 = arith.constant 13 : index
    %198 = memref.load %arg2[%c13_135] : memref<98xf32, #tpu.memory_space<smem>>
    %c14_136 = arith.constant 14 : index
    %199 = memref.load %arg2[%c14_136] : memref<98xf32, #tpu.memory_space<smem>>
    %c15_137 = arith.constant 15 : index
    %200 = memref.load %arg2[%c15_137] : memref<98xf32, #tpu.memory_space<smem>>
    %c16_138 = arith.constant 16 : index
    %201 = memref.load %arg2[%c16_138] : memref<98xf32, #tpu.memory_space<smem>>
    %c17_139 = arith.constant 17 : index
    %202 = memref.load %arg2[%c17_139] : memref<98xf32, #tpu.memory_space<smem>>
    %c18_140 = arith.constant 18 : index
    %203 = memref.load %arg2[%c18_140] : memref<98xf32, #tpu.memory_space<smem>>
    %c19_141 = arith.constant 19 : index
    %204 = memref.load %arg2[%c19_141] : memref<98xf32, #tpu.memory_space<smem>>
    %c20 = arith.constant 20 : index
    %205 = memref.load %arg2[%c20] : memref<98xf32, #tpu.memory_space<smem>>
    %c21 = arith.constant 21 : index
    %206 = memref.load %arg2[%c21] : memref<98xf32, #tpu.memory_space<smem>>
    %c22 = arith.constant 22 : index
    %207 = memref.load %arg2[%c22] : memref<98xf32, #tpu.memory_space<smem>>
    %c23 = arith.constant 23 : index
    %208 = memref.load %arg2[%c23] : memref<98xf32, #tpu.memory_space<smem>>
    %c24 = arith.constant 24 : index
    %209 = memref.load %arg2[%c24] : memref<98xf32, #tpu.memory_space<smem>>
    %c25 = arith.constant 25 : index
    %210 = memref.load %arg2[%c25] : memref<98xf32, #tpu.memory_space<smem>>
    %c26 = arith.constant 26 : index
    %211 = memref.load %arg2[%c26] : memref<98xf32, #tpu.memory_space<smem>>
    %c27 = arith.constant 27 : index
    %212 = memref.load %arg2[%c27] : memref<98xf32, #tpu.memory_space<smem>>
    %c28 = arith.constant 28 : index
    %213 = memref.load %arg2[%c28] : memref<98xf32, #tpu.memory_space<smem>>
    %c29 = arith.constant 29 : index
    %214 = memref.load %arg2[%c29] : memref<98xf32, #tpu.memory_space<smem>>
    %c30 = arith.constant 30 : index
    %215 = memref.load %arg2[%c30] : memref<98xf32, #tpu.memory_space<smem>>
    %c31 = arith.constant 31 : index
    %216 = memref.load %arg2[%c31] : memref<98xf32, #tpu.memory_space<smem>>
    %c32 = arith.constant 32 : index
    %217 = memref.load %arg2[%c32] : memref<98xf32, #tpu.memory_space<smem>>
    %c33 = arith.constant 33 : index
    %218 = memref.load %arg2[%c33] : memref<98xf32, #tpu.memory_space<smem>>
    %c34 = arith.constant 34 : index
    %219 = memref.load %arg2[%c34] : memref<98xf32, #tpu.memory_space<smem>>
    %c35 = arith.constant 35 : index
    %220 = memref.load %arg2[%c35] : memref<98xf32, #tpu.memory_space<smem>>
    %c36 = arith.constant 36 : index
    %221 = memref.load %arg2[%c36] : memref<98xf32, #tpu.memory_space<smem>>
    %c37 = arith.constant 37 : index
    %222 = memref.load %arg2[%c37] : memref<98xf32, #tpu.memory_space<smem>>
    %c38 = arith.constant 38 : index
    %223 = memref.load %arg2[%c38] : memref<98xf32, #tpu.memory_space<smem>>
    %c39 = arith.constant 39 : index
    %224 = memref.load %arg2[%c39] : memref<98xf32, #tpu.memory_space<smem>>
    %c40 = arith.constant 40 : index
    %225 = memref.load %arg2[%c40] : memref<98xf32, #tpu.memory_space<smem>>
    %c41 = arith.constant 41 : index
    %226 = memref.load %arg2[%c41] : memref<98xf32, #tpu.memory_space<smem>>
    %c42 = arith.constant 42 : index
    %227 = memref.load %arg2[%c42] : memref<98xf32, #tpu.memory_space<smem>>
    %c43 = arith.constant 43 : index
    %228 = memref.load %arg2[%c43] : memref<98xf32, #tpu.memory_space<smem>>
    %c44 = arith.constant 44 : index
    %229 = memref.load %arg2[%c44] : memref<98xf32, #tpu.memory_space<smem>>
    %c45 = arith.constant 45 : index
    %230 = memref.load %arg2[%c45] : memref<98xf32, #tpu.memory_space<smem>>
    %c46 = arith.constant 46 : index
    %231 = memref.load %arg2[%c46] : memref<98xf32, #tpu.memory_space<smem>>
    %c47 = arith.constant 47 : index
    %232 = memref.load %arg2[%c47] : memref<98xf32, #tpu.memory_space<smem>>
    %c48 = arith.constant 48 : index
    %233 = memref.load %arg2[%c48] : memref<98xf32, #tpu.memory_space<smem>>
    %c49 = arith.constant 49 : index
    %234 = memref.load %arg2[%c49] : memref<98xf32, #tpu.memory_space<smem>>
    %c50 = arith.constant 50 : index
    %235 = memref.load %arg2[%c50] : memref<98xf32, #tpu.memory_space<smem>>
    %c51 = arith.constant 51 : index
    %236 = memref.load %arg2[%c51] : memref<98xf32, #tpu.memory_space<smem>>
    %c52 = arith.constant 52 : index
    %237 = memref.load %arg2[%c52] : memref<98xf32, #tpu.memory_space<smem>>
    %c53 = arith.constant 53 : index
    %238 = memref.load %arg2[%c53] : memref<98xf32, #tpu.memory_space<smem>>
    %c54 = arith.constant 54 : index
    %239 = memref.load %arg2[%c54] : memref<98xf32, #tpu.memory_space<smem>>
    %c55 = arith.constant 55 : index
    %240 = memref.load %arg2[%c55] : memref<98xf32, #tpu.memory_space<smem>>
    %c56 = arith.constant 56 : index
    %241 = memref.load %arg2[%c56] : memref<98xf32, #tpu.memory_space<smem>>
    %c57 = arith.constant 57 : index
    %242 = memref.load %arg2[%c57] : memref<98xf32, #tpu.memory_space<smem>>
    %c58 = arith.constant 58 : index
    %243 = memref.load %arg2[%c58] : memref<98xf32, #tpu.memory_space<smem>>
    %c59 = arith.constant 59 : index
    %244 = memref.load %arg2[%c59] : memref<98xf32, #tpu.memory_space<smem>>
    %c60 = arith.constant 60 : index
    %245 = memref.load %arg2[%c60] : memref<98xf32, #tpu.memory_space<smem>>
    %c61 = arith.constant 61 : index
    %246 = memref.load %arg2[%c61] : memref<98xf32, #tpu.memory_space<smem>>
    %c62 = arith.constant 62 : index
    %247 = memref.load %arg2[%c62] : memref<98xf32, #tpu.memory_space<smem>>
    %c63 = arith.constant 63 : index
    %248 = memref.load %arg2[%c63] : memref<98xf32, #tpu.memory_space<smem>>
    %c64 = arith.constant 64 : index
    %249 = memref.load %arg2[%c64] : memref<98xf32, #tpu.memory_space<smem>>
    %c65 = arith.constant 65 : index
    %250 = memref.load %arg2[%c65] : memref<98xf32, #tpu.memory_space<smem>>
    %c66 = arith.constant 66 : index
    %251 = memref.load %arg2[%c66] : memref<98xf32, #tpu.memory_space<smem>>
    %c67 = arith.constant 67 : index
    %252 = memref.load %arg2[%c67] : memref<98xf32, #tpu.memory_space<smem>>
    %c68 = arith.constant 68 : index
    %253 = memref.load %arg2[%c68] : memref<98xf32, #tpu.memory_space<smem>>
    %c69 = arith.constant 69 : index
    %254 = memref.load %arg2[%c69] : memref<98xf32, #tpu.memory_space<smem>>
    %c70 = arith.constant 70 : index
    %255 = memref.load %arg2[%c70] : memref<98xf32, #tpu.memory_space<smem>>
    %c71 = arith.constant 71 : index
    %256 = memref.load %arg2[%c71] : memref<98xf32, #tpu.memory_space<smem>>
    %c72 = arith.constant 72 : index
    %257 = memref.load %arg2[%c72] : memref<98xf32, #tpu.memory_space<smem>>
    %c73 = arith.constant 73 : index
    %258 = memref.load %arg2[%c73] : memref<98xf32, #tpu.memory_space<smem>>
    %c74 = arith.constant 74 : index
    %259 = memref.load %arg2[%c74] : memref<98xf32, #tpu.memory_space<smem>>
    %c75 = arith.constant 75 : index
    %260 = memref.load %arg2[%c75] : memref<98xf32, #tpu.memory_space<smem>>
    %c76 = arith.constant 76 : index
    %261 = memref.load %arg2[%c76] : memref<98xf32, #tpu.memory_space<smem>>
    %c77 = arith.constant 77 : index
    %262 = memref.load %arg2[%c77] : memref<98xf32, #tpu.memory_space<smem>>
    %c78 = arith.constant 78 : index
    %263 = memref.load %arg2[%c78] : memref<98xf32, #tpu.memory_space<smem>>
    %c79 = arith.constant 79 : index
    %264 = memref.load %arg2[%c79] : memref<98xf32, #tpu.memory_space<smem>>
    %c80 = arith.constant 80 : index
    %265 = memref.load %arg2[%c80] : memref<98xf32, #tpu.memory_space<smem>>
    %c81 = arith.constant 81 : index
    %266 = memref.load %arg2[%c81] : memref<98xf32, #tpu.memory_space<smem>>
    %c82 = arith.constant 82 : index
    %267 = memref.load %arg2[%c82] : memref<98xf32, #tpu.memory_space<smem>>
    %c83 = arith.constant 83 : index
    %268 = memref.load %arg2[%c83] : memref<98xf32, #tpu.memory_space<smem>>
    %c84 = arith.constant 84 : index
    %269 = memref.load %arg2[%c84] : memref<98xf32, #tpu.memory_space<smem>>
    %c85 = arith.constant 85 : index
    %270 = memref.load %arg2[%c85] : memref<98xf32, #tpu.memory_space<smem>>
    %c86 = arith.constant 86 : index
    %271 = memref.load %arg2[%c86] : memref<98xf32, #tpu.memory_space<smem>>
    %c87 = arith.constant 87 : index
    %272 = memref.load %arg2[%c87] : memref<98xf32, #tpu.memory_space<smem>>
    %c88 = arith.constant 88 : index
    %273 = memref.load %arg2[%c88] : memref<98xf32, #tpu.memory_space<smem>>
    %c89 = arith.constant 89 : index
    %274 = memref.load %arg2[%c89] : memref<98xf32, #tpu.memory_space<smem>>
    %c90 = arith.constant 90 : index
    %275 = memref.load %arg2[%c90] : memref<98xf32, #tpu.memory_space<smem>>
    %c91 = arith.constant 91 : index
    %276 = memref.load %arg2[%c91] : memref<98xf32, #tpu.memory_space<smem>>
    %c92 = arith.constant 92 : index
    %277 = memref.load %arg2[%c92] : memref<98xf32, #tpu.memory_space<smem>>
    %c93 = arith.constant 93 : index
    %278 = memref.load %arg2[%c93] : memref<98xf32, #tpu.memory_space<smem>>
    %c94 = arith.constant 94 : index
    %279 = memref.load %arg2[%c94] : memref<98xf32, #tpu.memory_space<smem>>
    %c95 = arith.constant 95 : index
    %280 = memref.load %arg2[%c95] : memref<98xf32, #tpu.memory_space<smem>>
    %c96 = arith.constant 96 : index
    %281 = memref.load %arg2[%c96] : memref<98xf32, #tpu.memory_space<smem>>
    %c97 = arith.constant 97 : index
    %282 = memref.load %arg2[%c97] : memref<98xf32, #tpu.memory_space<smem>>
    %cst_142 = arith.constant 0.000000e+00 : f32
    %283 = vector.broadcast %cst_142 : f32 to vector<16x16xf32>
    %c0_143 = arith.constant 0 : index
    %c0_144 = arith.constant 0 : index
    %c0_145 = arith.constant 0 : index
    %284 = vector.load %arg5[%c0_143, %c0_144, %c0_145] : memref<2x22x22xf32, #tpu.memory_space<vmem>>, vector<1x22x16xf32>
    %285 = vector.shape_cast %284 : vector<1x22x16xf32> to vector<22x16xf32>
    %286 = vector.extract_strided_slice %285 {offsets = [0, 0], sizes = [16, 16], strides = [1, 1]} : vector<22x16xf32> to vector<16x16xf32>
    %287 = vector.broadcast %185 : f32 to vector<16x16xf32>
    %288 = arith.mulf %287, %286 : vector<16x16xf32>
    %289 = arith.addf %283, %288 : vector<16x16xf32>
    %290 = vector.extract_strided_slice %285 {offsets = [1, 0], sizes = [16, 16], strides = [1, 1]} : vector<22x16xf32> to vector<16x16xf32>
    %291 = vector.broadcast %192 : f32 to vector<16x16xf32>
    %292 = arith.mulf %291, %290 : vector<16x16xf32>
    %293 = arith.addf %289, %292 : vector<16x16xf32>
    %294 = vector.extract_strided_slice %285 {offsets = [2, 0], sizes = [16, 16], strides = [1, 1]} : vector<22x16xf32> to vector<16x16xf32>
    %295 = vector.broadcast %199 : f32 to vector<16x16xf32>
    %296 = arith.mulf %295, %294 : vector<16x16xf32>
    %297 = arith.addf %293, %296 : vector<16x16xf32>
    %298 = vector.extract_strided_slice %285 {offsets = [3, 0], sizes = [16, 16], strides = [1, 1]} : vector<22x16xf32> to vector<16x16xf32>
    %299 = vector.broadcast %206 : f32 to vector<16x16xf32>
    %300 = arith.mulf %299, %298 : vector<16x16xf32>
    %301 = arith.addf %297, %300 : vector<16x16xf32>
    %302 = vector.extract_strided_slice %285 {offsets = [4, 0], sizes = [16, 16], strides = [1, 1]} : vector<22x16xf32> to vector<16x16xf32>
    %303 = vector.broadcast %213 : f32 to vector<16x16xf32>
    %304 = arith.mulf %303, %302 : vector<16x16xf32>
    %305 = arith.addf %301, %304 : vector<16x16xf32>
    %306 = vector.extract_strided_slice %285 {offsets = [5, 0], sizes = [16, 16], strides = [1, 1]} : vector<22x16xf32> to vector<16x16xf32>
    %307 = vector.broadcast %220 : f32 to vector<16x16xf32>
    %308 = arith.mulf %307, %306 : vector<16x16xf32>
    %309 = arith.addf %305, %308 : vector<16x16xf32>
    %310 = vector.extract_strided_slice %285 {offsets = [6, 0], sizes = [16, 16], strides = [1, 1]} : vector<22x16xf32> to vector<16x16xf32>
    %311 = vector.broadcast %227 : f32 to vector<16x16xf32>
    %312 = arith.mulf %311, %310 : vector<16x16xf32>
    %313 = arith.addf %309, %312 : vector<16x16xf32>
    %c0_146 = arith.constant 0 : index
    %c0_147 = arith.constant 0 : index
    %c1_148 = arith.constant 1 : index
    %314 = vector.load %arg5[%c0_146, %c0_147, %c1_148] : memref<2x22x22xf32, #tpu.memory_space<vmem>>, vector<1x22x16xf32>
    %315 = vector.shape_cast %314 : vector<1x22x16xf32> to vector<22x16xf32>
    %316 = vector.extract_strided_slice %315 {offsets = [0, 0], sizes = [16, 16], strides = [1, 1]} : vector<22x16xf32> to vector<16x16xf32>
    %317 = vector.broadcast %186 : f32 to vector<16x16xf32>
    %318 = arith.mulf %317, %316 : vector<16x16xf32>
    %319 = arith.addf %313, %318 : vector<16x16xf32>
    %320 = vector.extract_strided_slice %315 {offsets = [1, 0], sizes = [16, 16], strides = [1, 1]} : vector<22x16xf32> to vector<16x16xf32>
    %321 = vector.broadcast %193 : f32 to vector<16x16xf32>
    %322 = arith.mulf %321, %320 : vector<16x16xf32>
    %323 = arith.addf %319, %322 : vector<16x16xf32>
    %324 = vector.extract_strided_slice %315 {offsets = [2, 0], sizes = [16, 16], strides = [1, 1]} : vector<22x16xf32> to vector<16x16xf32>
    %325 = vector.broadcast %200 : f32 to vector<16x16xf32>
    %326 = arith.mulf %325, %324 : vector<16x16xf32>
    %327 = arith.addf %323, %326 : vector<16x16xf32>
    %328 = vector.extract_strided_slice %315 {offsets = [3, 0], sizes = [16, 16], strides = [1, 1]} : vector<22x16xf32> to vector<16x16xf32>
    %329 = vector.broadcast %207 : f32 to vector<16x16xf32>
    %330 = arith.mulf %329, %328 : vector<16x16xf32>
    %331 = arith.addf %327, %330 : vector<16x16xf32>
    %332 = vector.extract_strided_slice %315 {offsets = [4, 0], sizes = [16, 16], strides = [1, 1]} : vector<22x16xf32> to vector<16x16xf32>
    %333 = vector.broadcast %214 : f32 to vector<16x16xf32>
    %334 = arith.mulf %333, %332 : vector<16x16xf32>
    %335 = arith.addf %331, %334 : vector<16x16xf32>
    %336 = vector.extract_strided_slice %315 {offsets = [5, 0], sizes = [16, 16], strides = [1, 1]} : vector<22x16xf32> to vector<16x16xf32>
    %337 = vector.broadcast %221 : f32 to vector<16x16xf32>
    %338 = arith.mulf %337, %336 : vector<16x16xf32>
    %339 = arith.addf %335, %338 : vector<16x16xf32>
    %340 = vector.extract_strided_slice %315 {offsets = [6, 0], sizes = [16, 16], strides = [1, 1]} : vector<22x16xf32> to vector<16x16xf32>
    %341 = vector.broadcast %228 : f32 to vector<16x16xf32>
    %342 = arith.mulf %341, %340 : vector<16x16xf32>
    %343 = arith.addf %339, %342 : vector<16x16xf32>
    %c0_149 = arith.constant 0 : index
    %c0_150 = arith.constant 0 : index
    %c2_151 = arith.constant 2 : index
    %344 = vector.load %arg5[%c0_149, %c0_150, %c2_151] : memref<2x22x22xf32, #tpu.memory_space<vmem>>, vector<1x22x16xf32>
    %345 = vector.shape_cast %344 : vector<1x22x16xf32> to vector<22x16xf32>
    %346 = vector.extract_strided_slice %345 {offsets = [0, 0], sizes = [16, 16], strides = [1, 1]} : vector<22x16xf32> to vector<16x16xf32>
    %347 = vector.broadcast %187 : f32 to vector<16x16xf32>
    %348 = arith.mulf %347, %346 : vector<16x16xf32>
    %349 = arith.addf %343, %348 : vector<16x16xf32>
    %350 = vector.extract_strided_slice %345 {offsets = [1, 0], sizes = [16, 16], strides = [1, 1]} : vector<22x16xf32> to vector<16x16xf32>
    %351 = vector.broadcast %194 : f32 to vector<16x16xf32>
    %352 = arith.mulf %351, %350 : vector<16x16xf32>
    %353 = arith.addf %349, %352 : vector<16x16xf32>
    %354 = vector.extract_strided_slice %345 {offsets = [2, 0], sizes = [16, 16], strides = [1, 1]} : vector<22x16xf32> to vector<16x16xf32>
    %355 = vector.broadcast %201 : f32 to vector<16x16xf32>
    %356 = arith.mulf %355, %354 : vector<16x16xf32>
    %357 = arith.addf %353, %356 : vector<16x16xf32>
    %358 = vector.extract_strided_slice %345 {offsets = [3, 0], sizes = [16, 16], strides = [1, 1]} : vector<22x16xf32> to vector<16x16xf32>
    %359 = vector.broadcast %208 : f32 to vector<16x16xf32>
    %360 = arith.mulf %359, %358 : vector<16x16xf32>
    %361 = arith.addf %357, %360 : vector<16x16xf32>
    %362 = vector.extract_strided_slice %345 {offsets = [4, 0], sizes = [16, 16], strides = [1, 1]} : vector<22x16xf32> to vector<16x16xf32>
    %363 = vector.broadcast %215 : f32 to vector<16x16xf32>
    %364 = arith.mulf %363, %362 : vector<16x16xf32>
    %365 = arith.addf %361, %364 : vector<16x16xf32>
    %366 = vector.extract_strided_slice %345 {offsets = [5, 0], sizes = [16, 16], strides = [1, 1]} : vector<22x16xf32> to vector<16x16xf32>
    %367 = vector.broadcast %222 : f32 to vector<16x16xf32>
    %368 = arith.mulf %367, %366 : vector<16x16xf32>
    %369 = arith.addf %365, %368 : vector<16x16xf32>
    %370 = vector.extract_strided_slice %345 {offsets = [6, 0], sizes = [16, 16], strides = [1, 1]} : vector<22x16xf32> to vector<16x16xf32>
    %371 = vector.broadcast %229 : f32 to vector<16x16xf32>
    %372 = arith.mulf %371, %370 : vector<16x16xf32>
    %373 = arith.addf %369, %372 : vector<16x16xf32>
    %c0_152 = arith.constant 0 : index
    %c0_153 = arith.constant 0 : index
    %c3_154 = arith.constant 3 : index
    %374 = vector.load %arg5[%c0_152, %c0_153, %c3_154] : memref<2x22x22xf32, #tpu.memory_space<vmem>>, vector<1x22x16xf32>
    %375 = vector.shape_cast %374 : vector<1x22x16xf32> to vector<22x16xf32>
    %376 = vector.extract_strided_slice %375 {offsets = [0, 0], sizes = [16, 16], strides = [1, 1]} : vector<22x16xf32> to vector<16x16xf32>
    %377 = vector.broadcast %188 : f32 to vector<16x16xf32>
    %378 = arith.mulf %377, %376 : vector<16x16xf32>
    %379 = arith.addf %373, %378 : vector<16x16xf32>
    %380 = vector.extract_strided_slice %375 {offsets = [1, 0], sizes = [16, 16], strides = [1, 1]} : vector<22x16xf32> to vector<16x16xf32>
    %381 = vector.broadcast %195 : f32 to vector<16x16xf32>
    %382 = arith.mulf %381, %380 : vector<16x16xf32>
    %383 = arith.addf %379, %382 : vector<16x16xf32>
    %384 = vector.extract_strided_slice %375 {offsets = [2, 0], sizes = [16, 16], strides = [1, 1]} : vector<22x16xf32> to vector<16x16xf32>
    %385 = vector.broadcast %202 : f32 to vector<16x16xf32>
    %386 = arith.mulf %385, %384 : vector<16x16xf32>
    %387 = arith.addf %383, %386 : vector<16x16xf32>
    %388 = vector.extract_strided_slice %375 {offsets = [3, 0], sizes = [16, 16], strides = [1, 1]} : vector<22x16xf32> to vector<16x16xf32>
    %389 = vector.broadcast %209 : f32 to vector<16x16xf32>
    %390 = arith.mulf %389, %388 : vector<16x16xf32>
    %391 = arith.addf %387, %390 : vector<16x16xf32>
    %392 = vector.extract_strided_slice %375 {offsets = [4, 0], sizes = [16, 16], strides = [1, 1]} : vector<22x16xf32> to vector<16x16xf32>
    %393 = vector.broadcast %216 : f32 to vector<16x16xf32>
    %394 = arith.mulf %393, %392 : vector<16x16xf32>
    %395 = arith.addf %391, %394 : vector<16x16xf32>
    %396 = vector.extract_strided_slice %375 {offsets = [5, 0], sizes = [16, 16], strides = [1, 1]} : vector<22x16xf32> to vector<16x16xf32>
    %397 = vector.broadcast %223 : f32 to vector<16x16xf32>
    %398 = arith.mulf %397, %396 : vector<16x16xf32>
    %399 = arith.addf %395, %398 : vector<16x16xf32>
    %400 = vector.extract_strided_slice %375 {offsets = [6, 0], sizes = [16, 16], strides = [1, 1]} : vector<22x16xf32> to vector<16x16xf32>
    %401 = vector.broadcast %230 : f32 to vector<16x16xf32>
    %402 = arith.mulf %401, %400 : vector<16x16xf32>
    %403 = arith.addf %399, %402 : vector<16x16xf32>
    %c0_155 = arith.constant 0 : index
    %c0_156 = arith.constant 0 : index
    %c4_157 = arith.constant 4 : index
    %404 = vector.load %arg5[%c0_155, %c0_156, %c4_157] : memref<2x22x22xf32, #tpu.memory_space<vmem>>, vector<1x22x16xf32>
    %405 = vector.shape_cast %404 : vector<1x22x16xf32> to vector<22x16xf32>
    %406 = vector.extract_strided_slice %405 {offsets = [0, 0], sizes = [16, 16], strides = [1, 1]} : vector<22x16xf32> to vector<16x16xf32>
    %407 = vector.broadcast %189 : f32 to vector<16x16xf32>
    %408 = arith.mulf %407, %406 : vector<16x16xf32>
    %409 = arith.addf %403, %408 : vector<16x16xf32>
    %410 = vector.extract_strided_slice %405 {offsets = [1, 0], sizes = [16, 16], strides = [1, 1]} : vector<22x16xf32> to vector<16x16xf32>
    %411 = vector.broadcast %196 : f32 to vector<16x16xf32>
    %412 = arith.mulf %411, %410 : vector<16x16xf32>
    %413 = arith.addf %409, %412 : vector<16x16xf32>
    %414 = vector.extract_strided_slice %405 {offsets = [2, 0], sizes = [16, 16], strides = [1, 1]} : vector<22x16xf32> to vector<16x16xf32>
    %415 = vector.broadcast %203 : f32 to vector<16x16xf32>
    %416 = arith.mulf %415, %414 : vector<16x16xf32>
    %417 = arith.addf %413, %416 : vector<16x16xf32>
    %418 = vector.extract_strided_slice %405 {offsets = [3, 0], sizes = [16, 16], strides = [1, 1]} : vector<22x16xf32> to vector<16x16xf32>
    %419 = vector.broadcast %210 : f32 to vector<16x16xf32>
    %420 = arith.mulf %419, %418 : vector<16x16xf32>
    %421 = arith.addf %417, %420 : vector<16x16xf32>
    %422 = vector.extract_strided_slice %405 {offsets = [4, 0], sizes = [16, 16], strides = [1, 1]} : vector<22x16xf32> to vector<16x16xf32>
    %423 = vector.broadcast %217 : f32 to vector<16x16xf32>
    %424 = arith.mulf %423, %422 : vector<16x16xf32>
    %425 = arith.addf %421, %424 : vector<16x16xf32>
    %426 = vector.extract_strided_slice %405 {offsets = [5, 0], sizes = [16, 16], strides = [1, 1]} : vector<22x16xf32> to vector<16x16xf32>
    %427 = vector.broadcast %224 : f32 to vector<16x16xf32>
    %428 = arith.mulf %427, %426 : vector<16x16xf32>
    %429 = arith.addf %425, %428 : vector<16x16xf32>
    %430 = vector.extract_strided_slice %405 {offsets = [6, 0], sizes = [16, 16], strides = [1, 1]} : vector<22x16xf32> to vector<16x16xf32>
    %431 = vector.broadcast %231 : f32 to vector<16x16xf32>
    %432 = arith.mulf %431, %430 : vector<16x16xf32>
    %433 = arith.addf %429, %432 : vector<16x16xf32>
    %c0_158 = arith.constant 0 : index
    %c0_159 = arith.constant 0 : index
    %c5_160 = arith.constant 5 : index
    %434 = vector.load %arg5[%c0_158, %c0_159, %c5_160] : memref<2x22x22xf32, #tpu.memory_space<vmem>>, vector<1x22x16xf32>
    %435 = vector.shape_cast %434 : vector<1x22x16xf32> to vector<22x16xf32>
    %436 = vector.extract_strided_slice %435 {offsets = [0, 0], sizes = [16, 16], strides = [1, 1]} : vector<22x16xf32> to vector<16x16xf32>
    %437 = vector.broadcast %190 : f32 to vector<16x16xf32>
    %438 = arith.mulf %437, %436 : vector<16x16xf32>
    %439 = arith.addf %433, %438 : vector<16x16xf32>
    %440 = vector.extract_strided_slice %435 {offsets = [1, 0], sizes = [16, 16], strides = [1, 1]} : vector<22x16xf32> to vector<16x16xf32>
    %441 = vector.broadcast %197 : f32 to vector<16x16xf32>
    %442 = arith.mulf %441, %440 : vector<16x16xf32>
    %443 = arith.addf %439, %442 : vector<16x16xf32>
    %444 = vector.extract_strided_slice %435 {offsets = [2, 0], sizes = [16, 16], strides = [1, 1]} : vector<22x16xf32> to vector<16x16xf32>
    %445 = vector.broadcast %204 : f32 to vector<16x16xf32>
    %446 = arith.mulf %445, %444 : vector<16x16xf32>
    %447 = arith.addf %443, %446 : vector<16x16xf32>
    %448 = vector.extract_strided_slice %435 {offsets = [3, 0], sizes = [16, 16], strides = [1, 1]} : vector<22x16xf32> to vector<16x16xf32>
    %449 = vector.broadcast %211 : f32 to vector<16x16xf32>
    %450 = arith.mulf %449, %448 : vector<16x16xf32>
    %451 = arith.addf %447, %450 : vector<16x16xf32>
    %452 = vector.extract_strided_slice %435 {offsets = [4, 0], sizes = [16, 16], strides = [1, 1]} : vector<22x16xf32> to vector<16x16xf32>
    %453 = vector.broadcast %218 : f32 to vector<16x16xf32>
    %454 = arith.mulf %453, %452 : vector<16x16xf32>
    %455 = arith.addf %451, %454 : vector<16x16xf32>
    %456 = vector.extract_strided_slice %435 {offsets = [5, 0], sizes = [16, 16], strides = [1, 1]} : vector<22x16xf32> to vector<16x16xf32>
    %457 = vector.broadcast %225 : f32 to vector<16x16xf32>
    %458 = arith.mulf %457, %456 : vector<16x16xf32>
    %459 = arith.addf %455, %458 : vector<16x16xf32>
    %460 = vector.extract_strided_slice %435 {offsets = [6, 0], sizes = [16, 16], strides = [1, 1]} : vector<22x16xf32> to vector<16x16xf32>
    %461 = vector.broadcast %232 : f32 to vector<16x16xf32>
    %462 = arith.mulf %461, %460 : vector<16x16xf32>
    %463 = arith.addf %459, %462 : vector<16x16xf32>
    %c0_161 = arith.constant 0 : index
    %c0_162 = arith.constant 0 : index
    %c6_163 = arith.constant 6 : index
    %464 = vector.load %arg5[%c0_161, %c0_162, %c6_163] : memref<2x22x22xf32, #tpu.memory_space<vmem>>, vector<1x22x16xf32>
    %465 = vector.shape_cast %464 : vector<1x22x16xf32> to vector<22x16xf32>
    %466 = vector.extract_strided_slice %465 {offsets = [0, 0], sizes = [16, 16], strides = [1, 1]} : vector<22x16xf32> to vector<16x16xf32>
    %467 = vector.broadcast %191 : f32 to vector<16x16xf32>
    %468 = arith.mulf %467, %466 : vector<16x16xf32>
    %469 = arith.addf %463, %468 : vector<16x16xf32>
    %470 = vector.extract_strided_slice %465 {offsets = [1, 0], sizes = [16, 16], strides = [1, 1]} : vector<22x16xf32> to vector<16x16xf32>
    %471 = vector.broadcast %198 : f32 to vector<16x16xf32>
    %472 = arith.mulf %471, %470 : vector<16x16xf32>
    %473 = arith.addf %469, %472 : vector<16x16xf32>
    %474 = vector.extract_strided_slice %465 {offsets = [2, 0], sizes = [16, 16], strides = [1, 1]} : vector<22x16xf32> to vector<16x16xf32>
    %475 = vector.broadcast %205 : f32 to vector<16x16xf32>
    %476 = arith.mulf %475, %474 : vector<16x16xf32>
    %477 = arith.addf %473, %476 : vector<16x16xf32>
    %478 = vector.extract_strided_slice %465 {offsets = [3, 0], sizes = [16, 16], strides = [1, 1]} : vector<22x16xf32> to vector<16x16xf32>
    %479 = vector.broadcast %212 : f32 to vector<16x16xf32>
    %480 = arith.mulf %479, %478 : vector<16x16xf32>
    %481 = arith.addf %477, %480 : vector<16x16xf32>
    %482 = vector.extract_strided_slice %465 {offsets = [4, 0], sizes = [16, 16], strides = [1, 1]} : vector<22x16xf32> to vector<16x16xf32>
    %483 = vector.broadcast %219 : f32 to vector<16x16xf32>
    %484 = arith.mulf %483, %482 : vector<16x16xf32>
    %485 = arith.addf %481, %484 : vector<16x16xf32>
    %486 = vector.extract_strided_slice %465 {offsets = [5, 0], sizes = [16, 16], strides = [1, 1]} : vector<22x16xf32> to vector<16x16xf32>
    %487 = vector.broadcast %226 : f32 to vector<16x16xf32>
    %488 = arith.mulf %487, %486 : vector<16x16xf32>
    %489 = arith.addf %485, %488 : vector<16x16xf32>
    %490 = vector.extract_strided_slice %465 {offsets = [6, 0], sizes = [16, 16], strides = [1, 1]} : vector<22x16xf32> to vector<16x16xf32>
    %491 = vector.broadcast %233 : f32 to vector<16x16xf32>
    %492 = arith.mulf %491, %490 : vector<16x16xf32>
    %493 = arith.addf %489, %492 : vector<16x16xf32>
    %c1_164 = arith.constant 1 : index
    %c0_165 = arith.constant 0 : index
    %c0_166 = arith.constant 0 : index
    %494 = vector.load %arg5[%c1_164, %c0_165, %c0_166] : memref<2x22x22xf32, #tpu.memory_space<vmem>>, vector<1x22x16xf32>
    %495 = vector.shape_cast %494 : vector<1x22x16xf32> to vector<22x16xf32>
    %496 = vector.extract_strided_slice %495 {offsets = [0, 0], sizes = [16, 16], strides = [1, 1]} : vector<22x16xf32> to vector<16x16xf32>
    %497 = vector.broadcast %234 : f32 to vector<16x16xf32>
    %498 = arith.mulf %497, %496 : vector<16x16xf32>
    %499 = arith.addf %493, %498 : vector<16x16xf32>
    %500 = vector.extract_strided_slice %495 {offsets = [1, 0], sizes = [16, 16], strides = [1, 1]} : vector<22x16xf32> to vector<16x16xf32>
    %501 = vector.broadcast %241 : f32 to vector<16x16xf32>
    %502 = arith.mulf %501, %500 : vector<16x16xf32>
    %503 = arith.addf %499, %502 : vector<16x16xf32>
    %504 = vector.extract_strided_slice %495 {offsets = [2, 0], sizes = [16, 16], strides = [1, 1]} : vector<22x16xf32> to vector<16x16xf32>
    %505 = vector.broadcast %248 : f32 to vector<16x16xf32>
    %506 = arith.mulf %505, %504 : vector<16x16xf32>
    %507 = arith.addf %503, %506 : vector<16x16xf32>
    %508 = vector.extract_strided_slice %495 {offsets = [3, 0], sizes = [16, 16], strides = [1, 1]} : vector<22x16xf32> to vector<16x16xf32>
    %509 = vector.broadcast %255 : f32 to vector<16x16xf32>
    %510 = arith.mulf %509, %508 : vector<16x16xf32>
    %511 = arith.addf %507, %510 : vector<16x16xf32>
    %512 = vector.extract_strided_slice %495 {offsets = [4, 0], sizes = [16, 16], strides = [1, 1]} : vector<22x16xf32> to vector<16x16xf32>
    %513 = vector.broadcast %262 : f32 to vector<16x16xf32>
    %514 = arith.mulf %513, %512 : vector<16x16xf32>
    %515 = arith.addf %511, %514 : vector<16x16xf32>
    %516 = vector.extract_strided_slice %495 {offsets = [5, 0], sizes = [16, 16], strides = [1, 1]} : vector<22x16xf32> to vector<16x16xf32>
    %517 = vector.broadcast %269 : f32 to vector<16x16xf32>
    %518 = arith.mulf %517, %516 : vector<16x16xf32>
    %519 = arith.addf %515, %518 : vector<16x16xf32>
    %520 = vector.extract_strided_slice %495 {offsets = [6, 0], sizes = [16, 16], strides = [1, 1]} : vector<22x16xf32> to vector<16x16xf32>
    %521 = vector.broadcast %276 : f32 to vector<16x16xf32>
    %522 = arith.mulf %521, %520 : vector<16x16xf32>
    %523 = arith.addf %519, %522 : vector<16x16xf32>
    %c1_167 = arith.constant 1 : index
    %c0_168 = arith.constant 0 : index
    %c1_169 = arith.constant 1 : index
    %524 = vector.load %arg5[%c1_167, %c0_168, %c1_169] : memref<2x22x22xf32, #tpu.memory_space<vmem>>, vector<1x22x16xf32>
    %525 = vector.shape_cast %524 : vector<1x22x16xf32> to vector<22x16xf32>
    %526 = vector.extract_strided_slice %525 {offsets = [0, 0], sizes = [16, 16], strides = [1, 1]} : vector<22x16xf32> to vector<16x16xf32>
    %527 = vector.broadcast %235 : f32 to vector<16x16xf32>
    %528 = arith.mulf %527, %526 : vector<16x16xf32>
    %529 = arith.addf %523, %528 : vector<16x16xf32>
    %530 = vector.extract_strided_slice %525 {offsets = [1, 0], sizes = [16, 16], strides = [1, 1]} : vector<22x16xf32> to vector<16x16xf32>
    %531 = vector.broadcast %242 : f32 to vector<16x16xf32>
    %532 = arith.mulf %531, %530 : vector<16x16xf32>
    %533 = arith.addf %529, %532 : vector<16x16xf32>
    %534 = vector.extract_strided_slice %525 {offsets = [2, 0], sizes = [16, 16], strides = [1, 1]} : vector<22x16xf32> to vector<16x16xf32>
    %535 = vector.broadcast %249 : f32 to vector<16x16xf32>
    %536 = arith.mulf %535, %534 : vector<16x16xf32>
    %537 = arith.addf %533, %536 : vector<16x16xf32>
    %538 = vector.extract_strided_slice %525 {offsets = [3, 0], sizes = [16, 16], strides = [1, 1]} : vector<22x16xf32> to vector<16x16xf32>
    %539 = vector.broadcast %256 : f32 to vector<16x16xf32>
    %540 = arith.mulf %539, %538 : vector<16x16xf32>
    %541 = arith.addf %537, %540 : vector<16x16xf32>
    %542 = vector.extract_strided_slice %525 {offsets = [4, 0], sizes = [16, 16], strides = [1, 1]} : vector<22x16xf32> to vector<16x16xf32>
    %543 = vector.broadcast %263 : f32 to vector<16x16xf32>
    %544 = arith.mulf %543, %542 : vector<16x16xf32>
    %545 = arith.addf %541, %544 : vector<16x16xf32>
    %546 = vector.extract_strided_slice %525 {offsets = [5, 0], sizes = [16, 16], strides = [1, 1]} : vector<22x16xf32> to vector<16x16xf32>
    %547 = vector.broadcast %270 : f32 to vector<16x16xf32>
    %548 = arith.mulf %547, %546 : vector<16x16xf32>
    %549 = arith.addf %545, %548 : vector<16x16xf32>
    %550 = vector.extract_strided_slice %525 {offsets = [6, 0], sizes = [16, 16], strides = [1, 1]} : vector<22x16xf32> to vector<16x16xf32>
    %551 = vector.broadcast %277 : f32 to vector<16x16xf32>
    %552 = arith.mulf %551, %550 : vector<16x16xf32>
    %553 = arith.addf %549, %552 : vector<16x16xf32>
    %c1_170 = arith.constant 1 : index
    %c0_171 = arith.constant 0 : index
    %c2_172 = arith.constant 2 : index
    %554 = vector.load %arg5[%c1_170, %c0_171, %c2_172] : memref<2x22x22xf32, #tpu.memory_space<vmem>>, vector<1x22x16xf32>
    %555 = vector.shape_cast %554 : vector<1x22x16xf32> to vector<22x16xf32>
    %556 = vector.extract_strided_slice %555 {offsets = [0, 0], sizes = [16, 16], strides = [1, 1]} : vector<22x16xf32> to vector<16x16xf32>
    %557 = vector.broadcast %236 : f32 to vector<16x16xf32>
    %558 = arith.mulf %557, %556 : vector<16x16xf32>
    %559 = arith.addf %553, %558 : vector<16x16xf32>
    %560 = vector.extract_strided_slice %555 {offsets = [1, 0], sizes = [16, 16], strides = [1, 1]} : vector<22x16xf32> to vector<16x16xf32>
    %561 = vector.broadcast %243 : f32 to vector<16x16xf32>
    %562 = arith.mulf %561, %560 : vector<16x16xf32>
    %563 = arith.addf %559, %562 : vector<16x16xf32>
    %564 = vector.extract_strided_slice %555 {offsets = [2, 0], sizes = [16, 16], strides = [1, 1]} : vector<22x16xf32> to vector<16x16xf32>
    %565 = vector.broadcast %250 : f32 to vector<16x16xf32>
    %566 = arith.mulf %565, %564 : vector<16x16xf32>
    %567 = arith.addf %563, %566 : vector<16x16xf32>
    %568 = vector.extract_strided_slice %555 {offsets = [3, 0], sizes = [16, 16], strides = [1, 1]} : vector<22x16xf32> to vector<16x16xf32>
    %569 = vector.broadcast %257 : f32 to vector<16x16xf32>
    %570 = arith.mulf %569, %568 : vector<16x16xf32>
    %571 = arith.addf %567, %570 : vector<16x16xf32>
    %572 = vector.extract_strided_slice %555 {offsets = [4, 0], sizes = [16, 16], strides = [1, 1]} : vector<22x16xf32> to vector<16x16xf32>
    %573 = vector.broadcast %264 : f32 to vector<16x16xf32>
    %574 = arith.mulf %573, %572 : vector<16x16xf32>
    %575 = arith.addf %571, %574 : vector<16x16xf32>
    %576 = vector.extract_strided_slice %555 {offsets = [5, 0], sizes = [16, 16], strides = [1, 1]} : vector<22x16xf32> to vector<16x16xf32>
    %577 = vector.broadcast %271 : f32 to vector<16x16xf32>
    %578 = arith.mulf %577, %576 : vector<16x16xf32>
    %579 = arith.addf %575, %578 : vector<16x16xf32>
    %580 = vector.extract_strided_slice %555 {offsets = [6, 0], sizes = [16, 16], strides = [1, 1]} : vector<22x16xf32> to vector<16x16xf32>
    %581 = vector.broadcast %278 : f32 to vector<16x16xf32>
    %582 = arith.mulf %581, %580 : vector<16x16xf32>
    %583 = arith.addf %579, %582 : vector<16x16xf32>
    %c1_173 = arith.constant 1 : index
    %c0_174 = arith.constant 0 : index
    %c3_175 = arith.constant 3 : index
    %584 = vector.load %arg5[%c1_173, %c0_174, %c3_175] : memref<2x22x22xf32, #tpu.memory_space<vmem>>, vector<1x22x16xf32>
    %585 = vector.shape_cast %584 : vector<1x22x16xf32> to vector<22x16xf32>
    %586 = vector.extract_strided_slice %585 {offsets = [0, 0], sizes = [16, 16], strides = [1, 1]} : vector<22x16xf32> to vector<16x16xf32>
    %587 = vector.broadcast %237 : f32 to vector<16x16xf32>
    %588 = arith.mulf %587, %586 : vector<16x16xf32>
    %589 = arith.addf %583, %588 : vector<16x16xf32>
    %590 = vector.extract_strided_slice %585 {offsets = [1, 0], sizes = [16, 16], strides = [1, 1]} : vector<22x16xf32> to vector<16x16xf32>
    %591 = vector.broadcast %244 : f32 to vector<16x16xf32>
    %592 = arith.mulf %591, %590 : vector<16x16xf32>
    %593 = arith.addf %589, %592 : vector<16x16xf32>
    %594 = vector.extract_strided_slice %585 {offsets = [2, 0], sizes = [16, 16], strides = [1, 1]} : vector<22x16xf32> to vector<16x16xf32>
    %595 = vector.broadcast %251 : f32 to vector<16x16xf32>
    %596 = arith.mulf %595, %594 : vector<16x16xf32>
    %597 = arith.addf %593, %596 : vector<16x16xf32>
    %598 = vector.extract_strided_slice %585 {offsets = [3, 0], sizes = [16, 16], strides = [1, 1]} : vector<22x16xf32> to vector<16x16xf32>
    %599 = vector.broadcast %258 : f32 to vector<16x16xf32>
    %600 = arith.mulf %599, %598 : vector<16x16xf32>
    %601 = arith.addf %597, %600 : vector<16x16xf32>
    %602 = vector.extract_strided_slice %585 {offsets = [4, 0], sizes = [16, 16], strides = [1, 1]} : vector<22x16xf32> to vector<16x16xf32>
    %603 = vector.broadcast %265 : f32 to vector<16x16xf32>
    %604 = arith.mulf %603, %602 : vector<16x16xf32>
    %605 = arith.addf %601, %604 : vector<16x16xf32>
    %606 = vector.extract_strided_slice %585 {offsets = [5, 0], sizes = [16, 16], strides = [1, 1]} : vector<22x16xf32> to vector<16x16xf32>
    %607 = vector.broadcast %272 : f32 to vector<16x16xf32>
    %608 = arith.mulf %607, %606 : vector<16x16xf32>
    %609 = arith.addf %605, %608 : vector<16x16xf32>
    %610 = vector.extract_strided_slice %585 {offsets = [6, 0], sizes = [16, 16], strides = [1, 1]} : vector<22x16xf32> to vector<16x16xf32>
    %611 = vector.broadcast %279 : f32 to vector<16x16xf32>
    %612 = arith.mulf %611, %610 : vector<16x16xf32>
    %613 = arith.addf %609, %612 : vector<16x16xf32>
    %c1_176 = arith.constant 1 : index
    %c0_177 = arith.constant 0 : index
    %c4_178 = arith.constant 4 : index
    %614 = vector.load %arg5[%c1_176, %c0_177, %c4_178] : memref<2x22x22xf32, #tpu.memory_space<vmem>>, vector<1x22x16xf32>
    %615 = vector.shape_cast %614 : vector<1x22x16xf32> to vector<22x16xf32>
    %616 = vector.extract_strided_slice %615 {offsets = [0, 0], sizes = [16, 16], strides = [1, 1]} : vector<22x16xf32> to vector<16x16xf32>
    %617 = vector.broadcast %238 : f32 to vector<16x16xf32>
    %618 = arith.mulf %617, %616 : vector<16x16xf32>
    %619 = arith.addf %613, %618 : vector<16x16xf32>
    %620 = vector.extract_strided_slice %615 {offsets = [1, 0], sizes = [16, 16], strides = [1, 1]} : vector<22x16xf32> to vector<16x16xf32>
    %621 = vector.broadcast %245 : f32 to vector<16x16xf32>
    %622 = arith.mulf %621, %620 : vector<16x16xf32>
    %623 = arith.addf %619, %622 : vector<16x16xf32>
    %624 = vector.extract_strided_slice %615 {offsets = [2, 0], sizes = [16, 16], strides = [1, 1]} : vector<22x16xf32> to vector<16x16xf32>
    %625 = vector.broadcast %252 : f32 to vector<16x16xf32>
    %626 = arith.mulf %625, %624 : vector<16x16xf32>
    %627 = arith.addf %623, %626 : vector<16x16xf32>
    %628 = vector.extract_strided_slice %615 {offsets = [3, 0], sizes = [16, 16], strides = [1, 1]} : vector<22x16xf32> to vector<16x16xf32>
    %629 = vector.broadcast %259 : f32 to vector<16x16xf32>
    %630 = arith.mulf %629, %628 : vector<16x16xf32>
    %631 = arith.addf %627, %630 : vector<16x16xf32>
    %632 = vector.extract_strided_slice %615 {offsets = [4, 0], sizes = [16, 16], strides = [1, 1]} : vector<22x16xf32> to vector<16x16xf32>
    %633 = vector.broadcast %266 : f32 to vector<16x16xf32>
    %634 = arith.mulf %633, %632 : vector<16x16xf32>
    %635 = arith.addf %631, %634 : vector<16x16xf32>
    %636 = vector.extract_strided_slice %615 {offsets = [5, 0], sizes = [16, 16], strides = [1, 1]} : vector<22x16xf32> to vector<16x16xf32>
    %637 = vector.broadcast %273 : f32 to vector<16x16xf32>
    %638 = arith.mulf %637, %636 : vector<16x16xf32>
    %639 = arith.addf %635, %638 : vector<16x16xf32>
    %640 = vector.extract_strided_slice %615 {offsets = [6, 0], sizes = [16, 16], strides = [1, 1]} : vector<22x16xf32> to vector<16x16xf32>
    %641 = vector.broadcast %280 : f32 to vector<16x16xf32>
    %642 = arith.mulf %641, %640 : vector<16x16xf32>
    %643 = arith.addf %639, %642 : vector<16x16xf32>
    %c1_179 = arith.constant 1 : index
    %c0_180 = arith.constant 0 : index
    %c5_181 = arith.constant 5 : index
    %644 = vector.load %arg5[%c1_179, %c0_180, %c5_181] : memref<2x22x22xf32, #tpu.memory_space<vmem>>, vector<1x22x16xf32>
    %645 = vector.shape_cast %644 : vector<1x22x16xf32> to vector<22x16xf32>
    %646 = vector.extract_strided_slice %645 {offsets = [0, 0], sizes = [16, 16], strides = [1, 1]} : vector<22x16xf32> to vector<16x16xf32>
    %647 = vector.broadcast %239 : f32 to vector<16x16xf32>
    %648 = arith.mulf %647, %646 : vector<16x16xf32>
    %649 = arith.addf %643, %648 : vector<16x16xf32>
    %650 = vector.extract_strided_slice %645 {offsets = [1, 0], sizes = [16, 16], strides = [1, 1]} : vector<22x16xf32> to vector<16x16xf32>
    %651 = vector.broadcast %246 : f32 to vector<16x16xf32>
    %652 = arith.mulf %651, %650 : vector<16x16xf32>
    %653 = arith.addf %649, %652 : vector<16x16xf32>
    %654 = vector.extract_strided_slice %645 {offsets = [2, 0], sizes = [16, 16], strides = [1, 1]} : vector<22x16xf32> to vector<16x16xf32>
    %655 = vector.broadcast %253 : f32 to vector<16x16xf32>
    %656 = arith.mulf %655, %654 : vector<16x16xf32>
    %657 = arith.addf %653, %656 : vector<16x16xf32>
    %658 = vector.extract_strided_slice %645 {offsets = [3, 0], sizes = [16, 16], strides = [1, 1]} : vector<22x16xf32> to vector<16x16xf32>
    %659 = vector.broadcast %260 : f32 to vector<16x16xf32>
    %660 = arith.mulf %659, %658 : vector<16x16xf32>
    %661 = arith.addf %657, %660 : vector<16x16xf32>
    %662 = vector.extract_strided_slice %645 {offsets = [4, 0], sizes = [16, 16], strides = [1, 1]} : vector<22x16xf32> to vector<16x16xf32>
    %663 = vector.broadcast %267 : f32 to vector<16x16xf32>
    %664 = arith.mulf %663, %662 : vector<16x16xf32>
    %665 = arith.addf %661, %664 : vector<16x16xf32>
    %666 = vector.extract_strided_slice %645 {offsets = [5, 0], sizes = [16, 16], strides = [1, 1]} : vector<22x16xf32> to vector<16x16xf32>
    %667 = vector.broadcast %274 : f32 to vector<16x16xf32>
    %668 = arith.mulf %667, %666 : vector<16x16xf32>
    %669 = arith.addf %665, %668 : vector<16x16xf32>
    %670 = vector.extract_strided_slice %645 {offsets = [6, 0], sizes = [16, 16], strides = [1, 1]} : vector<22x16xf32> to vector<16x16xf32>
    %671 = vector.broadcast %281 : f32 to vector<16x16xf32>
    %672 = arith.mulf %671, %670 : vector<16x16xf32>
    %673 = arith.addf %669, %672 : vector<16x16xf32>
    %c1_182 = arith.constant 1 : index
    %c0_183 = arith.constant 0 : index
    %c6_184 = arith.constant 6 : index
    %674 = vector.load %arg5[%c1_182, %c0_183, %c6_184] : memref<2x22x22xf32, #tpu.memory_space<vmem>>, vector<1x22x16xf32>
    %675 = vector.shape_cast %674 : vector<1x22x16xf32> to vector<22x16xf32>
    %676 = vector.extract_strided_slice %675 {offsets = [0, 0], sizes = [16, 16], strides = [1, 1]} : vector<22x16xf32> to vector<16x16xf32>
    %677 = vector.broadcast %240 : f32 to vector<16x16xf32>
    %678 = arith.mulf %677, %676 : vector<16x16xf32>
    %679 = arith.addf %673, %678 : vector<16x16xf32>
    %680 = vector.extract_strided_slice %675 {offsets = [1, 0], sizes = [16, 16], strides = [1, 1]} : vector<22x16xf32> to vector<16x16xf32>
    %681 = vector.broadcast %247 : f32 to vector<16x16xf32>
    %682 = arith.mulf %681, %680 : vector<16x16xf32>
    %683 = arith.addf %679, %682 : vector<16x16xf32>
    %684 = vector.extract_strided_slice %675 {offsets = [2, 0], sizes = [16, 16], strides = [1, 1]} : vector<22x16xf32> to vector<16x16xf32>
    %685 = vector.broadcast %254 : f32 to vector<16x16xf32>
    %686 = arith.mulf %685, %684 : vector<16x16xf32>
    %687 = arith.addf %683, %686 : vector<16x16xf32>
    %688 = vector.extract_strided_slice %675 {offsets = [3, 0], sizes = [16, 16], strides = [1, 1]} : vector<22x16xf32> to vector<16x16xf32>
    %689 = vector.broadcast %261 : f32 to vector<16x16xf32>
    %690 = arith.mulf %689, %688 : vector<16x16xf32>
    %691 = arith.addf %687, %690 : vector<16x16xf32>
    %692 = vector.extract_strided_slice %675 {offsets = [4, 0], sizes = [16, 16], strides = [1, 1]} : vector<22x16xf32> to vector<16x16xf32>
    %693 = vector.broadcast %268 : f32 to vector<16x16xf32>
    %694 = arith.mulf %693, %692 : vector<16x16xf32>
    %695 = arith.addf %691, %694 : vector<16x16xf32>
    %696 = vector.extract_strided_slice %675 {offsets = [5, 0], sizes = [16, 16], strides = [1, 1]} : vector<22x16xf32> to vector<16x16xf32>
    %697 = vector.broadcast %275 : f32 to vector<16x16xf32>
    %698 = arith.mulf %697, %696 : vector<16x16xf32>
    %699 = arith.addf %695, %698 : vector<16x16xf32>
    %700 = vector.extract_strided_slice %675 {offsets = [6, 0], sizes = [16, 16], strides = [1, 1]} : vector<22x16xf32> to vector<16x16xf32>
    %701 = vector.broadcast %282 : f32 to vector<16x16xf32>
    %702 = arith.mulf %701, %700 : vector<16x16xf32>
    %703 = arith.addf %699, %702 : vector<16x16xf32>
    %cst_185 = arith.constant 0.000000e+00 : f32
    %704 = vector.broadcast %cst_185 : f32 to vector<16x16xf32>
    %705 = arith.cmpf oge, %703, %704 : vector<16x16xf32>
    %cst_186 = arith.constant 0.00999999977 : f32
    %706 = vector.broadcast %cst_186 : f32 to vector<16x16xf32>
    %707 = arith.mulf %706, %703 : vector<16x16xf32>
    %708 = arith.select %705, %703, %707 : vector<16x16xi1>, vector<16x16xf32>
    %709 = arith.negf %708 : vector<16x16xf32>
    %710 = math.exp %709 : vector<16x16xf32>
    %cst_187 = arith.constant 1.000000e+00 : f32
    %711 = vector.broadcast %cst_187 : f32 to vector<16x16xf32>
    %712 = arith.addf %711, %710 : vector<16x16xf32>
    %713 = arith.divf %711, %712 : vector<16x16xf32>
    %714 = vector.extract_strided_slice %713 {offsets = [0, 0], sizes = [1, 16], strides = [1, 1]} : vector<16x16xf32> to vector<1x16xf32>
    %c0_188 = arith.constant 0 : index
    %c0_189 = arith.constant 0 : index
    %715 = vector.load %arg7[%c0_188, %c0_189] : memref<1x256xf32, #tpu.memory_space<vmem>>, vector<1x16xf32>
    tpu.vector_store %arg7[%c0_188, %c0_189], %714 {strides = array<i32>} : memref<1x256xf32, #tpu.memory_space<vmem>>, vector<1x16xf32>,
    %716 = vector.extract_strided_slice %713 {offsets = [1, 0], sizes = [1, 16], strides = [1, 1]} : vector<16x16xf32> to vector<1x16xf32>
    %c0_190 = arith.constant 0 : index
    %c16_191 = arith.constant 16 : index
    %717 = vector.load %arg7[%c0_190, %c16_191] : memref<1x256xf32, #tpu.memory_space<vmem>>, vector<1x16xf32>
    tpu.vector_store %arg7[%c0_190, %c16_191], %716 {strides = array<i32>} : memref<1x256xf32, #tpu.memory_space<vmem>>, vector<1x16xf32>,
    %718 = vector.extract_strided_slice %713 {offsets = [2, 0], sizes = [1, 16], strides = [1, 1]} : vector<16x16xf32> to vector<1x16xf32>
    %c0_192 = arith.constant 0 : index
    %c32_193 = arith.constant 32 : index
    %719 = vector.load %arg7[%c0_192, %c32_193] : memref<1x256xf32, #tpu.memory_space<vmem>>, vector<1x16xf32>
    tpu.vector_store %arg7[%c0_192, %c32_193], %718 {strides = array<i32>} : memref<1x256xf32, #tpu.memory_space<vmem>>, vector<1x16xf32>,
    %720 = vector.extract_strided_slice %713 {offsets = [3, 0], sizes = [1, 16], strides = [1, 1]} : vector<16x16xf32> to vector<1x16xf32>
    %c0_194 = arith.constant 0 : index
    %c48_195 = arith.constant 48 : index
    %721 = vector.load %arg7[%c0_194, %c48_195] : memref<1x256xf32, #tpu.memory_space<vmem>>, vector<1x16xf32>
    tpu.vector_store %arg7[%c0_194, %c48_195], %720 {strides = array<i32>} : memref<1x256xf32, #tpu.memory_space<vmem>>, vector<1x16xf32>,
    %722 = vector.extract_strided_slice %713 {offsets = [4, 0], sizes = [1, 16], strides = [1, 1]} : vector<16x16xf32> to vector<1x16xf32>
    %c0_196 = arith.constant 0 : index
    %c64_197 = arith.constant 64 : index
    %723 = vector.load %arg7[%c0_196, %c64_197] : memref<1x256xf32, #tpu.memory_space<vmem>>, vector<1x16xf32>
    tpu.vector_store %arg7[%c0_196, %c64_197], %722 {strides = array<i32>} : memref<1x256xf32, #tpu.memory_space<vmem>>, vector<1x16xf32>,
    %724 = vector.extract_strided_slice %713 {offsets = [5, 0], sizes = [1, 16], strides = [1, 1]} : vector<16x16xf32> to vector<1x16xf32>
    %c0_198 = arith.constant 0 : index
    %c80_199 = arith.constant 80 : index
    %725 = vector.load %arg7[%c0_198, %c80_199] : memref<1x256xf32, #tpu.memory_space<vmem>>, vector<1x16xf32>
    tpu.vector_store %arg7[%c0_198, %c80_199], %724 {strides = array<i32>} : memref<1x256xf32, #tpu.memory_space<vmem>>, vector<1x16xf32>,
    %726 = vector.extract_strided_slice %713 {offsets = [6, 0], sizes = [1, 16], strides = [1, 1]} : vector<16x16xf32> to vector<1x16xf32>
    %c0_200 = arith.constant 0 : index
    %c96_201 = arith.constant 96 : index
    %727 = vector.load %arg7[%c0_200, %c96_201] : memref<1x256xf32, #tpu.memory_space<vmem>>, vector<1x16xf32>
    tpu.vector_store %arg7[%c0_200, %c96_201], %726 {strides = array<i32>} : memref<1x256xf32, #tpu.memory_space<vmem>>, vector<1x16xf32>,
    %728 = vector.extract_strided_slice %713 {offsets = [7, 0], sizes = [1, 16], strides = [1, 1]} : vector<16x16xf32> to vector<1x16xf32>
    %c0_202 = arith.constant 0 : index
    %c112 = arith.constant 112 : index
    %729 = vector.load %arg7[%c0_202, %c112] : memref<1x256xf32, #tpu.memory_space<vmem>>, vector<1x16xf32>
    tpu.vector_store %arg7[%c0_202, %c112], %728 {strides = array<i32>} : memref<1x256xf32, #tpu.memory_space<vmem>>, vector<1x16xf32>,
    %730 = vector.extract_strided_slice %713 {offsets = [8, 0], sizes = [1, 16], strides = [1, 1]} : vector<16x16xf32> to vector<1x16xf32>
    %c0_203 = arith.constant 0 : index
    %c128 = arith.constant 128 : index
    %731 = vector.load %arg7[%c0_203, %c128] : memref<1x256xf32, #tpu.memory_space<vmem>>, vector<1x16xf32>
    tpu.vector_store %arg7[%c0_203, %c128], %730 {strides = array<i32>} : memref<1x256xf32, #tpu.memory_space<vmem>>, vector<1x16xf32>,
    %732 = vector.extract_strided_slice %713 {offsets = [9, 0], sizes = [1, 16], strides = [1, 1]} : vector<16x16xf32> to vector<1x16xf32>
    %c0_204 = arith.constant 0 : index
    %c144 = arith.constant 144 : index
    %733 = vector.load %arg7[%c0_204, %c144] : memref<1x256xf32, #tpu.memory_space<vmem>>, vector<1x16xf32>
    tpu.vector_store %arg7[%c0_204, %c144], %732 {strides = array<i32>} : memref<1x256xf32, #tpu.memory_space<vmem>>, vector<1x16xf32>,
    %734 = vector.extract_strided_slice %713 {offsets = [10, 0], sizes = [1, 16], strides = [1, 1]} : vector<16x16xf32> to vector<1x16xf32>
    %c0_205 = arith.constant 0 : index
    %c160 = arith.constant 160 : index
    %735 = vector.load %arg7[%c0_205, %c160] : memref<1x256xf32, #tpu.memory_space<vmem>>, vector<1x16xf32>
    tpu.vector_store %arg7[%c0_205, %c160], %734 {strides = array<i32>} : memref<1x256xf32, #tpu.memory_space<vmem>>, vector<1x16xf32>,
    %736 = vector.extract_strided_slice %713 {offsets = [11, 0], sizes = [1, 16], strides = [1, 1]} : vector<16x16xf32> to vector<1x16xf32>
    %c0_206 = arith.constant 0 : index
    %c176 = arith.constant 176 : index
    %737 = vector.load %arg7[%c0_206, %c176] : memref<1x256xf32, #tpu.memory_space<vmem>>, vector<1x16xf32>
    tpu.vector_store %arg7[%c0_206, %c176], %736 {strides = array<i32>} : memref<1x256xf32, #tpu.memory_space<vmem>>, vector<1x16xf32>,
    %738 = vector.extract_strided_slice %713 {offsets = [12, 0], sizes = [1, 16], strides = [1, 1]} : vector<16x16xf32> to vector<1x16xf32>
    %c0_207 = arith.constant 0 : index
    %c192 = arith.constant 192 : index
    %739 = vector.load %arg7[%c0_207, %c192] : memref<1x256xf32, #tpu.memory_space<vmem>>, vector<1x16xf32>
    tpu.vector_store %arg7[%c0_207, %c192], %738 {strides = array<i32>} : memref<1x256xf32, #tpu.memory_space<vmem>>, vector<1x16xf32>,
    %740 = vector.extract_strided_slice %713 {offsets = [13, 0], sizes = [1, 16], strides = [1, 1]} : vector<16x16xf32> to vector<1x16xf32>
    %c0_208 = arith.constant 0 : index
    %c208 = arith.constant 208 : index
    %741 = vector.load %arg7[%c0_208, %c208] : memref<1x256xf32, #tpu.memory_space<vmem>>, vector<1x16xf32>
    tpu.vector_store %arg7[%c0_208, %c208], %740 {strides = array<i32>} : memref<1x256xf32, #tpu.memory_space<vmem>>, vector<1x16xf32>,
    %742 = vector.extract_strided_slice %713 {offsets = [14, 0], sizes = [1, 16], strides = [1, 1]} : vector<16x16xf32> to vector<1x16xf32>
    %c0_209 = arith.constant 0 : index
    %c224 = arith.constant 224 : index
    %743 = vector.load %arg7[%c0_209, %c224] : memref<1x256xf32, #tpu.memory_space<vmem>>, vector<1x16xf32>
    tpu.vector_store %arg7[%c0_209, %c224], %742 {strides = array<i32>} : memref<1x256xf32, #tpu.memory_space<vmem>>, vector<1x16xf32>,
    %744 = vector.extract_strided_slice %713 {offsets = [15, 0], sizes = [1, 16], strides = [1, 1]} : vector<16x16xf32> to vector<1x16xf32>
    %c0_210 = arith.constant 0 : index
    %c240 = arith.constant 240 : index
    %745 = vector.load %arg7[%c0_210, %c240] : memref<1x256xf32, #tpu.memory_space<vmem>>, vector<1x16xf32>
    tpu.vector_store %arg7[%c0_210, %c240], %744 {strides = array<i32>} : memref<1x256xf32, #tpu.memory_space<vmem>>, vector<1x16xf32>,
    %c0_211 = arith.constant 0 : index
    %c0_212 = arith.constant 0 : index
    %746 = vector.load %arg7[%c0_211, %c0_212] : memref<1x256xf32, #tpu.memory_space<vmem>>, vector<1x256xf32>
    %c0_213 = arith.constant 0 : index
    %c0_214 = arith.constant 0 : index
    %c0_215 = arith.constant 0 : index
    %747 = vector.load %arg3[%c0_213, %c0_214, %c0_215] : memref<1x4x256xf32, #tpu.memory_space<vmem>>, vector<1x4x256xf32>
    %748 = vector.shape_cast %747 : vector<1x4x256xf32> to vector<4x256xf32>
    %749 = vector.broadcast %40 : vector<4x1xf32> to vector<4x256xf32>
    %750 = arith.mulf %748, %749 : vector<4x256xf32>
    %751 = vector.broadcast %746 : vector<1x256xf32> to vector<4x256xf32>
    %752 = arith.mulf %750, %751 : vector<4x256xf32>
    %c0_216 = arith.constant 0 : index
    %c0_217 = arith.constant 0 : index
    %c0_218 = arith.constant 0 : index
    %753 = vector.load %arg4[%c0_216, %c0_217, %c0_218] : memref<1x4x256xf32, #tpu.memory_space<vmem>>, vector<1x4x256xf32>
    %754 = vector.shape_cast %753 : vector<1x4x256xf32> to vector<4x256xf32>
    %755 = vector.shape_cast %752 : vector<4x256xf32> to vector<1x4x256xf32>
    tpu.vector_store %arg4[%c0_216, %c0_217, %c0_218], %755 {strides = array<i32>} : memref<1x4x256xf32, #tpu.memory_space<vmem>>, vector<1x4x256xf32>,
    return
  }
  func.func @transform_0(%arg0: i32) -> i32 {
    %c0_i32 = arith.constant 0 : i32
    %c0_i32_0 = arith.constant 0 : i32
    return %c0_i32 : i32
  }
  func.func @transform_1(%arg0: i32) -> i32 {
    %c0_i32 = arith.constant 0 : i32
    %c0_i32_0 = arith.constant 0 : i32
    return %c0_i32 : i32
  }
  func.func @transform_2(%arg0: i32) -> (i32, i32, i32) {
    %c0_i32 = arith.constant 0 : i32
    %c0_i32_0 = arith.constant 0 : i32
    %c0_i32_1 = arith.constant 0 : i32
    return %arg0, %c0_i32, %c0_i32_0 : i32, i32, i32
  }
  func.func @transform_3(%arg0: i32) -> (i32, i32, i32) {
    %c0_i32 = arith.constant 0 : i32
    %c0_i32_0 = arith.constant 0 : i32
    %c0_i32_1 = arith.constant 0 : i32
    return %arg0, %c0_i32, %c0_i32_0 : i32, i32, i32
  }
}

</mosaic_0001>

<bundles_post_ra>
// kernel: tpu_custom_call.1
= control target key start
LH: loop header
LB: loop body
LE: loop exit
PB: predicated region body
PF: predicated region fallthrough
CT: control target
= control target key end

     0   :  { %s5780_s0 = inlined_call_operand.hbm [shape: f32[3], index: 0, kind: input, shape index: {}]   ;;  %s5781_s1 = inlined_call_operand.hbm [shape: f32[98], index: 1, kind: input, shape index: {}]   ;;  %s5782_s2 = inlined_call_operand.hbm [shape: f32[2,4,256], index: 2, kind: input, shape index: {}]   ;;  %s5783_s3 = inlined_call_operand.hbm [shape: f32[2,4,256], index: 3, kind: output, shape index: {}]  }
   0x1   :  { %5904 = sst [smem:[#allocation152_spill]] %s5780_s0 }
   0x2   :  { %5905 = sst [smem:[#allocation153_spill]] %s5781_s1 }
   0x3   :  { %5906 = sst [smem:[#allocation154_spill]] %s5782_s2 }
   0x4   :  { %5907 = sst [smem:[#allocation155_spill]] %s5783_s3 }
   0x5   :  { %8 = vsyncpa [#allocation8], 0 }
   0x6   :  { %9 = vsyncpa [#allocation10], 0 }
   0x7   :  { %10 = vsyncpa [#allocation6], 0 }
   0x8   :  { %12 = vsyncpa [#allocation6 + $0x1], 0 }
   0x9   :  { %13 = vsyncpa [#allocation7], 0 }
   0xa   :  { %15 = vsyncpa [#allocation7 + $0x1], 0  ;;  %s3100_s12 = smov 0   ;;  %s3102_s13 = smov 0  }
   0xb   :  { %s3104_s14 = smov 0   ;;  %s3106_s15 = smov 0  }
   0xc LB: > { %5908 = sst [smem:[#allocation17_spill]] %s3040_s12  ;;  %s3121_s16 = sadd.s32 4294967295, %s3052_s15   ;;  %s3052_s15 = sphi %s3106_s15, %s6355_s15   ;;  %s3048_s14 = sphi %s3104_s14, %s6358_s14   ;;  %s3044_s13 = sphi %s3102_s13, %s6357_s13   ;;  %s3040_s12 = sphi %s3100_s12, %s6356_s12  }
   0xd   : > { %5909 = sst [smem:[#allocation18_spill]] %s3044_s13  ;;  %s2686_s17 = sadd.s32 4294967294, %s3052_s15  }
   0xe   : > { %5910 = sst [smem:[#allocation19_spill]] %s3048_s14  ;;  %p83_p0 = scmp.ne.s32.totalorder %s3044_s13, %s3040_s12 }
   0xf   : > { %5911 = sst [smem:[#allocation20_spill]] %s3052_s15  ;;  %p84_p1 = scmp.eq.s32.totalorder %s3121_s16, 0 }
  0x10   : > { %p107_p2 = scmp.eq.s32.totalorder %s3121_s16, 1  ;;  %p113_p3 = scmp.eq.s32.totalorder %s2686_s17, 1 }
  0x11   : > { %p3130_p4 = por %p84_p1, %p83_p0  ;;  %p2687_p5 = scmp.ge.s32.totalorder %s3052_s15, 1 }
  0x12   : > { %p3135_p6 = por %p113_p3, %p83_p0  ;;  %p120_p7 = scmp.lt.s32.totalorder %s3052_s15, 3 }
  0x13   : > { %s5915_s0 = sld [smem:[#allocation152_spill]]  ;;  %s3156_s27 = sadd.s32 1, %s3052_s15  }
  0x14   : > { %s5913_s19 = scalar_select %p3135_p6, 1, 0 }
  0x15   : > { %p3143_p8 = pnand %p2687_p5, %p120_p7  ;;  %s5917_s1 = sld [smem:[#allocation153_spill]] }
  0x16   : > { %5914 = sst [smem:[#allocation21_spill]] %s5913_s19  ;;  %s67_s28 = ssub.s32 %s3052_s15, %s3156_s27 }
  0x17   : > { %p2820_p10 = pneg %p3143_p8  ;;  %5918 = sst [smem:[#allocation22_spill]] %s3156_s27 }
  0x18   : > { %s3054_s29 = smov [#allocation5]   ;;  %s3055_s30 = smov [#allocation9]  }
  0x19   : > { %s132_s22 = sshll.u32 %s5915_s0, 4  ;;  %p2821_p11 = pnand %p2820_p10, %p84_p1  ;;  %s133_s22 = int_to_ptr.hbm [resolvable:$true] %s132_s22 }
  0x1a   : > { %p68_p12 = scmp.eq.s32.totalorder %s67_s28, 0  ;;  %s70_s4 = sadd.s32 1, %s3048_s14 }
  0x1b   : > { %s142_s26 = sshll.u32 %s5917_s1, 4  ;;  %p77_p13 = scmp.ne.s32.totalorder %s3048_s14, %s3044_s13  ;;  %s143_s26 = int_to_ptr.hbm [resolvable:$true] %s142_s26 }
  0x1c   : > { %2823 = dma.hbm_to_smem (!%p2821_p11), %s133_s22, 16, %s3054_s29, [#allocation8]  }
  0x1d   : > { %2826 = dma.hbm_to_smem (!%p2821_p11), %s143_s26, 16, %s3055_s30, [#allocation10]  }
  0x1e   : > { %p78_p0 = scmp.eq.s32.totalorder %s3052_s15, 0  ;;  %p3169_p5 = por %p107_p2, %p77_p13 }
  0x1f   : > { %s3165_s5 = scalar_select %p68_p12, %s3048_s14, %s70_s4  }
  0x20   : > { %p79_p3 = por %p78_p0, %p77_p13  ;;  %p2837_p7 = scmp.lt.s32.totalorder %s3052_s15, 2 }
  0x21   : > { %5919 = sst [smem:[#allocation23_spill]] %s3165_s5  ;;  %s153_s7 = sand.u32 1, %s3048_s14  }
  0x22   : > { %s5920_s6 = scalar_select %p3169_p5, 1, 0 }
  0x23   : > { %s2691_s8 = sshll.u32 %s153_s7, 3  ;;  %s2806_s9 = sshll.u32 %s3052_s15, 3 }
  0x24   : > { %5921 = sst [smem:[#allocation24_spill]] %s5920_s6  ;;  %s157_s20 = scalar_lea.vmem [#allocation11], %s2691_s8 }
  0x25   : > { %s5922_s2 = sld [smem:[#allocation154_spill]]  ;;  %s166_s21 = sshll.u32 %s157_s20, 4  ;;  %s167_s21 = int_to_ptr.vmem [resolvable:$true] %s166_s21 }
  0x26   : > { %p3179_p10 = pnand %p2837_p7, %p79_p3  ;;  %s154_s25 = scalar_lea.sflag [#allocation6], %s153_s7 }
  0x28   : > { %p2952_p11 = pneg %p3179_p10 }
  0x2b   : > { %s162_s17 = scalar_lea.hbm %s5922_s2, %s2806_s9  ;;  %s2955_s4 = scalar_lea.hbm %s5922_s2, 16 }
  0x2c   : > { %s164_s22 = sshll.u32 %s162_s17, 4  ;;  %s165_s22 = int_to_ptr.hbm [resolvable:$true] %s164_s22 }
  0x2d   : > { %s2948_s26 = sshra.s32 %s165_s22, 4  ;;  %s2949_s26 = int_to_ptr.hbm [resolvable:$true] %s2948_s26 }
  0x2e   : > { %s2950_s28 = scalar_lea.hbm %s2949_s26, 8  ;;  %p2956_p0 = scmp.lt.s32.totalorder %s2949_s26, %s5922_s2 }
  0x2f   : > { %p2951_p2 = scmp.ne.s32.totalorder %s2949_s26, %s2950_s28  ;;  %p2957_p3 = scmp.lt.s32.totalorder %s2955_s4, %s2950_s28 }
  0x31   : > { %p2953_p12 = pnand %p2952_p11, %p2951_p2  ;;  %p2958_p7 = por %p2957_p3, %p2956_p0 }
  0x33   : > { %p2954_p13 = pneg %p2953_p12 }
  0x35   : > { %p2959_p9 = pnand %p2958_p7, %p2954_p13 }
  0x37   : > { %2962 = shalt.err (!%p2959_p9)
}
  0x38   : > { %2830 = dma.hbm_to_vmem [thread:$0]  (!%p3179_p10), %s165_s22, 128, %s167_s21, %s154_s25  }
  0x39   : > { %175 = sbr.rel (%p3143_p8) target bundleno = 1488 (0x5d0), region = 32 }
  0x3e   : > { %3023 = dma.done.wait (%p84_p1), [#allocation8], 16  }
  0x3f   : > { %3025 = vsyncadd (%p84_p1), [#allocation8], 4294967280 }
  0x40   : > { %3027 = dma.done.wait (%p84_p1), [#allocation10], 16  }
  0x41   : > { %3029 = vsyncadd (%p84_p1), [#allocation10], 4294967280  ;;  %s3204_s7 = sand.u32 1, %s3044_s13  }
  0x42   : > { %s5784_s23 = sshll.u32 %s3204_s7, 3  ;;  %s188_s10 = scalar_lea.sflag [#allocation6], %s3204_s7 }
  0x43   : > { %s191_s11 = scalar_lea.vmem [#allocation11], %s5784_s23 }
  0x44   : > { %3031 = dma.done.wait (%p3130_p4), %s188_s10, 128  }
  0x45   : > { %3033 = vsyncadd (%p3130_p4), %s188_s10, 4294967168 }
  0x46   : > { %197 = sfence }
  0x47   : > { %v3214_v0 = vld [vmem:[%s191_s11] sm:$0xff]  ;;  %vm5897_vm0 = vcmask 1043456   ;;  %vm240_vm1 = vcmask 8192   ;;  %v3056_v11 = vmov 0.0   ;;  %vm243_vm2 = vcmask 3072   ;;  %s247_s18 = sld [smem:[#allocation5]] }
  0x48   : > { %218 = vst [vmem:[#allocation1] ss:$2 sm:$0xff] %v3214_v0  ;;  %vm245_vm3 = vcmask 11272   ;;  %s2699_s17 = sld [smem:[#allocation5 + $0x1]]  ;;  %s5789_s21 = smov 127   ;;  %v3058_v28 = vmov 0  }
  0x49   : > { %241 = vst.msk [vmem:[#allocation3] sm:$0x1] %vm240_vm1, %v3056_v11  ;;  %s2700_s20 = sld [smem:[#allocation5 + $0x2]]  ;;  %2899 = vset.pattern.permute.xlu1 %v3058_v28  ;;  %2900 = vset.pattern.permute.xlu0 %v3058_v28  ;;  %v3059_v44 = vmov 839922192   ;;  %s3060_s22 = smov 51  }
  0x4a   : > { %242 = vst.msk [vmem:[#allocation3 + $0x5] sm:$0x1] %vm240_vm1, %v3056_v11  ;;  %v293_v45 = vunpack.c.l.s4 %v3059_v44  ;;  %s3061_s24 = smov 115   ;;  %s3062_s25 = smov 3   ;;  %vm344_vm9 = vcmask 23552   ;;  %vm349_vm10 = vcmask 179352  }
  0x4b   : > { %s3063_s26 = smov 35   ;;  %s3064_s28 = smov 99   ;;  %345 = vst.msk [vmem:[#allocation2 + $0x3] sm:$0xff] %vm344_vm9, %v3056_v11  ;;  %vm339_vm11 = vcmask 174080   ;;  %vm358_vm12 = vcmask 147480   ;;  %vm601_vm13 = vcmask 1046528  }
  0x4c   : > { %v294_v46 = vunpack.c.0.s8 %v293_v45  ;;  %s3065_s29 = smov 83   ;;  %s3066_s30 = smov 67   ;;  %350 = vst.msk [vmem:[#allocation2 + $0x3] sm:$0xff] %vm349_vm10, %v3056_v11  ;;  %vm618_vm14 = vcmask 1045504   ;;  %vm635_vm15 = vcmask 1044480   ;;  %vm668_vm1 = vcmask 1042432  }
  0x4d   : > { %v251_v15 = vstv %s247_s18  ;;  %s3067_s4 = smov 19   ;;  %346 = vst.msk [vmem:[#allocation2 + $0xb] sm:$0xff] %vm344_vm9, %v3056_v11  ;;  %s3281_s8 = sld [smem:[#allocation9 + $0x2]] }
  0x4e   : > { %v254_v16 = vstv %s2699_s17  ;;  %347 = vst.msk [vmem:[#allocation2 + $0x1b] sm:$0xff] %vm344_vm9, %v3056_v11  ;;  %s3283_s9 = sld [smem:[#allocation9 + $0x1]]  ;;  %s5787_s10 = smov 126  }
  0x4f   : > { %v219_v1 = vld.sshfl [vmem:[#allocation1] sm:$0xff pattern:$0x75316420]  ;;  %v220_v2 = vld.sshfl [vmem:[#allocation1 + $0x8] sm:$0xff pattern:$0x75316420]  ;;  %v258_v20 = vstv %s2700_s20 }
  0x50   : > { %v224_v3 = vsel %vm5897_vm0, %v219_v1, 0.0  ;;  %v225_v4 = vsel %vm5897_vm0, %v220_v2, 0.0  ;;  %230 = vst [vmem:[#allocation1] ss:$2 sm:$0xff] %v3214_v0  ;;  %s3303_s11 = sld [smem:[#allocation9 + $0x3]]  ;;  %s5952_s13 = smov 125  }
  0x51   : > { %v226_v5 = vadd.f32 %v225_v4, %v224_v3  ;;  %348 = vst.msk [vmem:[#allocation2 + $0x23] sm:$0xff] %vm344_vm9, %v3056_v11  ;;  %s3307_s18 = sld [smem:[#allocation9 + $0x5]] }
  0x52   : > { %351 = vst.msk [vmem:[#allocation2 + $0xb] sm:$0xff] %vm349_vm10, %v3056_v11  ;;  %s3309_s17 = sld [smem:[#allocation9 + $0x4]] }
  0x53   : > { %227 = vadd.xlane.f32.xlu0 %v226_v5  ;;  %352 = vst.msk [vmem:[#allocation2 + $0x1b] sm:$0xff] %vm349_vm10, %v3056_v11  ;;  %v828_v28 = vstv %s3281_s8  ;;  %s2709_s20 = sld [smem:[#allocation9 + $0x8]] }
  0x54   : > { %353 = vst.msk [vmem:[#allocation2 + $0x23] sm:$0xff] %vm349_vm10, %v3056_v11  ;;  %s3344_s8 = sld [smem:[#allocation9 + $0x9]] }
  0x55   : > { %340 = vst.msk [vmem:[#allocation2] sm:$0x7] %vm339_vm11, %v3056_v11  ;;  %s3378_s23 = sld [smem:[#allocation9 + $0x2a]] }
  0x56   : > { %341 = vst.msk [vmem:[#allocation2 + $0x18] sm:$0x7] %vm339_vm11, %v3056_v11  ;;  %v961_v44 = vstv %s3303_s11  ;;  %s3351_s11 = sld [smem:[#allocation9 + $0x7]] }
  0x57   : > { %v231_v6 = vld.sshfl [vmem:[#allocation1] sm:$0xff pattern:$0x75316420]  ;;  %v232_v7 = vld.sshfl [vmem:[#allocation1 + $0x8] sm:$0xff pattern:$0x75316420] }
  0x58   : > { %v235_v8 = vsel %vm5897_vm0, %v231_v6, -inf  ;;  %v236_v9 = vsel %vm5897_vm0, %v232_v7, -inf  ;;  %342 = vst.msk [vmem:[#allocation2 + $0x13] sm:$0x7] %vm339_vm11, %v3056_v11  ;;  %s4095_s0 = sld [smem:[#allocation9 + $0x5e]] }
  0x59   : > { %v237_v10 = vmax.f32 %v235_v8, %v236_v9  ;;  %343 = vst.msk [vmem:[#allocation2 + $0x2b] sm:$0x7] %vm339_vm11, %v3056_v11  ;;  %s4107_s1 = sld [smem:[#allocation9 + $0x56]] }
  0x5a   : > { %s4119_s2 = sld [smem:[#allocation9 + $0x57]] }
  0x5b   : > { %238 = vmax.xlane.f32.xlu0 %v237_v10  ;;  %s4133_s5 = sld [smem:[#allocation9 + $0x43]] }
  0x5c   : > { %s4148_s14 = sld [smem:[#allocation9 + $0x3b]] }
  0x5d   : > { %s4160_s27 = sld [smem:[#allocation9 + $0x4a]] }
  0x5e   : > { %s4220_s15 = sld [smem:[#allocation9 + $0x3c]] }
  0x5f   : > { %s4233_s19 = sld [smem:[#allocation9 + $0x51]] }
  0x60   : > { %s4249_s12 = sld [smem:[#allocation9 + $0x4b]] }
  0x61   : > { %s4280_s6 = sld [smem:[#allocation9 + $0x38]] }
  0x62   : > { %s4297_s3 = sld [smem:[#allocation9 + $0x3f]] }
  0xc6   : > { %v228_v12 = vpop.xlane.xlu0 %227 }
  0xc7   : > { %v229_v13 = vmul.f32 0.00390625, %v228_v12 }
  0xc9   : > { %244 = vst.msk [vmem:[#allocation3 + $0x1] sm:$0xf] %vm243_vm2, %v229_v13  ;;  %vm685_vm2 = vcmask 1041408  }
  0xce   : > { %v239_v14 = vpop.xlane.xlu0 %238 }
  0xcf   : > { %246 = vst.msk [vmem:[#allocation3 + $0x1] sm:$0xf] %vm245_vm3, %v239_v14 }
  0xd6   : > { %v250_v17 = vld [vmem:[#allocation3] sm:$0xf] }
  0xd7   : > { %v253_v18 = vld [vmem:[#allocation3 + $0x1] sm:$0xf]  ;;  %v252_v21 = vmul.f32 %v251_v15, %v250_v17 }
  0xd8   : > { %v257_v19 = vld [vmem:[#allocation3 + $0x2] sm:$0xf]  ;;  %v255_v22 = vmul.f32 %v254_v16, %v253_v18 }
  0xd9   : > { %v259_v24 = vmul.f32 %v258_v20, %v257_v19 }
  0xda   : > { %v256_v23 = vadd.f32 %v255_v22, %v252_v21 }
  0xdc   : > { %v260_v25 = vadd.f32 %v259_v24, %v256_v23 }
  0xde   : > { %vm261_vm4 = vcmp.ge.f32.partialorder %v260_v25, 0.0  ;;  %v262_v26 = vmul.f32 0.01, %v260_v25 }
  0xe0   : > { %v263_v27 = vsel %vm261_vm4, %v260_v25, %v262_v26 }
  0xe1   : > { %265 = vrot.lane.b32.xlu1 %v263_v27, %s5789_s21 }
 0x153   : > { %v266_v29 = vpop.permute.xlu1 %265 }
 0x154   : > { %v268_v30 = vadd.f32 %v266_v29, %v263_v27  ;;  %v695_v29 = vstv %s3283_s9  ;;  %s3348_s9 = sld [smem:[#allocation9]] }
 0x156   : > { %v2701_v31 = vmul.f32 -1.442695, %v268_v30 }
 0x158   : > { %2901 = vpow2.f32 %v2701_v31 }
 0x15e   : > { %v2902_v32 = vpop.eup %2901 }
 0x15f   : > { %v272_v33 = vadd.f32 1.0, %v2902_v32 }
 0x161   : > { %2903 = vrcp.f32 %v272_v33  ;;  %v284_v37 = vand.u32 2147483648, %v272_v33  ;;  %v282_v39 = vand.u32 2147483647, %v272_v33  ;;  %vm278_vm6 = vweird.f32 %v272_v33 }
 0x163   : > { %v285_v41 = vor.u32 1.1754944e-38, %v284_v37  ;;  %vm283_vm8 = vcmp.eq.f32.partialorder %v282_v39, 8.507059e+37 }
 0x167   : > { %v2904_v34 = vpop.eup %2903 }
 0x168   : > { %v274_v35 = vmul.f32 %v2904_v34, %v272_v33  ;;  %vm279_vm5 = vweird.f32 %v2904_v34 }
 0x169   : > { %vm280_vm7 = vmor %vm278_vm6, %vm279_vm5 }
 0x16a   : > { %v275_v36 = vsub.f32 1.0, %v274_v35 }
 0x16c   : > { %v276_v38 = vmul.f32 %v2904_v34, %v275_v36 }
 0x16e   : > { %v277_v40 = vadd.f32 %v2904_v34, %v276_v38 }
 0x170   : > { %v281_v42 = vsel %vm280_vm7, %v2904_v34, %v277_v40 }
 0x171   : > { %v286_v43 = vsel %vm283_vm8, %v285_v41, %v281_v42 }
 0x172   : > { %290 = vperm.xlu1 %2899, %v286_v43  }
 0x1e4   : > { %v291_v47 = vpop.permute.xlu1 %290 }
 0x1e5   : > { %v295_v48 = vperm.slane %v291_v47, %v294_v46 }
 0x1e7   : > { %v3226_v49 = vmul.f32 %v295_v48, %v3214_v0  ;;  %v1227_v48 = vstv %s3307_s18  ;;  %s3357_s18 = sld [smem:[#allocation9 + $0xe]] }
 0x1e9   : > { %5924 = vst [vmem:[#allocation25_spill] sm:$0xff] %v3226_v49 }
 0x1ea   : > { %299 = vst [vmem:[#allocation1] ss:$2 sm:$0xff] %v3226_v49 }
 0x1f1   : > { %v300_v50 = vld.sshfl [vmem:[#allocation1] sm:$0xff pattern:$0x75316420]  ;;  %v301_v51 = vld.sshfl [vmem:[#allocation1 + $0x8] sm:$0xff pattern:$0x75316420] }
 0x1f2   : > { %320 = vst [vmem:[#allocation1] ss:$2 sm:$0xff] %v3226_v49  ;;  %v304_v52 = vsel %vm5897_vm0, %v300_v50, 0.0  ;;  %v311_v53 = vsel %vm5897_vm0, %v301_v51, 0.0  ;;  %v1094_v50 = vstv %s3309_s17  ;;  %s3365_s17 = sld [smem:[#allocation9 + $0x15]] }
 0x1f3   : > { %v305_v54 = vrot.slane %v304_v52, 4  ;;  %v312_v55 = vrot.slane %v311_v53, 4 }
 0x1f5   : > { %v306_v56 = vadd.f32 %v305_v54, %v304_v52  ;;  %v313_v57 = vadd.f32 %v312_v55, %v311_v53 }
 0x1f7   : > { %v307_v58 = vrot.slane %v306_v56, 2  ;;  %v314_v59 = vrot.slane %v313_v57, 2 }
 0x1f9   : > { %v308_v60 = vadd.f32 %v307_v58, %v306_v56  ;;  %v315_v62 = vadd.f32 %v314_v59, %v313_v57  ;;  %v321_v3 = vld.sshfl [vmem:[#allocation1] sm:$0xff pattern:$0x75316420]  ;;  %v322_v12 = vld.sshfl [vmem:[#allocation1 + $0x8] sm:$0xff pattern:$0x75316420]  ;;  %v708_v56 = vstv %s2709_s20 }
 0x1fa   : > { %v325_v5 = vsel %vm5897_vm0, %v321_v3, -inf  ;;  %v332_v14 = vsel %vm5897_vm0, %v322_v12, -inf  ;;  %s3369_s20 = sld [smem:[#allocation9 + $0x1c]] }
 0x1fb   : > { %v309_v61 = vrot.slane %v308_v60, 1  ;;  %v316_v1 = vrot.slane %v315_v62, 1  ;;  %v326_v6 = vrot.slane %v325_v5, 4  ;;  %v333_v15 = vrot.slane %v332_v14, 4 }
 0x1fd   : > { %v310_v63 = vadd.f32 %v309_v61, %v308_v60  ;;  %v317_v2 = vadd.f32 %v316_v1, %v315_v62  ;;  %v327_v7 = vmax.f32 %v325_v5, %v326_v6  ;;  %v334_v16 = vmax.f32 %v332_v14, %v333_v15 }
 0x1ff   : > { %v318_v0 = vmul.f32 0.25, %v310_v63  ;;  %v319_v4 = vmul.f32 0.25, %v317_v2  ;;  %v328_v8 = vrot.slane %v327_v7, 2  ;;  %v335_v17 = vrot.slane %v334_v16, 2 }
 0x201   : > { %398 = vrot.lane.b32.xlu1 %v318_v0, %s3060_s22  ;;  %366 = vrot.lane.b32.xlu0 %v318_v0, %s3061_s24  ;;  %v329_v9 = vmax.f32 %v327_v7, %v328_v8  ;;  %v336_v18 = vmax.f32 %v334_v16, %v335_v17 }
 0x202   : > { %355 = vrot.lane.b32.xlu2 %v318_v0, %s3062_s25 }
 0x203   : > { %v330_v10 = vrot.slane %v329_v9, 1  ;;  %v337_v19 = vrot.slane %v336_v18, 1 }
 0x205   : > { %v331_v13 = vmax.f32 %v329_v9, %v330_v10  ;;  %v338_v20 = vmax.f32 %v336_v18, %v337_v19 }
 0x209   : > { %423 = vrot.lane.b32.xlu1 %v319_v4, %s3062_s25  ;;  %406 = vrot.lane.b32.xlu0 %v318_v0, %s3063_s26 }
 0x20a   : > { %374 = vrot.lane.b32.xlu2 %v318_v0, %s3064_s28 }
 0x211   : > { %448 = vrot.lane.b32.xlu1 %v319_v4, %s3065_s29  ;;  %432 = vrot.lane.b32.xlu0 %v319_v4, %s3061_s24 }
 0x212   : > { %382 = vrot.lane.b32.xlu2 %v318_v0, %s3065_s29 }
 0x219   : > { %472 = vrot.lane.b32.xlu1 %v319_v4, %s3063_s26  ;;  %456 = vrot.lane.b32.xlu0 %v319_v4, %s3066_s30 }
 0x21a   : > { %390 = vrot.lane.b32.xlu2 %v318_v0, %s3066_s30 }
 0x221   : > { %370 = vrot.lane.b32.xlu1 %v331_v13, %s3061_s24  ;;  %480 = vrot.lane.b32.xlu0 %v319_v4, %s3067_s4 }
 0x222   : > { %414 = vrot.lane.b32.xlu2 %v318_v0, %s3067_s4 }
 0x229   : > { %378 = vrot.lane.b32.xlu1 %v331_v13, %s3064_s28  ;;  %394 = vrot.lane.b32.xlu0 %v331_v13, %s3066_s30 }
 0x22a   : > { %440 = vrot.lane.b32.xlu2 %v319_v4, %s3064_s28 }
 0x231   : > { %386 = vrot.lane.b32.xlu1 %v331_v13, %s3065_s29  ;;  %418 = vrot.lane.b32.xlu0 %v331_v13, %s3067_s4 }
 0x232   : > { %464 = vrot.lane.b32.xlu2 %v319_v4, %s3060_s22 }
 0x239   : > { %410 = vrot.lane.b32.xlu1 %v331_v13, %s3063_s26  ;;  %444 = vrot.lane.b32.xlu0 %v338_v20, %s3064_s28  ;;  %s5795_s28 = smov 124  }
 0x23a   : > { %361 = vrot.lane.b32.xlu2 %v331_v13, %s3062_s25 }
 0x241   : > { %436 = vrot.lane.b32.xlu1 %v338_v20, %s3061_s24  ;;  %468 = vrot.lane.b32.xlu0 %v338_v20, %s3060_s22  ;;  %s2716_s24 = sld [smem:[#allocation9 + $0xf]] }
 0x242   : > { %402 = vrot.lane.b32.xlu2 %v331_v13, %s3060_s22  ;;  %s5797_s22 = smov 125  }
 0x247   : > { %v3355_v3 = vstv %s2716_s24  ;;  %s3376_s24 = sld [smem:[#allocation9 + $0x23]] }
 0x249   : > { %460 = vrot.lane.b32.xlu1 %v338_v20, %s3066_s30  ;;  %s3340_s30 = sld [smem:[#allocation9 + $0x16]] }
 0x24a   : > { %428 = vrot.lane.b32.xlu2 %v338_v20, %s3062_s25  ;;  %s3332_s25 = sld [smem:[#allocation9 + $0x6]] }
 0x24f   : > { %v3388_v19 = vstv %s3340_s30  ;;  %s2717_s30 = sld [smem:[#allocation9 + $0x10]] }
 0x250   : > { %v1360_v14 = vstv %s3332_s25  ;;  %s5791_s25 = smov 122  }
 0x251   : > { %484 = vrot.lane.b32.xlu1 %v338_v20, %s3067_s4  ;;  %s3342_s4 = sld [smem:[#allocation9 + $0x24]] }
 0x252   : > { %452 = vrot.lane.b32.xlu2 %v338_v20, %s3065_s29  ;;  %s3336_s29 = sld [smem:[#allocation9 + $0x1d]] }
 0x258   : > { %v768_v15 = vstv %s3336_s29  ;;  %s2724_s29 = sld [smem:[#allocation9 + $0x17]] }
 0x25a   : > { %476 = vrot.lane.b32.xlu2 %v338_v20, %s3063_s26  ;;  %s5793_s26 = smov 123   ;;  %v3391_v20 = vstv %s3342_s4  ;;  %s2731_s4 = sld [smem:[#allocation9 + $0x1e]] }
 0x25c   : > { %v356_v21 = vpop.permute.xlu2 %355 }
 0x25d   : > { %359 = vst.msk [vmem:[#allocation2 + $0x3] sm:$0x1] %vm358_vm12, %v356_v21 }
 0x264   : > { %v375_v22 = vpop.permute.xlu2 %374 }
 0x265   : > { %377 = vst.msk [vmem:[#allocation2 + $0x5] sm:$0x1] %vm358_vm12, %v375_v22  ;;  %v3399_v22 = vstv %s3344_s8  ;;  %s3579_s8 = sld [smem:[#allocation9 + $0x2c]] }
 0x26c   : > { %v383_v23 = vpop.permute.xlu2 %382 }
 0x26d   : > { %385 = vst.msk [vmem:[#allocation2 + $0x6] sm:$0x1] %vm358_vm12, %v383_v23  ;;  %v589_v23 = vstv %s3348_s9  ;;  %s3679_s9 = sld [smem:[#allocation9 + $0x19]] }
 0x273   : > { %v399_v24 = vpop.permute.xlu1 %398  ;;  %v367_v25 = vpop.permute.xlu0 %366 }
 0x274   : > { %401 = vst.msk [vmem:[#allocation2 + $0x8] sm:$0x1] %vm358_vm12, %v399_v24  ;;  %v391_v11 = vpop.permute.xlu2 %390 }
 0x275   : > { %369 = vst.msk [vmem:[#allocation2 + $0x4] sm:$0x1] %vm358_vm12, %v367_v25 }
 0x276   : > { %393 = vst.msk [vmem:[#allocation2 + $0x7] sm:$0x1] %vm358_vm12, %v391_v11 }
 0x27b   : > { %v424_v26 = vpop.permute.xlu1 %423  ;;  %v407_v27 = vpop.permute.xlu0 %406 }
 0x27c   : > { %426 = vst.msk [vmem:[#allocation2 + $0xb] sm:$0x1] %vm358_vm12, %v424_v26  ;;  %v415_v30 = vpop.permute.xlu2 %414 }
 0x27d   : > { %v3291_v31 = vld [vmem:[#allocation2] sm:$0xff]  ;;  %409 = vst.msk [vmem:[#allocation2 + $0x9] sm:$0x1] %vm358_vm12, %v407_v27 }
 0x27e   : > { %417 = vst.msk [vmem:[#allocation2 + $0xa] sm:$0x1] %vm358_vm12, %v415_v30  ;;  %v829_v32 = vmul.f32 %v828_v28, %v3291_v31  ;;  %v696_v33 = vmul.f32 %v695_v29, %v3291_v31  ;;  %v1228_v54 = vmul.f32 %v1227_v48, %v3291_v31  ;;  %v1095_v55 = vmul.f32 %v1094_v50, %v3291_v31 }
 0x27f   : > { %v962_v57 = vmul.f32 %v961_v44, %v3291_v31  ;;  %v709_v59 = vmul.f32 %v708_v56, %v3291_v31  ;;  %v1361_v24 = vmul.f32 %v1360_v14, %v3291_v31  ;;  %v769_v26 = vmul.f32 %v768_v15, %v3291_v31 }
 0x280   : > { %833 = vrot.lane.b32.xlu1 %v829_v32, %s5787_s10  ;;  %700 = vrot.lane.b32.xlu2 %v696_v33, %s5789_s21  ;;  %v749_v27 = vmul.f32 %v3388_v19, %v3291_v31  ;;  %v3422_v32 = vstv %s3365_s17  ;;  %v3425_v33 = vstv %s3369_s20  ;;  %s2725_s17 = sld [smem:[#allocation9 + $0x18]] }
 0x281   : > { %v715_v1 = vrot.slane %v709_v59, 1  ;;  %s3586_s20 = sld [smem:[#allocation9 + $0xa]] }
 0x283   : > { %v449_v34 = vpop.permute.xlu1 %448  ;;  %v433_v35 = vpop.permute.xlu0 %432 }
 0x284   : > { %451 = vst.msk [vmem:[#allocation2 + $0xe] sm:$0x1] %vm358_vm12, %v449_v34  ;;  %v441_v36 = vpop.permute.xlu2 %440  ;;  %v3428_v34 = vstv %s3376_s24  ;;  %s3588_s24 = sld [smem:[#allocation9 + $0x26]] }
 0x285   : > { %435 = vst.msk [vmem:[#allocation2 + $0xc] sm:$0x1] %vm358_vm12, %v433_v35 }
 0x286   : > { %443 = vst.msk [vmem:[#allocation2 + $0xd] sm:$0x1] %vm358_vm12, %v441_v36 }
 0x28b   : > { %v473_v37 = vpop.permute.xlu1 %472  ;;  %v457_v38 = vpop.permute.xlu0 %456 }
 0x28c   : > { %475 = vst.msk [vmem:[#allocation2 + $0x11] sm:$0x1] %vm358_vm12, %v473_v37  ;;  %v465_v39 = vpop.permute.xlu2 %464 }
 0x28d   : > { %459 = vst.msk [vmem:[#allocation2 + $0xf] sm:$0x1] %vm358_vm12, %v457_v38  ;;  %v3439_v38 = vstv %s3378_s23  ;;  %s3474_s23 = sld [smem:[#allocation9 + $0x2b]] }
 0x28e   : > { %467 = vst.msk [vmem:[#allocation2 + $0x10] sm:$0x1] %vm358_vm12, %v465_v39  ;;  %v775_v39 = vrot.slane %v769_v26, 4 }
 0x293   : > { %v371_v40 = vpop.permute.xlu1 %370  ;;  %v481_v41 = vpop.permute.xlu0 %480 }
 0x294   : > { %v3311_v42 = vld [vmem:[#allocation2 + $0x8] sm:$0xff]  ;;  %373 = vst.msk [vmem:[#allocation2 + $0x1c] sm:$0x1] %vm358_vm12, %v371_v40  ;;  %v362_v43 = vpop.permute.xlu2 %361 }
 0x295   : > { %483 = vst.msk [vmem:[#allocation2 + $0x12] sm:$0x1] %vm358_vm12, %v481_v41  ;;  %v963_v45 = vmul.f32 %v961_v44, %v3311_v42  ;;  %v830_v46 = vmul.f32 %v828_v28, %v3311_v42  ;;  %v697_v47 = vmul.f32 %v695_v29, %v3311_v42  ;;  %v710_v58 = vmul.f32 %v708_v56, %v3311_v42  ;;  %v4224_v49 = vld [vmem:[#allocation2 + $0x8] sm:$0xff] }
 0x296   : > { %365 = vst.msk [vmem:[#allocation2 + $0x1b] sm:$0x1] %vm358_vm12, %v362_v43  ;;  %v1229_v2 = vmul.f32 %v1227_v48, %v3311_v42  ;;  %v1096_v5 = vmul.f32 %v1094_v50, %v3311_v42  ;;  %v3374_v8 = vmul.f32 %v3355_v3, %v3311_v42  ;;  %v3385_v18 = vmul.f32 %v768_v15, %v3311_v42 }
 0x297   : > { %968 = vrot.lane.b32.xlu1 %v963_v45, %s5797_s22  ;;  %835 = vrot.lane.b32.xlu2 %v830_v46, %s5787_s10  ;;  %v716_v60 = vrot.slane %v710_v58, 1  ;;  %v3396_v21 = vmul.f32 %v3388_v19, %v3311_v42  ;;  %v3414_v28 = vstv %s3351_s11  ;;  %v3417_v29 = vstv %s3357_s18  ;;  %s3583_s11 = sld [smem:[#allocation9 + $0x25]]  ;;  %5963 = vst [vmem:[#allocation47_spill] sm:$0xff] %v4224_v49 }
 0x298   : > { %702 = vrot.lane.b32.xlu0 %v697_v47, %s5789_s21  ;;  %v736_v17 = vrot.slane %v3374_v8, 2  ;;  %v776_v30 = vrot.slane %v3385_v18, 4  ;;  %v3443_v40 = vmul.f32 %v3414_v28, %v3311_v42  ;;  %v3447_v41 = vmul.f32 %v3417_v29, %v3311_v42  ;;  %s2718_s18 = sld [smem:[#allocation9 + $0x11]] }
 0x299   : > { %v717_v4 = vsel %vm601_vm13, %v715_v1, %v716_v60  ;;  %v756_v35 = vrot.slane %v3396_v21, 3  ;;  %v755_v45 = vrot.slane %v749_v27, 3  ;;  %v3451_v46 = vmul.f32 %v3422_v32, %v3311_v42 }
 0x29a   : > { %v3455_v47 = vmul.f32 %v3425_v33, %v3311_v42  ;;  %v1362_v50 = vmul.f32 %v1360_v14, %v3311_v42  ;;  %v603_v58 = vrot.slane %v3443_v40, 1  ;;  %v620_v59 = vrot.slane %v3447_v41, 2 }
 0x29b   : > { %v379_v51 = vpop.permute.xlu1 %378  ;;  %v395_v52 = vpop.permute.xlu0 %394  ;;  %v3493_v1 = vmul.f32 %v3439_v38, %v3311_v42 }
 0x29c   : > { %381 = vst.msk [vmem:[#allocation2 + $0x1d] sm:$0x1] %vm358_vm12, %v379_v51  ;;  %v403_v53 = vpop.permute.xlu2 %402  ;;  %v3346_v61 = vld [vmem:[#allocation2 + $0x10] sm:$0x3f]  ;;  %v777_v51 = vsel %vm5897_vm0, %v775_v39, %v776_v30 }
 0x29d   : > { %397 = vst.msk [vmem:[#allocation2 + $0x1f] sm:$0x1] %vm358_vm12, %v395_v52  ;;  %v731_v6 = vmul.f32 %v3355_v3, %v3346_v61  ;;  %v711_v7 = vmul.f32 %v708_v56, %v3346_v61  ;;  %v3433_v36 = vmul.f32 %v3391_v20, %v3346_v61  ;;  %v3436_v37 = vmul.f32 %v768_v15, %v3346_v61 }
 0x29e   : > { %405 = vst.msk [vmem:[#allocation2 + $0x20] sm:$0x1] %vm358_vm12, %v403_v53  ;;  %v729_v52 = vmul.f32 %v3355_v3, %v3291_v31  ;;  %v3466_v53 = vmul.f32 %v3391_v20, %v3311_v42 }
 0x29f   : > { %1232 = vrot.lane.b32.xlu1 %v1228_v54, %s5793_s26  ;;  %1099 = vrot.lane.b32.xlu2 %v1095_v55, %s5795_s28  ;;  %v738_v9 = vrot.slane %v731_v6, 2  ;;  %v718_v10 = vrot.slane %v711_v7, 1  ;;  %v757_v54 = vsel %vm635_vm15, %v755_v45, %v756_v35  ;;  %v798_v55 = vrot.slane %v3433_v36, 5 }
 0x2a0   : > { %966 = vrot.lane.b32.xlu0 %v962_v57, %s5797_s22  ;;  %v778_v56 = vrot.slane %v3436_v37, 4  ;;  %v3478_v57 = vmul.f32 %v3428_v34, %v3311_v42  ;;  %v664_v6 = vmul.f32 %v3428_v34, %v3346_v61  ;;  %v796_v36 = vrot.slane %v3466_v53, 5 }
 0x2a1   : > { %v739_v25 = vsel %vm618_vm14, %v736_v17, %v738_v9  ;;  %v719_v11 = vsel %vm601_vm13, %v716_v60, %v718_v10  ;;  %v597_v60 = vmul.f32 %v3414_v28, %v3346_v61  ;;  %v591_v9 = vmul.f32 %v589_v23, %v3311_v42 }
 0x2a2   : > { %v670_v7 = vrot.slane %v3478_v57, 5 }
 0x2a3   : > { %v387_v62 = vpop.permute.xlu1 %386  ;;  %v419_v63 = vpop.permute.xlu0 %418  ;;  %v605_v3 = vrot.slane %v597_v60, 1 }
 0x2a4   : > { %389 = vst.msk [vmem:[#allocation2 + $0x1e] sm:$0x1] %vm358_vm12, %v387_v62  ;;  %v429_v0 = vpop.permute.xlu2 %428  ;;  %v614_v62 = vmul.f32 %v3417_v29, %v3346_v61 }
 0x2a5   : > { %421 = vst.msk [vmem:[#allocation2 + $0x22] sm:$0x1] %vm358_vm12, %v419_v63  ;;  %v637_v63 = vrot.slane %v3451_v46, 3 }
 0x2a6   : > { %431 = vst.msk [vmem:[#allocation2 + $0x23] sm:$0x1] %vm358_vm12, %v429_v0  ;;  %v653_v0 = vrot.slane %v3455_v47, 4 }
 0x2a7   : > { %1234 = vrot.lane.b32.xlu2 %v1229_v2, %s5793_s26  ;;  %720 = vrot.lane.b32.xlu1 %v717_v4, %s5789_s21  ;;  %v631_v2 = vmul.f32 %v3422_v32, %v3346_v61  ;;  %v622_v4 = vrot.slane %v614_v62, 2  ;;  %s4047_s26 = sld [smem:[#allocation9 + $0x49]] }
 0x2a8   : > { %1101 = vrot.lane.b32.xlu0 %v1096_v5, %s5795_s28  ;;  %v648_v5 = vmul.f32 %v3425_v33, %v3346_v61  ;;  %s4059_s28 = sld [smem:[#allocation9 + $0x48]] }
 0x2a9   : > { %v639_v10 = vrot.slane %v631_v2, 3  ;;  %v623_v14 = vsel %vm618_vm14, %v620_v59, %v622_v4 }
 0x2aa   : > { %v655_v15 = vrot.slane %v648_v5, 4 }
 0x2ab   : > { %v411_v12 = vpop.permute.xlu1 %410  ;;  %v445_v13 = vpop.permute.xlu0 %444  ;;  %v640_v26 = vsel %vm635_vm15, %v637_v63, %v639_v10 }
 0x2ac   : > { %413 = vst.msk [vmem:[#allocation2 + $0x21] sm:$0x1] %vm358_vm12, %v411_v12  ;;  %v453_v16 = vpop.permute.xlu2 %452  ;;  %v681_v12 = vmul.f32 %v3439_v38, %v3346_v61  ;;  %v656_v37 = vsel %vm5897_vm0, %v653_v0, %v655_v15 }
 0x2ad   : > { %447 = vst.msk [vmem:[#allocation2 + $0x25] sm:$0x1] %vm358_vm12, %v445_v13  ;;  %v606_v13 = vsel %vm601_vm13, %v603_v58, %v605_v3 }
 0x2ae   : > { %455 = vst.msk [vmem:[#allocation2 + $0x26] sm:$0x1] %vm358_vm12, %v453_v16  ;;  %v672_v16 = vrot.slane %v664_v6, 5  ;;  %v689_v27 = vrot.slane %v681_v12, 6  ;;  %v881_v6 = vstv %s2724_s29  ;;  %s2732_s29 = sld [smem:[#allocation9 + $0x1f]] }
 0x2af   : > { %742 = vrot.lane.b32.xlu1 %v739_v25, %s5789_s21  ;;  %722 = vrot.lane.b32.xlu2 %v719_v11, %s5789_s21  ;;  %v687_v25 = vrot.slane %v3493_v1, 6  ;;  %v610_v11 = vadd.f32 %v606_v13, %v591_v9  ;;  %v3557_v9 = vstv %s2717_s30  ;;  %s2712_s30 = sld [smem:[#allocation9 + $0xb]] }
 0x2b0   : > { %1365 = vrot.lane.b32.xlu0 %v1361_v24, %s5791_s25  ;;  %v673_v39 = vsel %vm668_vm1, %v670_v7, %v672_v16  ;;  %v3568_v15 = vmul.f32 %v3557_v9, %v3311_v42 }
 0x2b1   : > { %v627_v45 = vadd.f32 %v623_v14, %v610_v11  ;;  %v883_v14 = vmul.f32 %v881_v6, %v3311_v42  ;;  %v862_v11 = vmul.f32 %v3557_v9, %v3291_v31 }
 0x2b3   : > { %v437_v43 = vpop.permute.xlu1 %436  ;;  %v469_v44 = vpop.permute.xlu0 %468  ;;  %v644_v18 = vadd.f32 %v640_v26, %v627_v45  ;;  %v789_v26 = vmul.f32 %v3391_v20, %v3291_v31  ;;  %v889_v21 = vrot.slane %v883_v14, 3  ;;  %v842_v14 = vmul.f32 %v3399_v22, %v3291_v31 }
 0x2b4   : > { %439 = vst.msk [vmem:[#allocation2 + $0x24] sm:$0x1] %vm358_vm12, %v437_v43  ;;  %v477_v48 = vpop.permute.xlu2 %476  ;;  %v735_v43 = vrot.slane %v729_v52, 2 }
 0x2b5   : > { %471 = vst.msk [vmem:[#allocation2 + $0x28] sm:$0x1] %vm358_vm12, %v469_v44  ;;  %v808_v44 = vstv %s3474_s23  ;;  %v660_v62 = vadd.f32 %v656_v37, %v644_v18  ;;  %v868_v37 = vrot.slane %v862_v11, 2  ;;  %s3596_s23 = sld [smem:[#allocation9 + $0x2d]]  ;;  %v941_v18 = vstv %s3579_s8 }
 0x2b6   : > { %479 = vst.msk [vmem:[#allocation2 + $0x29] sm:$0x1] %vm358_vm12, %v477_v48  ;;  %v690_v48 = vsel %vm685_vm2, %v687_v25, %v689_v27  ;;  %v3539_v52 = vmul.f32 %v808_v44, %v3311_v42  ;;  %v737_v60 = vsel %vm618_vm14, %v735_v43, %v736_v17  ;;  %v901_v43 = vstv %s2731_s4  ;;  %s2719_s4 = sld [smem:[#allocation9 + $0x12]] }
 0x2b7   : > { %780 = vrot.lane.b32.xlu1 %v777_v51, %s5789_s21  ;;  %760 = vrot.lane.b32.xlu2 %v757_v54, %s5789_s21  ;;  %v779_v51 = vsel %vm5897_vm0, %v776_v30, %v778_v56  ;;  %v844_v54 = vmul.f32 %v3399_v22, %v3346_v61  ;;  %v3551_v30 = vmul.f32 %v3399_v22, %v3311_v42  ;;  %s3665_s8 = sld [smem:[#allocation9 + $0x20]] }
 0x2b8   : > { %1367 = vrot.lane.b32.xlu0 %v1362_v50, %s5791_s25  ;;  %v799_v50 = vsel %vm668_vm1, %v796_v36, %v798_v55  ;;  %v751_v55 = vmul.f32 %v3388_v19, %v3346_v61  ;;  %v809_v56 = vmul.f32 %v808_v44, %v3291_v31  ;;  %v816_v17 = vrot.slane %v3539_v52, 6  ;;  %s4030_s25 = sld [smem:[#allocation9 + $0x5d]] }
 0x2b9   : > { %v851_v8 = vrot.slane %v844_v54, 1  ;;  %v677_v4 = vadd.f32 %v673_v39, %v660_v62  ;;  %v849_v19 = vrot.slane %v3551_v30, 1  ;;  %v795_v39 = vrot.slane %v789_v26, 5 }
 0x2ba   : > { %v758_v3 = vrot.slane %v751_v55, 3  ;;  %v815_v5 = vrot.slane %v809_v56, 6  ;;  %v811_v54 = vmul.f32 %v808_v44, %v3346_v61  ;;  %v3606_v52 = vmul.f32 %v901_v43, %v3311_v42 }
 0x2bb   : > { %v461_v24 = vpop.permute.xlu1 %460  ;;  %v3559_v10 = vadd.f32 %v690_v48, %v677_v4  ;;  %v852_v12 = vsel %vm601_vm13, %v849_v19, %v851_v8  ;;  %v904_v48 = vmul.f32 %v901_v43, %v3346_v61  ;;  %v3611_v56 = vstv %s3583_s11  ;;  %s3683_s11 = sld [smem:[#allocation9 + $0x27]] }
 0x2bc   : > { %463 = vst.msk [vmem:[#allocation2 + $0x27] sm:$0x1] %vm358_vm12, %v461_v24  ;;  %v817_v13 = vsel %vm685_vm2, %v815_v5, %v816_v17  ;;  %v759_v16 = vsel %vm635_vm15, %v756_v35, %v758_v3  ;;  %v882_v24 = vmul.f32 %v881_v6, %v3291_v31  ;;  %v869_v35 = vrot.slane %v3568_v15, 2 }
 0x2bd   : > { %v818_v53 = vrot.slane %v811_v54, 6  ;;  %v3613_v62 = vstv %s2718_s18  ;;  %v3615_v44 = vstv %s2725_s17  ;;  %v3622_v3 = vmul.f32 %v941_v18, %v3311_v42  ;;  %s3699_s18 = sld [smem:[#allocation9 + $0x2e]] }
 0x2be   : > { %v888_v27 = vrot.slane %v882_v24, 3  ;;  %v870_v20 = vsel %vm618_vm14, %v868_v37, %v869_v35  ;;  %v3626_v4 = vmul.f32 %v3611_v56, %v3311_v42  ;;  %v3646_v24 = vstv %s3596_s23  ;;  %s3726_s17 = sld [smem:[#allocation9 + $0x1a]] }
 0x2bf   : > { %802 = vrot.lane.b32.xlu1 %v799_v50, %s5789_s21  ;;  %782 = vrot.lane.b32.xlu2 %v779_v51, %s5789_s21  ;;  %v884_v50 = vmul.f32 %v881_v6, %v3346_v61  ;;  %v797_v51 = vsel %vm668_vm1, %v795_v39, %v796_v36  ;;  %v909_v36 = vrot.slane %v3606_v52, 4  ;;  %v819_v5 = vsel %vm685_vm2, %v816_v17, %v818_v53  ;;  %s3748_s23 = sld [smem:[#allocation9 + $0xc]] }
 0x2c0   : > { %740 = vrot.lane.b32.xlu0 %v737_v60, %s5789_s21  ;;  %v890_v45 = vsel %vm635_vm15, %v888_v27, %v889_v21  ;;  %v911_v60 = vrot.slane %v904_v48, 4  ;;  %v595_v6 = vmul.f32 %v3414_v28, %v3291_v31  ;;  %v922_v17 = vmul.f32 %v3611_v56, %v3291_v31 }
 0x2c1   : > { %v891_v55 = vrot.slane %v884_v50, 3  ;;  %v590_v11 = vmul.f32 %v589_v23, %v3291_v31  ;;  %v3651_v28 = vstv %s2732_s29  ;;  %v3653_v26 = vstv %s2712_s30  ;;  %s3774_s29 = sld [smem:[#allocation9 + $0xd]] }
 0x2c2   : > { %v912_v8 = vsel %vm5897_vm0, %v909_v36, %v911_v60  ;;  %v612_v27 = vmul.f32 %v3417_v29, %v3291_v31  ;;  %v3661_v22 = vmul.f32 %v3422_v32, %v3291_v31  ;;  %v949_v37 = vrot.slane %v3622_v3, 6  ;;  %s3815_s30 = sld [smem:[#allocation9 + $0x2f]] }
 0x2c3   : > { %v485_v2 = vpop.permute.xlu1 %484  ;;  %v5785_v39 = vrot.slane %v3626_v4, 5  ;;  %v602_v23 = vrot.slane %v595_v6, 1  ;;  %v3677_v29 = vmul.f32 %v3439_v38, %v3291_v31  ;;  %v848_v32 = vrot.slane %v842_v14, 1 }
 0x2c4   : > { %487 = vst.msk [vmem:[#allocation2 + $0x2a] sm:$0x1] %vm358_vm12, %v485_v2  ;;  %v892_v2 = vsel %vm635_vm15, %v889_v21, %v891_v55  ;;  %v3655_v21 = vstv %s2719_s4  ;;  %v928_v50 = vrot.slane %v922_v17, 5  ;;  %v619_v55 = vrot.slane %v612_v27, 2  ;;  %s3903_s4 = sld [smem:[#allocation9 + $0x22]] }
 0x2c5   : > { %v850_v53 = vsel %vm601_vm13, %v848_v32, %v849_v19  ;;  %v636_v3 = vrot.slane %v3661_v22, 3  ;;  %v686_v19 = vrot.slane %v3677_v29, 6  ;;  %v3731_v14 = vmul.f32 %v3615_v44, %v3291_v31 }
 0x2c6   : > { %v930_v40 = vsel %vm668_vm1, %v928_v50, %v5785_v39  ;;  %v3738_v22 = vstv %s3665_s8  ;;  %v3746_v32 = vmul.f32 %v3653_v26, %v3291_v31  ;;  %v3755_v50 = vmul.f32 %v3646_v24, %v3291_v31  ;;  %s3912_s8 = sld [smem:[#allocation9 + $0x14]] }
 0x2c7   : > { %855 = vrot.lane.b32.xlu1 %v852_v12, %s5787_s10  ;;  %820 = vrot.lane.b32.xlu2 %v817_v13, %s5789_s21  ;;  %v3634_v12 = vstv %s3586_s20  ;;  %v3637_v13 = vstv %s3588_s24  ;;  %s3733_s20 = sld [smem:[#allocation9 + $0x13]]  ;;  %v638_v15 = vsel %vm635_vm15, %v636_v3, %v637_v63  ;;  %v1036_v57 = vmul.f32 %v3651_v28, %v3311_v42 }
 0x2c8   : > { %762 = vrot.lane.b32.xlu0 %v759_v16, %s5789_s21  ;;  %v942_v16 = vmul.f32 %v941_v18, %v3291_v31  ;;  %v3693_v38 = vmul.f32 %v3634_v12, %v3291_v31  ;;  %v3697_v54 = vmul.f32 %v3637_v13, %v3291_v31  ;;  %s3740_s24 = sld [smem:[#allocation9 + $0x28]]  ;;  %v3772_v41 = vstv %s3699_s18 }
 0x2c9   : > { %s3936_s18 = sld [smem:[#allocation9 + $0x1b]] }
 0x2ca   : > { %v948_v48 = vrot.slane %v942_v16, 6  ;;  %v981_v27 = vrot.slane %v3693_v38, 1  ;;  %v5928_v1 = vrot.slane %v3697_v54, 5 }
 0x2cc   : > { %v950_v60 = vsel %vm685_vm2, %v948_v48, %v949_v37  ;;  %v621_v48 = vsel %vm618_vm14, %v619_v55, %v620_v59  ;;  %v1017_v55 = vmul.f32 %v3615_v44, %v3346_v61 }
 0x2cf   : > { %893 = vrot.lane.b32.xlu1 %v890_v45, %s5787_s10  ;;  %873 = vrot.lane.b32.xlu2 %v870_v20, %s5787_s10  ;;  %v3669_v45 = vmul.f32 %v3425_v33, %v3291_v31  ;;  %v3673_v20 = vmul.f32 %v3428_v34, %v3291_v31  ;;  %v604_v33 = vsel %vm601_vm13, %v602_v23, %v603_v58  ;;  %v3853_v23 = vstv %s3774_s29  ;;  %s3998_s29 = sld [smem:[#allocation9 + $0x5c]] }
 0x2d0   : > { %800 = vrot.lane.b32.xlu0 %v797_v51, %s5789_s21  ;;  %v995_v51 = vmul.f32 %v3613_v62, %v3291_v31  ;;  %v3689_v34 = vmul.f32 %v901_v43, %v3291_v31  ;;  %v3707_v58 = vmul.f32 %v3613_v62, %v3311_v42  ;;  %v944_v43 = vmul.f32 %v941_v18, %v3346_v61 }
 0x2d1   : > { %v652_v18 = vrot.slane %v3669_v45, 4  ;;  %v669_v30 = vrot.slane %v3673_v20, 5  ;;  %v3827_v45 = vstv %s3740_s24  ;;  %5926 = vst [vmem:[#allocation27_spill] sm:$0xff] %v3853_v23  ;;  %s3970_s24 = sld [smem:[#allocation9 + $0x47]] }
 0x2d2   : > { %v1001_v6 = vrot.slane %v995_v51, 2  ;;  %v5786_v16 = vrot.slane %v3707_v58, 2  ;;  %v951_v17 = vrot.slane %v944_v43, 6  ;;  %v3758_v51 = vstv %s3679_s9  ;;  %5925 = vst [vmem:[#allocation26_spill] sm:$0xff] %v3827_v45  ;;  %s3918_s9 = sld [smem:[#allocation9 + $0x21]] }
 0x2d3   : > { %v671_v52 = vsel %vm668_vm1, %v669_v30, %v670_v7  ;;  %v3901_v7 = vmul.f32 %v3853_v23, %v3291_v31  ;;  %v5929_v29 = vrot.slane %v3707_v58, 2  ;;  %v1130_v58 = vmul.f32 %v3655_v21, %v3346_v61 }
 0x2d4   : > { %v1003_v59 = vsel %vm618_vm14, %v1001_v6, %v5786_v16  ;;  %v952_v43 = vsel %vm685_vm2, %v949_v37, %v951_v17  ;;  %v3794_v37 = vmul.f32 %v3758_v51, %v3291_v31  ;;  %v3810_v17 = vmul.f32 %v3772_v41, %v3291_v31 }
 0x2d7   : > { %915 = vrot.lane.b32.xlu1 %v912_v8, %s5787_s10  ;;  %895 = vrot.lane.b32.xlu2 %v892_v2, %s5787_s10  ;;  %v864_v8 = vmul.f32 %v3557_v9, %v3346_v61  ;;  %v3719_v2 = vmul.f32 %v3651_v28, %v3291_v31  ;;  %v908_v9 = vrot.slane %v3689_v34, 4 }
 0x2d8   : > { %822 = vrot.lane.b32.xlu0 %v819_v5, %s5789_s21  ;;  %v609_v5 = vadd.f32 %v604_v33, %v590_v11  ;;  %v3761_v33 = vstv %s3683_s11  ;;  %s3927_s11 = sld [smem:[#allocation9 + $0x29]] }
 0x2d9   : > { %v871_v11 = vrot.slane %v864_v8, 2  ;;  %v3798_v6 = vmul.f32 %v3761_v33, %v3291_v31  ;;  %s4027_s21 = sld [smem:[#allocation9 + $0x4f]] }
 0x2da   : > { %v626_v38 = vadd.f32 %v621_v48, %v609_v5  ;;  %v3850_v5 = vmul.f32 %v3827_v45, %v3291_v31 }
 0x2db   : > { %v872_v8 = vsel %vm618_vm14, %v869_v35, %v871_v11  ;;  %v3806_v35 = vmul.f32 %v3615_v44, %v3311_v42  ;;  %v3813_v11 = vstv %s3726_s17  ;;  %v1024_v44 = vrot.slane %v1017_v55, 3  ;;  %s3945_s17 = sld [smem:[#allocation9 + $0x37]] }
 0x2dc   : > { %v643_v48 = vadd.f32 %v638_v15, %v626_v38  ;;  %v3832_v15 = vstv %s3748_s23  ;;  %v3836_v46 = vmul.f32 %v3813_v11, %v3291_v31  ;;  %v654_v55 = vsel %vm5897_vm0, %v652_v18, %v653_v0  ;;  %s3983_s23 = sld [smem:[#allocation9 + $0x55]] }
 0x2dd   : > { %v1022_v3 = vrot.slane %v3806_v35, 3  ;;  %v1194_v39 = vrot.slane %v3798_v6, 5  ;;  %v3863_v18 = vmul.f32 %v3637_v13, %v3311_v42  ;;  %v3879_v63 = vmul.f32 %v3832_v15, %v3291_v31 }
 0x2de   : > { %v659_v16 = vadd.f32 %v654_v55, %v643_v48  ;;  %v997_v48 = vmul.f32 %v3613_v62, %v3346_v61  ;;  %v910_v55 = vsel %vm5897_vm0, %v908_v9, %v909_v36  ;;  %v977_v36 = vmul.f32 %v3634_v12, %v3346_v61 }
 0x2df   : > { %953 = vrot.lane.b32.xlu1 %v950_v60, %s5787_s10  ;;  %933 = vrot.lane.b32.xlu2 %v930_v40, %s5787_s10  ;;  %v3765_v60 = vmul.f32 %v3738_v22, %v3291_v31  ;;  %v3769_v40 = vmul.f32 %v3655_v21, %v3291_v31  ;;  %v1025_v47 = vsel %vm635_vm15, %v1022_v3, %v1024_v44  ;;  %v3892_v62 = vstv %s3815_s30  ;;  %s4005_s30 = sld [smem:[#allocation9 + $0x3a]] }
 0x2e0   : > { %853 = vrot.lane.b32.xlu0 %v850_v53, %s5787_s10  ;;  %v3784_v53 = vmul.f32 %v3634_v12, %v3311_v42  ;;  %v676_v34 = vadd.f32 %v671_v52, %v659_v16  ;;  %v1062_v12 = vrot.slane %v3863_v18, 5  ;;  %v1004_v30 = vrot.slane %v997_v48, 2 }
 0x2e1   : > { %v3910_v16 = vmul.f32 %v3653_v26, %v3311_v42  ;;  %v984_v18 = vrot.slane %v977_v36, 1  ;;  %v1042_v52 = vrot.slane %v1036_v57, 4  ;;  %v3934_v20 = vmul.f32 %v3892_v62, %v3291_v31 }
 0x2e2   : > { %v1169_v35 = vmul.f32 %v3738_v22, %v3311_v42  ;;  %v5943_v6 = vrot.slane %v3810_v17, 6  ;;  %v4131_v17 = vstv %s3903_s4  ;;  %s5951_s4 = smov 124   ;;  %v5967_v44 = vrot.slane %v3901_v7, 1 }
 0x2e3   : > { %v1115_v36 = vrot.slane %v3910_v16, 1  ;;  %5947 = vst [vmem:[#allocation36_spill] sm:$0xff] %v4131_v17 }
 0x2e7   : > { %1006 = vrot.lane.b32.xlu1 %v1003_v59, %s5797_s22  ;;  %955 = vrot.lane.b32.xlu2 %v952_v43, %s5787_s10  ;;  %v3817_v59 = vpop.permute.xlu2 %700  ;;  %v982_v43 = vrot.slane %v3784_v53, 1 }
 0x2e8   : > { %875 = vrot.lane.b32.xlu0 %v872_v8, %s5787_s10  ;;  %v3824_v8 = vstv %s3733_s20  ;;  %s3956_s20 = sld [smem:[#allocation9 + $0x40]] }
 0x2e9   : > { %v3846_v38 = vmul.f32 %v3824_v8, %v3291_v31  ;;  %v983_v0 = vsel %vm601_vm13, %v981_v27, %v982_v43  ;;  %v924_v27 = vmul.f32 %v3611_v56, %v3346_v61  ;;  %v1077_v56 = vmul.f32 %v3646_v24, %v3346_v61 }
 0x2eb   : > { %v1084_v48 = vrot.slane %v1077_v56, 6  ;;  %v5930_v56 = vrot.slane %v3626_v4, 5  ;;  %v985_v4 = vsel %vm601_vm13, %v982_v43, %v984_v18  ;;  %v1110_v43 = vmul.f32 %v3653_v26, %v3346_v61 }
 0x2ec   : > { %v1190_v26 = vmul.f32 %v3761_v33, %v3346_v61  ;;  %v1170_v18 = vmul.f32 %v3738_v22, %v3346_v61  ;;  %v5935_v22 = vrot.slane %v3755_v50, 6 }
 0x2ef   : > { %1028 = vrot.lane.b32.xlu1 %v1025_v47, %s5797_s22  ;;  %986 = vrot.lane.b32.xlu2 %v983_v0, %s5797_s22  ;;  %v1076_v47 = vmul.f32 %v3646_v24, %v3311_v42  ;;  %v931_v0 = vrot.slane %v924_v27, 5  ;;  %v688_v24 = vsel %vm685_vm2, %v686_v19, %v687_v25  ;;  %v1037_v27 = vmul.f32 %v3651_v28, %v3346_v61 }
 0x2f0   : > { %913 = vrot.lane.b32.xlu0 %v910_v55, %s5787_s10  ;;  %v1057_v55 = vmul.f32 %v3637_v13, %v3346_v61  ;;  %v3929_v13 = vadd.f32 %v688_v24, %v676_v34  ;;  %v1063_v25 = vsel %vm668_vm1, %v5928_v1, %v1062_v12  ;;  %v1005_v28 = vsel %vm618_vm14, %v5929_v29, %v1004_v30 }
 0x2f1   : > { %v3894_v9 = vpop.permute.xlu2 %835  ;;  %v1082_v19 = vrot.slane %v1076_v47, 6  ;;  %v932_v31 = vsel %vm668_vm1, %v5930_v56, %v931_v0  ;;  %v1129_v34 = vmul.f32 %v3655_v21, %v3311_v42  ;;  %v5931_v30 = vrot.slane %v3731_v14, 3 }
 0x2f2   : > { %5927 = vst [vmem:[#allocation28_spill] sm:$0xff] %v3894_v9  ;;  %v1064_v54 = vrot.slane %v1057_v55, 5  ;;  %v1044_v0 = vrot.slane %v1037_v27, 4  ;;  %v5933_v55 = vrot.slane %v3719_v2, 4  ;;  %v1149_v14 = vmul.f32 %v3758_v51, %v3311_v42 }
 0x2f3   : > { %v1085_v57 = vsel %vm685_vm2, %v1082_v19, %v1084_v48  ;;  %v3968_v47 = vsel %vm635_vm15, %v5931_v30, %v1022_v3  ;;  %v5934_v3 = vrot.slane %v3746_v32, 1  ;;  %v1189_v2 = vmul.f32 %v3761_v33, %v3311_v42 }
 0x2f4   : > { %v1043_v53 = vsel %vm5897_vm0, %v5933_v55, %v1042_v52  ;;  %v4001_v48 = vsel %vm668_vm1, %v1062_v12, %v1064_v54  ;;  %v1135_v27 = vrot.slane %v1129_v34, 2  ;;  %v1137_v1 = vrot.slane %v1130_v58, 2 }
 0x2f5   : > { %v3990_v24 = vsel %vm601_vm13, %v5934_v3, %v1115_v36  ;;  %v1150_v32 = vmul.f32 %v3758_v51, %v3346_v61  ;;  %v4010_v33 = vsel %vm5897_vm0, %v1042_v52, %v1044_v0  ;;  %v4015_v29 = vsel %vm685_vm2, %v5935_v22, %v1082_v19 }
 0x2f6   : > { %v1243_v12 = vmul.f32 %v3832_v15, %v3346_v61  ;;  %v1117_v51 = vrot.slane %v1110_v43, 1  ;;  %v1175_v56 = vrot.slane %v1169_v35, 4  ;;  %v1242_v52 = vmul.f32 %v3832_v15, %v3311_v42  ;;  %v4061_v35 = vpop.permute.xlu1 %833 }
 0x2f7   : > { %1066 = vrot.lane.b32.xlu1 %v1063_v25, %s5797_s22  ;;  %1008 = vrot.lane.b32.xlu2 %v1005_v28, %s5797_s22  ;;  %v4007_v25 = vld [vmem:[#allocation2 + $0x20] sm:$0xff]  ;;  %v4021_v28 = vmul.f32 %v3772_v41, %v3311_v42  ;;  %v1195_v50 = vrot.slane %v1189_v2, 5  ;;  %v1197_v19 = vrot.slane %v1190_v26, 5  ;;  %v1177_v54 = vrot.slane %v1170_v18, 4  ;;  %5938 = vst [vmem:[#allocation31_spill] sm:$0xff] %v4061_v35 }
 0x2f8   : > { %935 = vrot.lane.b32.xlu0 %v932_v31, %s5787_s10  ;;  %s4023_s10 = sld [smem:[#allocation9 + $0x41]]  ;;  %v1155_v31 = vrot.slane %v1149_v14, 3  ;;  %v5803_v34 = vstv %s3945_s17  ;;  %v4035_v58 = vsel %vm618_vm14, %v1135_v27, %v1137_v1  ;;  %v5936_v30 = vrot.slane %v3769_v40, 2 }
 0x2f9   : > { %v3972_v21 = vpop.permute.xlu2 %1099  ;;  %v1157_v15 = vrot.slane %v1150_v32, 3  ;;  %v4045_v55 = vmul.f32 %v5803_v34, %v4007_v25  ;;  %v4053_v43 = vmul.f32 %v3813_v11, %v3311_v42  ;;  %v4057_v40 = vmul.f32 %v3824_v8, %v3311_v42 }
 0x2fa   : > { %5932 = vst [vmem:[#allocation29_spill] sm:$0xff] %v3972_v21  ;;  %v4040_v0 = vsel %vm618_vm14, %v5936_v30, %v1135_v27  ;;  %v5940_v3 = vrot.slane %v3765_v60, 4  ;;  %v1248_v26 = vrot.slane %v1242_v52, 1  ;;  %v1210_v18 = vmul.f32 %v3772_v41, %v3346_v61 }
 0x2fb   : > { %5937 = vst [vmem:[#allocation30_spill] sm:$0xff] %v4045_v55  ;;  %v5941_v27 = vrot.slane %v3794_v37, 3  ;;  %v4085_v16 = vsel %vm668_vm1, %v1195_v50, %v1197_v19  ;;  %v4093_v60 = vsel %vm668_vm1, %v1194_v39, %v1195_v50  ;;  %v4098_v41 = vsel %vm635_vm15, %v1155_v31, %v1157_v15 }
 0x2fc   : > { %v4073_v2 = vsel %vm5897_vm0, %v5940_v3, %v1175_v56  ;;  %v4102_v37 = vmul.f32 %v3827_v45, %v3311_v42  ;;  %v1283_v32 = vmul.f32 %v3813_v11, %v3346_v61  ;;  %v1347_v22 = vrot.slane %v3934_v20, 6 }
 0x2fd   : > { %v4082_v1 = vsel %vm635_vm15, %v5941_v27, %v1155_v31  ;;  %v1217_v11 = vrot.slane %v1210_v18, 6  ;;  %v5944_v20 = vrot.slane %v3879_v63, 1  ;;  %v4128_v31 = vmul.f32 %v3853_v23, %v3311_v42 }
 0x2fe   : > { %5942 = vst [vmem:[#allocation33_spill] sm:$0xff] %v4102_v37  ;;  %v4137_v52 = vmul.f32 %v3892_v62, %v3311_v42  ;;  %v1263_v50 = vmul.f32 %v3824_v8, %v3346_v61  ;;  %v4143_v63 = vmul.f32 %v4131_v17, %v3311_v42  ;;  %v4146_v19 = vstv %s3912_s8  ;;  %s4177_s8 = sld [smem:[#allocation9 + $0x58]] }
 0x2ff   : > { %1088 = vrot.lane.b32.xlu1 %v1085_v57, %s5797_s22  ;;  %1046 = vrot.lane.b32.xlu2 %v1043_v53, %s5797_s22  ;;  %v1250_v57 = vrot.slane %v1243_v12, 1  ;;  %v1215_v53 = vrot.slane %v4021_v28, 6  ;;  %v1288_v28 = vrot.slane %v4053_v43, 3  ;;  %5946 = vst [vmem:[#allocation35_spill] sm:$0xff] %v4128_v31  ;;  %v1290_v30 = vrot.slane %v1283_v32, 3  ;;  %v4169_v43 = vld [vmem:[#allocation2] sm:$0xff] }
 0x300   : > { %988 = vrot.lane.b32.xlu0 %v985_v4, %s5797_s22  ;;  %v4068_v4 = vsel %vm601_vm13, %v1115_v36, %v1117_v51  ;;  %s4077_s22 = sld [smem:[#allocation9 + $0x42]]  ;;  %v4088_v36 = vsel %vm5897_vm0, %v1175_v56, %v1177_v54  ;;  %v1268_v51 = vrot.slane %v4057_v40, 2  ;;  %v4124_v56 = vsel %vm601_vm13, %v5944_v20, %v1248_v26  ;;  %5948 = vst [vmem:[#allocation37_spill] sm:$0xff] %v4137_v52 }
 0x301   : > { %v4063_v14 = vpop.permute.xlu2 %1234  ;;  %v4110_v39 = vsel %vm601_vm13, %v1248_v26, %v1250_v57  ;;  %v4115_v12 = vsel %vm685_vm2, %v5943_v6, %v1215_v53  ;;  %5945 = vst [vmem:[#allocation34_spill] sm:$0xff] %v4124_v56  ;;  %v5807_v54 = vrot.slane %v4102_v37, 5  ;;  %v4157_v8 = vmul.f32 %v4146_v19, %v3311_v42 }
 0x302   : > { %5939 = vst [vmem:[#allocation32_spill] sm:$0xff] %v4063_v14  ;;  %v1300_v15 = vstv %s3918_s9  ;;  %v5954_v57 = vrot.slane %v3836_v46, 3  ;;  %v4175_v3 = vstv %s3927_s11  ;;  %v5958_v46 = vrot.slane %v3846_v38, 2  ;;  %s4194_s9 = sld [smem:[#allocation9 + $0x50]] }
 0x303   : > { %5949 = vst [vmem:[#allocation38_spill] sm:$0xff] %v4143_v63  ;;  %v1303_v40 = vmul.f32 %v1300_v15, %v3346_v61  ;;  %v4189_v27 = vsel %vm685_vm2, %v1215_v53, %v1217_v11  ;;  %v1394_v6 = vmul.f32 %v4169_v43, %v4146_v19  ;;  %v1270_v34 = vrot.slane %v1263_v50, 2  ;;  %s4203_s11 = sld [smem:[#allocation9 + $0x5f]] }
 0x304   : > { %5950 = vst [vmem:[#allocation39_spill] sm:$0xff] %v4146_v19  ;;  %v5960_v53 = vrot.slane %v3850_v5, 5  ;;  %v4214_v32 = vmul.f32 %v4169_v43, %v1300_v15  ;;  %v4218_v50 = vmul.f32 %v4169_v43, %v4175_v3  ;;  %v4228_v5 = vmul.f32 %v4224_v49, %v4175_v3 }
 0x305   : > { %5953 = vst [vmem:[#allocation40_spill] sm:$0xff] %v4157_v8  ;;  %v5970_v14 = vrot.slane %v4137_v52, 6  ;;  %v5973_v7 = vrot.slane %v4143_v63, 4  ;;  %v4353_v63 = vstv %s4107_s1  ;;  %v4389_v35 = vstv %s4220_s15  ;;  %s4490_s1 = sld [smem:[#allocation9 + $0x54]] }
 0x306   : > { %5955 = vst [vmem:[#allocation41_spill] sm:$0xff] %v4169_v43  ;;  %v4210_v11 = vsel %vm668_vm1, %v5960_v53, %v5807_v54  ;;  %v4231_v53 = vstv %s3956_s20  ;;  %v5966_v54 = vrot.slane %v4128_v31, 1  ;;  %s4265_s20 = sld [smem:[#allocation9 + $0x31]]  ;;  %v4397_v37 = vstv %s4233_s19 }
 0x307   : > { %1119 = vrot.lane.b32.xlu1 %v3990_v24, %s5951_s4  ;;  %1068 = vrot.lane.b32.xlu2 %v4001_v48, %s5952_s13  ;;  %v4167_v24 = vsel %vm635_vm15, %v5954_v57, %v1288_v28  ;;  %v1434_v48 = vmul.f32 %v4169_v43, %v4131_v17  ;;  %5956 = vst [vmem:[#allocation42_spill] sm:$0xff] %v4175_v3  ;;  %v1310_v57 = vrot.slane %v1303_v40, 4  ;;  %v1400_v40 = vrot.slane %v1394_v6, 2  ;;  %s4630_s15 = sld [smem:[#allocation9 + $0x52]] }
 0x308   : > { %1026 = vrot.lane.b32.xlu0 %v3968_v47, %s5952_s13  ;;  %v4186_v47 = vsel %vm618_vm14, %v5958_v46, %v1268_v51  ;;  %v4201_v46 = vmul.f32 %v1300_v15, %v3311_v42  ;;  %5961 = vst [vmem:[#allocation45_spill] sm:$0xff] %v4214_v32  ;;  %v4222_v42 = vld [vmem:[#allocation2 + $0x28] sm:$0x3f]  ;;  %v4236_v15 = vsel %vm635_vm15, %v1288_v28, %v1290_v30  ;;  %v4372_v3 = vstv %s4177_s8  ;;  %s4634_s19 = sld [smem:[#allocation9 + $0x59]] }
 0x309   : > { %v4179_v26 = vpop.permute.xlu1 %968  ;;  %v4181_v18 = vpop.permute.xlu2 %722  ;;  %5962 = vst [vmem:[#allocation46_spill] sm:$0xff] %v4218_v50  ;;  %v1440_v38 = vrot.slane %v1434_v48, 4  ;;  %v4243_v48 = vsel %vm601_vm13, %v5967_v44, %v5966_v54  ;;  %v4247_v55 = vmul.f32 %v4231_v53, %v4007_v25  ;;  %v4254_v28 = vsel %vm685_vm2, %v1347_v22, %v5970_v14  ;;  %s5133_s8 = sld [smem:[#allocation9 + $0x33]] }
 0x30a   : > { %5957 = vst [vmem:[#allocation43_spill] sm:$0xff] %v4179_v26  ;;  %v4196_v20 = vpop.permute.xlu0 %702  ;;  %v4257_v30 = vsel %vm618_vm14, %v1268_v51, %v1270_v34  ;;  %v5812_v54 = vrot.slane %v4201_v46, 4  ;;  %v5975_v14 = vrot.slane %v4157_v8, 2  ;;  %v1633_v6 = vmul.f32 %v4231_v53, %v4222_v42 }
 0x30b   : > { %5959 = vst [vmem:[#allocation44_spill] sm:$0xff] %v4201_v46  ;;  %v4262_v44 = vsel %vm5897_vm0, %v1440_v38, %v5973_v7  ;;  %v4291_v38 = vstv %s3936_s18  ;;  %v4309_v22 = vstv %s3970_s24  ;;  %s4311_s18 = sld [smem:[#allocation9 + $0x46]]  ;;  %v4325_v51 = vstv %s4023_s10 }
 0x30c   : > { %5964 = vst [vmem:[#allocation48_spill] sm:$0xff] %v4228_v5  ;;  %v4274_v34 = vsel %vm618_vm14, %v1400_v40, %v5975_v14  ;;  %v4295_v40 = vmul.f32 %v3892_v62, %v3346_v61  ;;  %v1640_v61 = vrot.slane %v1633_v6, 2  ;;  %s4327_s24 = sld [smem:[#allocation9 + $0x3d]]  ;;  %v4330_v6 = vstv %s4027_s21 }
 0x30d   : > { %5965 = vst [vmem:[#allocation49_spill] sm:$0xff] %v4231_v53  ;;  %v4336_v14 = vstv %s4047_s26  ;;  %v4344_v53 = vstv %s4059_s28  ;;  %v4347_v26 = vstv %s4077_s22  ;;  %v4375_v31 = vstv %s4194_s9  ;;  %s4722_s21 = sld [smem:[#allocation9 + $0x5a]]  ;;  %s6084_s26 = smov 122  }
 0x30e   : > { %5968 = vst [vmem:[#allocation50_spill] sm:$0xff] %v4243_v48  ;;  %v4378_v8 = vstv %s4203_s11  ;;  %v4386_v9 = vmul.f32 %v4309_v22, %v4007_v25  ;;  %v5831_v23 = vstv %s4265_s20  ;;  %v4403_v52 = vstv %s4280_s6  ;;  %s4670_s6 = sld [smem:[#allocation9 + $0x4c]]  ;;  %s6167_s9 = smov 127  }
 0x30f   : > { %5969 = vst [vmem:[#allocation51_spill] sm:$0xff] %v4247_v55  ;;  %1141 = vrot.lane.b32.xlu1 %v4035_v58, %s5951_s4  ;;  %1121 = vrot.lane.b32.xlu2 %v4068_v4, %s5951_s4  ;;  %v4287_v58 = vsel %vm5897_vm0, %v5812_v54, %v1310_v57  ;;  %v4322_v54 = vstv %s4005_s30  ;;  %v4333_v4 = vstv %s4030_s25  ;;  %v1653_v49 = vmul.f32 %v4309_v22, %v4222_v42  ;;  %s4744_s10 = sld [smem:[#allocation9 + $0x53]]  ;;  %s6169_s11 = smov 126  }
 0x310   : > { %5971 = vst [vmem:[#allocation52_spill] sm:$0xff] %v4254_v28  ;;  %1048 = vrot.lane.b32.xlu0 %v4010_v33, %s5952_s13  ;;  %v4301_v33 = vadd.f32 %v3817_v59, %v3929_v13  ;;  %v4316_v59 = vstv %s3983_s23  ;;  %v4319_v13 = vstv %s3998_s29  ;;  %v4452_v50 = vmul.f32 %v4325_v51, %v4007_v25  ;;  %s4839_s22 = sld [smem:[#allocation9 + $0x61]] }
 0x311   : > { %5972 = vst [vmem:[#allocation53_spill] sm:$0xff] %v4257_v30  ;;  %v4303_v57 = vpop.permute.xlu1 %1232  ;;  %v4305_v7 = vpop.permute.xlu2 %760  ;;  %v4357_v17 = vmul.f32 %v4316_v59, %v4007_v25  ;;  %v1693_v19 = vmul.f32 %v4316_v59, %v4222_v42  ;;  %v4425_v32 = vmul.f32 %v4319_v13, %v4007_v25  ;;  %v1660_v5 = vrot.slane %v1653_v49, 3  ;;  %s2749_s28 = sld [smem:[#allocation9 + $0x30]] }
 0x312   : > { %5974 = vst [vmem:[#allocation54_spill] sm:$0xff] %v4262_v44  ;;  %v4313_v62 = vpop.permute.xlu0 %966  ;;  %v4464_v30 = vmul.f32 %v4336_v14, %v4007_v25  ;;  %v6022_v44 = vrot.slane %v4386_v9, 3  ;;  %v707_v48 = vadd.f32 %v4196_v20, %v3559_v10  ;;  %v4565_v20 = vmul.f32 %v4372_v3, %v4007_v25  ;;  %s5104_s25 = sld [smem:[#allocation9 + $0x34]] }
 0x313   : > { %5976 = vst [vmem:[#allocation55_spill] sm:$0xff] %v4274_v34  ;;  %v6016_v46 = vrot.slane %v4357_v17, 5  ;;  %v1746_v34 = vmul.f32 %v4322_v54, %v4222_v42  ;;  %s5106_s23 = sld [smem:[#allocation9 + $0x32]] }
 0x314   : > { %5977 = vst [vmem:[#allocation56_spill] sm:$0xff] %v4287_v58  ;;  %s5124_s29 = sld [smem:[#allocation9 + $0x36]] }
 0x315   : > { %5978 = vst [vmem:[#allocation57_spill] sm:$0xff] %v4291_v38  ;;  %v4419_v38 = vstv %s4311_s18  ;;  %s5131_s30 = sld [smem:[#allocation9 + $0x35]] }
 0x316   : > { %5979 = vst [vmem:[#allocation58_spill] sm:$0xff] %v4295_v40  ;;  %v4561_v10 = vmul.f32 %v4419_v38, %v4007_v25  ;;  %s2758_s18 = sld [smem:[#allocation9 + $0x39]] }
 0x317   : > { %5980 = vst [vmem:[#allocation59_spill] sm:$0xff] %v4303_v57  ;;  %v5989_v57 = vrot.slane %v4247_v55, 2  ;;  %v4360_v55 = vstv %s4119_s2  ;;  %1179 = vrot.lane.b32.xlu1 %v4073_v2, %s5951_s4  ;;  %1159 = vrot.lane.b32.xlu2 %v4082_v1, %s5951_s4  ;;  %v4400_v2 = vstv %s4249_s12  ;;  %v4408_v1 = vmul.f32 %v5831_v23, %v4007_v25  ;;  %s4499_s2 = sld [smem:[#allocation9 + $0x5b]] }
 0x318   : > { %5981 = vst [vmem:[#allocation60_spill] sm:$0xff] %v4305_v7  ;;  %1086 = vrot.lane.b32.xlu0 %v4015_v29, %s5952_s13  ;;  %v1700_v29 = vrot.slane %v1693_v19, 5  ;;  %v4429_v23 = vmul.f32 %v4403_v52, %v4007_v25  ;;  %v4439_v19 = vmul.f32 %v4322_v54, %v4007_v25  ;;  %v4488_v7 = vsel %vm635_vm15, %v6022_v44, %v1660_v5  ;;  %s4599_s12 = sld [smem:[#allocation9 + $0x44]] }
 0x319   : > { %5982 = vst [vmem:[#allocation61_spill] sm:$0xff] %v4309_v22  ;;  %v4341_v21 = vsel %vm618_vm14, %v5989_v57, %v1640_v61  ;;  %v4363_v57 = vstv %s4133_s5  ;;  %v4366_v61 = vstv %s4148_s14  ;;  %v4410_v40 = vpop.permute.xlu1 %720  ;;  %v4412_v43 = vpop.permute.xlu2 %782  ;;  %v4460_v22 = vmul.f32 %v4333_v4, %v4007_v25  ;;  %s4618_s14 = sld [smem:[#allocation9 + $0x60]] }
 0x31a   : > { %5983 = vst [vmem:[#allocation62_spill] sm:$0xff] %v4313_v62  ;;  %v4350_v62 = vstv %s4095_s0  ;;  %v4421_v58 = vpop.permute.xlu0 %1101  ;;  %v4448_v45 = vsel %vm668_vm1, %v6016_v46, %v1700_v29  ;;  %v4468_v46 = vmul.f32 %v4344_v53, %v4007_v25  ;;  %v1504_v29 = vmul.f32 %v4403_v52, %v4222_v42  ;;  %s4474_s0 = sld [smem:[#allocation9 + $0x4d]] }
 0x31b   : > { %5984 = vst [vmem:[#allocation63_spill] sm:$0xff] %v4316_v59  ;;  %v4416_v59 = vstv %s4297_s3  ;;  %v4482_v49 = vmul.f32 %v4350_v62, %v4007_v25  ;;  %s6041_s3 = smov 123   ;;  %s4656_s5 = sld [smem:[#allocation9 + $0x3e]] }
 0x31c   : > { %5985 = vst [vmem:[#allocation64_spill] sm:$0xff] %v4319_v13 }
 0x31d   : > { %5986 = vst [vmem:[#allocation65_spill] sm:$0xff] %v4322_v54  ;;  %v1753_v54 = vrot.slane %v1746_v34, 1  ;;  %v6032_v34 = vrot.slane %v4439_v19, 1 }
 0x31e   : > { %5987 = vst [vmem:[#allocation66_spill] sm:$0xff] %v4333_v4 }
 0x31f   : > { %5988 = vst [vmem:[#allocation67_spill] sm:$0xff] %v4336_v14  ;;  %1201 = vrot.lane.b32.xlu1 %v4085_v16, %s5951_s4  ;;  %1181 = vrot.lane.b32.xlu2 %v4088_v36, %s5951_s4  ;;  %v4507_v16 = vmul.f32 %v4353_v63, %v4007_v25  ;;  %v4511_v36 = vmul.f32 %v4360_v55, %v4007_v25 }
 0x320   : > { %5990 = vst [vmem:[#allocation68_spill] sm:$0xff] %v4341_v21  ;;  %v4369_v21 = vstv %s4160_s27  ;;  %1139 = vrot.lane.b32.xlu0 %v4040_v0, %s5951_s4  ;;  %v6027_v0 = vrot.slane %v4429_v23, 1  ;;  %s4639_s27 = sld [smem:[#allocation9 + $0x45]] }
 0x321   : > { %5991 = vst [vmem:[#allocation69_spill] sm:$0xff] %v4344_v53 }
 0x322   : > { %5992 = vst [vmem:[#allocation70_spill] sm:$0xff] %v4347_v26 }
 0x323   : > { %5993 = vst [vmem:[#allocation71_spill] sm:$0xff] %v4350_v62 }
 0x324   : > { %5994 = vst [vmem:[#allocation72_spill] sm:$0xff] %v4353_v63 }
 0x325   : > { %5995 = vst [vmem:[#allocation73_spill] sm:$0xff] %v4357_v17  ;;  %v4478_v17 = vmul.f32 %v4347_v26, %v4007_v25 }
 0x326   : > { %5996 = vst [vmem:[#allocation74_spill] sm:$0xff] %v4360_v55 }
 0x327   : > { %5997 = vst [vmem:[#allocation75_spill] sm:$0xff] %v4363_v57  ;;  %1254 = vrot.lane.b32.xlu1 %v4110_v39, %s6041_s3  ;;  %1219 = vrot.lane.b32.xlu2 %v4115_v12, %s5951_s4  ;;  %v1536_v39 = vmul.f32 %v4419_v38, %v4222_v42 }
 0x328   : > { %5998 = vst [vmem:[#allocation76_spill] sm:$0xff] %v4366_v61  ;;  %1161 = vrot.lane.b32.xlu0 %v4098_v41, %s5951_s4 }
 0x329   : > { %5999 = vst [vmem:[#allocation77_spill] sm:$0xff] %v4369_v21 }
 0x32a   : > { %6000 = vst [vmem:[#allocation78_spill] sm:$0xff] %v4372_v3 }
 0x32b   : > { %6001 = vst [vmem:[#allocation79_spill] sm:$0xff] %v4375_v31 }
 0x32c   : > { %6002 = vst [vmem:[#allocation80_spill] sm:$0xff] %v4378_v8 }
 0x32d   : > { %6003 = vst [vmem:[#allocation81_spill] sm:$0xff] %v4386_v9  ;;  %v4528_v9 = vpop.permute.xlu0 %1365 }
 0x32e   : > { %6004 = vst [vmem:[#allocation82_spill] sm:$0xff] %v4389_v35 }
 0x32f   : > { %6005 = vst [vmem:[#allocation83_spill] sm:$0xff] %v4403_v52  ;;  %v1511_v52 = vrot.slane %v1504_v29, 1  ;;  %v4515_v29 = vpop.permute.xlu2 %820  ;;  %1292 = vrot.lane.b32.xlu1 %v4167_v24, %s6041_s3  ;;  %1272 = vrot.lane.b32.xlu2 %v4186_v47, %s6041_s3  ;;  %v4720_v24 = vstv %s4618_s14 }
 0x330   : > { %6006 = vst [vmem:[#allocation84_spill] sm:$0xff] %v4408_v1  ;;  %v4432_v1 = vstv %s4327_s24  ;;  %1199 = vrot.lane.b32.xlu0 %v4093_v60, %s5951_s4  ;;  %v4704_v60 = vmul.f32 %v4397_v37, %v4007_v25  ;;  %s3076_s24 = smov 64  }
 0x331   : > { %6007 = vst [vmem:[#allocation85_spill] sm:$0xff] %v4412_v43  ;;  %v4456_v43 = vmul.f32 %v4330_v6, %v4007_v25  ;;  %v4521_v5 = vsel %vm601_vm13, %v6027_v0, %v1511_v52  ;;  %v4549_v0 = vmul.f32 %v4363_v57, %v4007_v25  ;;  %v4585_v52 = vmul.f32 %v4378_v8, %v4007_v25 }
 0x332   : > { %6008 = vst [vmem:[#allocation86_spill] sm:$0xff] %v4416_v59  ;;  %v1766_v8 = vmul.f32 %v4325_v51, %v4222_v42 }
 0x333   : > { %6009 = vst [vmem:[#allocation87_spill] sm:$0xff] %v4419_v38  ;;  %v6058_v47 = vrot.slane %v4456_v43, 4 }
 0x334   : > { %6010 = vst [vmem:[#allocation88_spill] sm:$0xff] %v4421_v58  ;;  %v4443_v58 = vmul.f32 %v4416_v59, %v4007_v25 }
 0x335   : > { %6011 = vst [vmem:[#allocation89_spill] sm:$0xff] %v4425_v32 }
 0x336   : > { %6012 = vst [vmem:[#allocation90_spill] sm:$0xff] %v4429_v23  ;;  %v6029_v44 = vrot.slane %v4443_v58, 2 }
 0x337   : > { %6013 = vst [vmem:[#allocation91_spill] sm:$0xff] %v4432_v1  ;;  %v4615_v23 = vpop.permute.xlu2 %873  ;;  %1332 = vrot.lane.b32.xlu1 %v4210_v11, %s6041_s3  ;;  %1294 = vrot.lane.b32.xlu2 %v4236_v15, %s6041_s3  ;;  %v1979_v15 = vmul.f32 %v4350_v62, %v4222_v42 }
 0x338   : > { %6014 = vst [vmem:[#allocation92_spill] sm:$0xff] %v4439_v19  ;;  %v4628_v19 = vpop.permute.xlu0 %1367  ;;  %1221 = vrot.lane.b32.xlu0 %v4189_v27, %s5951_s4  ;;  %v4829_v27 = vstv %s4744_s10 }
 0x339   : > { %6015 = vst [vmem:[#allocation93_spill] sm:$0xff] %v4443_v58 }
 0x33a   : > { %6017 = vst [vmem:[#allocation94_spill] sm:$0xff] %v4448_v45  ;;  %v1520_v45 = vmul.f32 %v4416_v59, %v4222_v42  ;;  %v1713_v59 = vmul.f32 %v4319_v13, %v4222_v42 }
 0x33b   : > { %6018 = vst [vmem:[#allocation95_spill] sm:$0xff] %v4456_v43 }
 0x33c   : > { %6019 = vst [vmem:[#allocation96_spill] sm:$0xff] %v4460_v22  ;;  %v1527_v56 = vrot.slane %v1520_v45, 2  ;;  %v4513_v45 = vpop.permute.xlu1 %742 }
 0x33d   : > { %6020 = vst [vmem:[#allocation97_spill] sm:$0xff] %v4464_v30 }
 0x33e   : > { %6021 = vst [vmem:[#allocation98_spill] sm:$0xff] %v4468_v46 }
 0x33f   : > { %6023 = vst [vmem:[#allocation99_spill] sm:$0xff] %v4488_v7  ;;  %v4526_v7 = vsel %vm618_vm14, %v6029_v44, %v1527_v56  ;;  %v4541_v44 = vsel %vm601_vm13, %v6032_v34, %v1753_v54  ;;  %v4553_v56 = vmul.f32 %v4366_v61, %v4007_v25  ;;  %v4557_v54 = vmul.f32 %v4369_v21, %v4007_v25 }
 0x340   : > { %6024 = vst [vmem:[#allocation100_spill] sm:$0xff] %v4507_v16  ;;  %v6038_v34 = vrot.slane %v4425_v32, 6  ;;  %v1543_v32 = vrot.slane %v1536_v39, 3 }
 0x341   : > { %6025 = vst [vmem:[#allocation101_spill] sm:$0xff] %v4511_v36 }
 0x342   : > { %6026 = vst [vmem:[#allocation102_spill] sm:$0xff] %v4515_v29  ;;  %v4577_v29 = vstv %s4474_s0  ;;  %s3077_s0 = smov 80  }
 0x343   : > { %6028 = vst [vmem:[#allocation103_spill] sm:$0xff] %v4521_v5  ;;  %v4592_v5 = vstv %s4490_s1  ;;  %v4605_v12 = vmul.f32 %v4577_v29, %v4007_v25  ;;  %s3078_s1 = smov 96  }
 0x344   : > { %6030 = vst [vmem:[#allocation104_spill] sm:$0xff] %v4526_v7  ;;  %v1720_v7 = vrot.slane %v1713_v59, 6  ;;  %v4569_v59 = vmul.f32 %v4375_v31, %v4007_v25  ;;  %v4613_v58 = vpop.permute.xlu1 %780  ;;  %v1568_v38 = vmul.f32 %v4592_v5, %v4222_v42 }
 0x345   : > { %6031 = vst [vmem:[#allocation105_spill] sm:$0xff] %v4528_v9  ;;  %v5856_v13 = vrot.slane %v4605_v12, 4 }
 0x346   : > { %6033 = vst [vmem:[#allocation106_spill] sm:$0xff] %v4541_v44  ;;  %v4574_v28 = vsel %vm685_vm2, %v6038_v34, %v1720_v7  ;;  %v4589_v44 = vmul.f32 %v4389_v35, %v4007_v25  ;;  %v4595_v7 = vstv %s4499_s2  ;;  %v1552_v34 = vmul.f32 %v4577_v29, %v4222_v42  ;;  %s3079_s2 = smov 112  }
 0x347   : > { %6034 = vst [vmem:[#allocation107_spill] sm:$0xff] %v4549_v0  ;;  %v4624_v9 = vmul.f32 %v4595_v7, %v4007_v25 }
 0x348   : > { %6035 = vst [vmem:[#allocation108_spill] sm:$0xff] %v4553_v56  ;;  %v1559_v41 = vrot.slane %v1552_v34, 4 }
 0x349   : > { %6036 = vst [vmem:[#allocation109_spill] sm:$0xff] %v4561_v10 }
 0x34a   : > { %6037 = vst [vmem:[#allocation110_spill] sm:$0xff] %v4569_v59  ;;  %v4649_v34 = vsel %vm5897_vm0, %v5856_v13, %v1559_v41  ;;  %v1773_v13 = vrot.slane %v1766_v8, 2  ;;  %v1846_v8 = vmul.f32 %v4333_v4, %v4222_v42 }
 0x34b   : > { %6039 = vst [vmem:[#allocation111_spill] sm:$0xff] %v4574_v28  ;;  %v4611_v28 = vmul.f32 %v4592_v5, %v4007_v25 }
 0x34c   : > { %6040 = vst [vmem:[#allocation112_spill] sm:$0xff] %v4577_v29  ;;  %v1584_v29 = vmul.f32 %v4595_v7, %v4222_v42 }
 0x34d   : > { %6042 = vst [vmem:[#allocation113_spill] sm:$0xff] %v4592_v5  ;;  %v1575_v5 = vrot.slane %v1568_v38, 5  ;;  %v1806_v38 = vmul.f32 %v4330_v6, %v4222_v42 }
 0x34e   : > { %6043 = vst [vmem:[#allocation114_spill] sm:$0xff] %v4595_v7  ;;  %v1591_v36 = vrot.slane %v1584_v29, 6  ;;  %v6050_v7 = vrot.slane %v4561_v10, 3  ;;  %v1786_v29 = vmul.f32 %v4344_v53, %v4222_v42 }
 0x34f   : > { %6044 = vst [vmem:[#allocation115_spill] sm:$0xff] %v4605_v12  ;;  %v1813_v12 = vrot.slane %v1806_v38, 4  ;;  %v1826_v38 = vmul.f32 %v4353_v63, %v4222_v42  ;;  %v4762_v63 = vstv %s4656_s5 }
 0x350   : > { %6045 = vst [vmem:[#allocation116_spill] sm:$0xff] %v4611_v28  ;;  %v4644_v39 = vsel %vm635_vm15, %v6050_v7, %v1543_v32  ;;  %v6054_v7 = vrot.slane %v4624_v9, 6  ;;  %v1793_v10 = vrot.slane %v1786_v29, 3 }
 0x351   : > { %6046 = vst [vmem:[#allocation117_spill] sm:$0xff] %v4613_v58  ;;  %v727_v58 = vadd.f32 %v4181_v18, %v707_v48  ;;  %v4691_v29 = vsel %vm5897_vm0, %v6058_v47, %v1813_v12  ;;  %v4708_v12 = vmul.f32 %v4400_v2, %v4007_v25  ;;  %v4712_v47 = vmul.f32 %v4432_v1, %v4007_v25 }
 0x352   : > { %6047 = vst [vmem:[#allocation118_spill] sm:$0xff] %v4615_v23  ;;  %v5859_v23 = vrot.slane %v4611_v28, 5  ;;  %v4666_v41 = vsel %vm685_vm2, %v6054_v7, %v1591_v36  ;;  %v6060_v7 = vrot.slane %v4468_v46, 3  ;;  %v1919_v18 = vmul.f32 %v4336_v14, %v4222_v42 }
 0x353   : > { %6048 = vst [vmem:[#allocation119_spill] sm:$0xff] %v4624_v9  ;;  %v4765_v46 = vstv %s4670_s6  ;;  %v6068_v14 = vrot.slane %v4460_v22, 6  ;;  %s6348_s6 = sshll.u32 %s3204_s7, 3 }
 0x354   : > { %6049 = vst [vmem:[#allocation120_spill] sm:$0xff] %v4628_v19  ;;  %v4661_v32 = vsel %vm668_vm1, %v5859_v23, %v1575_v5  ;;  %v6056_v5 = vrot.slane %v4452_v50, 2  ;;  %v4696_v23 = vsel %vm635_vm15, %v6060_v7, %v1793_v10  ;;  %v4715_v10 = vstv %s4599_s12  ;;  %v4717_v7 = vpop.permute.xlu0 %740 }
 0x355   : > { %6051 = vst [vmem:[#allocation121_spill] sm:$0xff] %v4644_v39  ;;  %v4732_v48 = vmul.f32 %v4715_v10, %v4007_v25  ;;  %v4739_v39 = vstv %s4630_s15  ;;  %s6345_s15 = sld [smem:[#allocation155_spill]] }
 0x356   : > { %6052 = vst [vmem:[#allocation122_spill] sm:$0xff] %v4649_v34  ;;  %v4682_v36 = vsel %vm618_vm14, %v6056_v5, %v1773_v13  ;;  %v4698_v13 = vpop.permute.xlu1 %802  ;;  %v4700_v5 = vpop.permute.xlu2 %895  ;;  %v4736_v34 = vmul.f32 %v4720_v24, %v4007_v25  ;;  %v4751_v9 = vmul.f32 %v4739_v39, %v4007_v25 }
 0x357   : > { %6053 = vst [vmem:[#allocation123_spill] sm:$0xff] %v4661_v32  ;;  %v1853_v32 = vrot.slane %v1846_v8, 6  ;;  %v6066_v8 = vrot.slane %v4464_v30, 3 }
 0x358   : > { %6055 = vst [vmem:[#allocation124_spill] sm:$0xff] %v4666_v41  ;;  %v1926_v41 = vrot.slane %v1919_v18, 3 }
 0x359   : > { %6057 = vst [vmem:[#allocation125_spill] sm:$0xff] %v4682_v36  ;;  %v4742_v36 = vstv %s4634_s19  ;;  %v4780_v4 = vsel %vm685_vm2, %v6068_v14, %v1853_v32  ;;  %v726_v14 = vadd.f32 %v4410_v40, %v4301_v33  ;;  %v1879_v32 = vmul.f32 %v4366_v61, %v4222_v42 }
 0x35a   : > { %6059 = vst [vmem:[#allocation126_spill] sm:$0xff] %v4691_v29  ;;  %v1833_v29 = vrot.slane %v1826_v38, 5  ;;  %v4755_v28 = vmul.f32 %v4742_v36, %v4007_v25  ;;  %v6064_v38 = vrot.slane %v4507_v16, 5  ;;  %v4775_v53 = vsel %vm635_vm15, %v6066_v8, %v1926_v41 }
 0x35b   : > { %6061 = vst [vmem:[#allocation127_spill] sm:$0xff] %v4696_v23  ;;  %v4747_v23 = vstv %s4639_s27  ;;  %v4794_v41 = vmul.f32 %v4765_v46, %v4007_v25  ;;  %v4804_v8 = vadd.f32 %v4513_v45, %v727_v58  ;;  %v1899_v58 = vmul.f32 %v4347_v26, %v4222_v42  ;;  %s6346_s19 = smov %s6345_s15 }
 0x35c   : > { %v4759_v19 = vmul.f32 %v4747_v23, %v4007_v25  ;;  %6062 = vst [vmem:[#allocation128_spill] sm:$0xff] %v4762_v63  ;;  %v4770_v18 = vsel %vm668_vm1, %v6064_v38, %v1833_v29  ;;  %v4790_v38 = vmul.f32 %v4762_v63, %v4007_v25  ;;  %v4813_v11 = vpop.permute.xlu0 %762  ;;  %v2032_v45 = vmul.f32 %v4363_v57, %v4222_v42 }
 0x35d   : > { %6063 = vst [vmem:[#allocation129_spill] sm:$0xff] %v4765_v46  ;;  %v1906_v62 = vrot.slane %v1899_v58, 2  ;;  %v4837_v26 = vmul.f32 %v4829_v27, %v4007_v25  ;;  %v1939_v40 = vmul.f32 %v4375_v31, %v4222_v42  ;;  %v1959_v33 = vmul.f32 %v4360_v55, %v4222_v42 }
 0x35e   : > { %6065 = vst [vmem:[#allocation130_spill] sm:$0xff] %v4770_v18  ;;  %v4806_v29 = vpop.permute.xlu1 %855  ;;  %v4808_v16 = vpop.permute.xlu2 %933  ;;  %v4826_v18 = vstv %s4722_s21  ;;  %v2039_v30 = vrot.slane %v2032_v45, 2  ;;  %v6078_v58 = vrot.slane %v4553_v56, 1  ;;  %v6080_v57 = vrot.slane %v4478_v17, 2  ;;  %s215_s21 = scalar_lea.vmem [#allocation12], %s6348_s6 }
 0x35f   : > { %6067 = vst [vmem:[#allocation131_spill] sm:$0xff] %v4775_v53  ;;  %v1886_v53 = vrot.slane %v1879_v32, 1  ;;  %v4833_v61 = vmul.f32 %v4826_v18, %v4007_v25  ;;  %v6082_v31 = vrot.slane %v4549_v0, 2  ;;  %v746_v55 = vadd.f32 %v4717_v7, %v726_v14  ;;  %v6088_v7 = vld [vmem:[#allocation80_spill] sm:$0xff]  ;;  %s2591_s10 = sshll.u32 %s215_s21, 4  ;;  %s2592_s10 = int_to_ptr.vmem [resolvable:$true] %s2591_s10 }
 0x360   : > { %6069 = vst [vmem:[#allocation132_spill] sm:$0xff] %v4780_v4  ;;  %v1986_v4 = vrot.slane %v1979_v15, 6  ;;  %v6076_v15 = vrot.slane %v4482_v49, 6  ;;  %v4858_v22 = vsel %vm618_vm14, %v6080_v57, %v1906_v62  ;;  %v6087_v62 = vld [vmem:[#allocation34_spill] sm:$0xff]  ;;  %v2145_v57 = vmul.f32 %v4432_v1, %v4222_v42  ;;  %v6094_v0 = vld [vmem:[#allocation60_spill] sm:$0xff] }
 0x361   : > { %6070 = vst [vmem:[#allocation133_spill] sm:$0xff] %v4790_v38  ;;  %v4853_v45 = vsel %vm601_vm13, %v6078_v58, %v1886_v53  ;;  %v4863_v43 = vsel %vm618_vm14, %v6082_v31, %v2039_v30  ;;  %v1946_v53 = vrot.slane %v1939_v40, 4  ;;  %v1966_v58 = vrot.slane %v1959_v33, 5  ;;  %1252 = vrot.lane.b32.xlu0 %v6087_v62, %s6041_s3  ;;  %v6091_v62 = vld [vmem:[#allocation101_spill] sm:$0xff] }
 0x362   : > { %6071 = vst [vmem:[#allocation134_spill] sm:$0xff] %v4794_v41  ;;  %v4848_v32 = vsel %vm685_vm2, %v6076_v15, %v1986_v4  ;;  %v6085_v4 = vld [vmem:[#allocation50_spill] sm:$0xff]  ;;  %v6086_v15 = vld [vmem:[#allocation52_spill] sm:$0xff]  ;;  %v2052_v31 = vmul.f32 %v4369_v21, %v4222_v42  ;;  %v2012_v30 = vmul.f32 %v4389_v35, %v4222_v42  ;;  %v2112_v14 = vmul.f32 %v6088_v7, %v4222_v42 }
 0x363   : > { %6072 = vst [vmem:[#allocation135_spill] sm:$0xff] %v4826_v18  ;;  %1385 = vrot.lane.b32.xlu1 %v6085_v4, %s6084_s26  ;;  %1352 = vrot.lane.b32.xlu2 %v6086_v15, %s6041_s3  ;;  %v6089_v4 = vrot.slane %v4569_v59, 4  ;;  %v2072_v1 = vmul.f32 %v4397_v37, %v4222_v42  ;;  %v2152_v21 = vrot.slane %v2145_v57, 1  ;;  %v766_v59 = vadd.f32 %v6094_v0, %v746_v55 }
 0x364   : > { %6073 = vst [vmem:[#allocation136_spill] sm:$0xff] %v4829_v27  ;;  %v801_v35 = vpop.permute.xlu0 %800  ;;  %v2059_v7 = vrot.slane %v2052_v31, 3  ;;  %v2119_v56 = vrot.slane %v2112_v14, 6  ;;  %v6099_v31 = vrot.slane %v4589_v44, 1  ;;  %v6101_v55 = vrot.slane %v4712_v47, 1 }
 0x365   : > { %6074 = vst [vmem:[#allocation137_spill] sm:$0xff] %v4833_v61  ;;  %v4889_v15 = vsel %vm5897_vm0, %v6089_v4, %v1946_v53  ;;  %v6095_v53 = vrot.slane %v4565_v20, 5  ;;  %v4927_v57 = vstv %s4839_s22 }
 0x366   : > { %6075 = vst [vmem:[#allocation138_spill] sm:$0xff] %v4837_v26  ;;  %v4882_v40 = vpop.permute.xlu1 %893  ;;  %v4884_v33 = vpop.permute.xlu2 %955  ;;  %v4919_v0 = vsel %vm601_vm13, %v6101_v55, %v2152_v21  ;;  %v2185_v21 = vmul.f32 %v4400_v2, %v4222_v42  ;;  %v6108_v55 = vld [vmem:[#allocation54_spill] sm:$0xff] }
 0x367   : > { %6077 = vst [vmem:[#allocation139_spill] sm:$0xff] %v4848_v32 }
 0x368   : > { %6079 = vst [vmem:[#allocation140_spill] sm:$0xff] %v4853_v45  ;;  %v2092_v45 = vmul.f32 %v4372_v3, %v4222_v42  ;;  %v2019_v3 = vrot.slane %v2012_v30, 1 }
 0x369   : > { %6081 = vst [vmem:[#allocation141_spill] sm:$0xff] %v4858_v22  ;;  %v6092_v22 = vrot.slane %v6091_v62, 5 }
 0x36a   : > { %6083 = vst [vmem:[#allocation142_spill] sm:$0xff] %v4863_v43  ;;  %v2099_v32 = vrot.slane %v2092_v45, 5  ;;  %v6097_v45 = vrot.slane %v4557_v54, 3  ;;  %v4914_v30 = vsel %vm601_vm13, %v6099_v31, %v2019_v3  ;;  %v2165_v3 = vmul.f32 %v4715_v10, %v4222_v42 }
 0x36b   : > { %6090 = vst [vmem:[#allocation50_spill] sm:$0xff] %v4889_v15  ;;  %v4894_v43 = vsel %vm668_vm1, %v6092_v22, %v1966_v58  ;;  %v2079_v15 = vrot.slane %v2072_v1, 4  ;;  %v2205_v22 = vmul.f32 %v4739_v39, %v4222_v42  ;;  %v6103_v1 = vrot.slane %v4585_v52, 6  ;;  %1445 = vrot.lane.b32.xlu1 %v6108_v55, %s6084_s26 }
 0x36c   : > { %6093 = vst [vmem:[#allocation52_spill] sm:$0xff] %v4894_v43  ;;  %v4902_v4 = vsel %vm668_vm1, %v6095_v53, %v2099_v32  ;;  %v4909_v58 = vsel %vm635_vm15, %v6097_v45, %v2059_v7  ;;  %v6106_v7 = vrot.slane %v4704_v60, 4  ;;  %v2225_v45 = vmul.f32 %v4742_v36, %v4222_v42 }
 0x36d   : > { %6096 = vst [vmem:[#allocation34_spill] sm:$0xff] %v4902_v4  ;;  %v4924_v32 = vsel %vm685_vm2, %v6103_v1, %v2119_v56  ;;  %v2212_v53 = vrot.slane %v2205_v22, 4  ;;  %v2245_v56 = vmul.f32 %v4720_v24, %v4222_v42  ;;  %v2318_v31 = vmul.f32 %v4765_v46, %v4222_v42  ;;  %v6128_v46 = vld [vmem:[#allocation46_spill] sm:$0xff] }
 0x36e   : > { %6098 = vst [vmem:[#allocation101_spill] sm:$0xff] %v4909_v58  ;;  %v4932_v14 = vsel %vm5897_vm0, %v6106_v7, %v2079_v15  ;;  %v6109_v15 = vld [vmem:[#allocation55_spill] sm:$0xff]  ;;  %v4950_v22 = vmul.f32 %v4927_v57, %v4007_v25  ;;  %v6111_v1 = vrot.slane %v4751_v9, 4  ;;  %v2192_v55 = vrot.slane %v2185_v21, 3  ;;  %v4961_v58 = vpop.permute.xlu1 %915  ;;  %v4963_v25 = vpop.permute.xlu2 %986 }
 0x36f   : > { %6100 = vst [vmem:[#allocation60_spill] sm:$0xff] %v4914_v30  ;;  %1405 = vrot.lane.b32.xlu2 %v6109_v15, %s6084_s26  ;;  %v2278_v30 = vmul.f32 %v4762_v63, %v4222_v42  ;;  %v2252_v43 = vrot.slane %v2245_v56, 6  ;;  %v2325_v15 = vrot.slane %v2318_v31, 3  ;;  %v6114_v4 = vrot.slane %v4732_v48, 2  ;;  %v823_v21 = vpop.permute.xlu0 %822 }
 0x370   : > { %6102 = vst [vmem:[#allocation143_spill] sm:$0xff] %v4919_v0  ;;  %v4955_v7 = vsel %vm5897_vm0, %v6111_v1, %v2212_v53  ;;  %v2232_v0 = vrot.slane %v2225_v45, 5  ;;  %v2298_v1 = vmul.f32 %v4747_v23, %v4222_v42  ;;  %v6116_v45 = vrot.slane %v4708_v12, 3 }
 0x371   : > { %6104 = vst [vmem:[#allocation144_spill] sm:$0xff] %v4924_v32  ;;  %v6113_v32 = vld [vmem:[#allocation53_spill] sm:$0xff]  ;;  %v6118_v31 = vrot.slane %v4755_v28, 5  ;;  %v6129_v63 = vrot.slane %v6128_v46, 5  ;;  %v6132_v46 = vrot.slane %v4759_v19, 2 }
 0x372   : > { %6105 = vst [vmem:[#allocation145_spill] sm:$0xff] %v4927_v57  ;;  %1274 = vrot.lane.b32.xlu0 %v6113_v32, %s6041_s3  ;;  %v2378_v32 = vmul.f32 %v4927_v57, %v4222_v42  ;;  %v4977_v56 = vsel %vm635_vm15, %v6116_v45, %v2192_v55  ;;  %v5889_v57 = vrot.slane %v4950_v22, 6  ;;  %v6124_v55 = vrot.slane %v4790_v38, 1  ;;  %v6161_v38 = vld [vmem:[#allocation42_spill] sm:$0xff] }
 0x373   : > { %6107 = vst [vmem:[#allocation146_spill] sm:$0xff] %v4932_v14  ;;  %v2172_v14 = vrot.slane %v2165_v3, 2  ;;  %v2285_v3 = vrot.slane %v2278_v30, 1 }
 0x374   : > { %6110 = vst [vmem:[#allocation54_spill] sm:$0xff] %v4950_v22 }
 0x375   : > { %6112 = vst [vmem:[#allocation55_spill] sm:$0xff] %v4955_v7  ;;  %v4968_v53 = vsel %vm618_vm14, %v6114_v4, %v2172_v14  ;;  %v4982_v7 = vsel %vm668_vm1, %v6118_v31, %v2232_v0  ;;  %v6120_v4 = vrot.slane %v4736_v34, 6  ;;  %v6122_v14 = vrot.slane %v4794_v41, 3  ;;  %v6126_v31 = vld [vmem:[#allocation48_spill] sm:$0xff] }
 0x376   : > { %6115 = vst [vmem:[#allocation53_spill] sm:$0xff] %v4968_v53  ;;  %v4998_v45 = vsel %vm601_vm13, %v6124_v55, %v2285_v3  ;;  %v2385_v0 = vrot.slane %v2378_v32, 6  ;;  %v2358_v3 = vmul.f32 %v4826_v18, %v4222_v42  ;;  %v6131_v32 = vld [vmem:[#allocation117_spill] sm:$0xff] }
 0x377   : > { %6117 = vst [vmem:[#allocation147_spill] sm:$0xff] %v4977_v56  ;;  %v4987_v30 = vsel %vm685_vm2, %v6120_v4, %v2252_v43  ;;  %v4992_v53 = vsel %vm635_vm15, %v6122_v14, %v2325_v15  ;;  %v2305_v56 = vrot.slane %v2298_v1, 2  ;;  %v5005_v4 = vld [vmem:[#allocation2 + $0x10] sm:$0x3f]  ;;  %v2338_v14 = vmul.f32 %v4829_v27, %v4222_v42 }
 0x378   : > { %6119 = vst [vmem:[#allocation148_spill] sm:$0xff] %v4982_v7  ;;  %v6127_v7 = vrot.slane %v6126_v31, 5  ;;  %v767_v1 = vadd.f32 %v4813_v11, %v4804_v8  ;;  %v786_v55 = vadd.f32 %v6131_v32, %v766_v59  ;;  %v6135_v11 = vld [vmem:[#allocation44_spill] sm:$0xff]  ;;  %v6137_v59 = vld [vmem:[#allocation45_spill] sm:$0xff] }
 0x379   : > { %6121 = vst [vmem:[#allocation149_spill] sm:$0xff] %v4987_v30  ;;  %v6130_v30 = vld [vmem:[#allocation26_spill] sm:$0xff]  ;;  %v2345_v42 = vrot.slane %v2338_v14, 4  ;;  %v6136_v8 = vrot.slane %v6135_v11, 4  ;;  %v6138_v32 = vrot.slane %v6137_v59, 4  ;;  %v954_v11 = vpop.permute.xlu1 %953 }
 0x37a   : > { %6123 = vst [vmem:[#allocation150_spill] sm:$0xff] %v4992_v53  ;;  %v1462_v43 = vsel %vm668_vm1, %v6129_v63, %v6127_v7  ;;  %v1323_v15 = vmul.f32 %v5005_v4, %v6130_v30  ;;  %v5019_v63 = vsel %vm618_vm14, %v6132_v46, %v2305_v56  ;;  %v5024_v7 = vsel %vm685_vm2, %v5889_v57, %v2385_v0  ;;  %v6139_v56 = vld [vmem:[#allocation56_spill] sm:$0xff]  ;;  %v6140_v0 = vld [vmem:[#allocation57_spill] sm:$0xff]  ;;  %v6141_v46 = vld [vmem:[#allocation47_spill] sm:$0xff] }
 0x37b   : > { %6125 = vst [vmem:[#allocation151_spill] sm:$0xff] %v4998_v45  ;;  %v5891_v30 = vrot.slane %v4833_v61, 5  ;;  %v5890_v45 = vrot.slane %v4837_v26, 4  ;;  %v2365_v53 = vrot.slane %v2358_v3, 5  ;;  %v806_v41 = vadd.f32 %v801_v35, %v786_v55  ;;  %1314 = vrot.lane.b32.xlu1 %v6139_v56, %s6041_s3  ;;  %1465 = vrot.lane.b32.xlu2 %v1462_v43, %s6084_s26  ;;  %v6144_v3 = vld [vmem:[#allocation85_spill] sm:$0xff]  ;;  %v5052_v43 = vpop.permute.xlu2 %1008 }
 0x37c   : > { %6133 = vst [vmem:[#allocation48_spill] sm:$0xff] %v5019_v63  ;;  %v1309_v27 = vsel %vm5897_vm0, %v6138_v32, %v6136_v8  ;;  %v5038_v57 = vmul.f32 %v6141_v46, %v6140_v0  ;;  %v787_v55 = vadd.f32 %v6144_v3, %v767_v1  ;;  %v6145_v8 = vld [vmem:[#allocation41_spill] sm:$0xff]  ;;  %v854_v32 = vpop.permute.xlu0 %853  ;;  %v1330_v63 = vrot.slane %v1323_v15, 5  ;;  %v6152_v15 = vld [vmem:[#allocation39_spill] sm:$0xff] }
 0x37d   : > { %6134 = vst [vmem:[#allocation46_spill] sm:$0xff] %v5024_v7  ;;  %1312 = vrot.lane.b32.xlu0 %v1309_v27, %s6041_s3  ;;  %v5044_v35 = vsel %vm5897_vm0, %v5890_v45, %v2345_v42  ;;  %v5049_v14 = vsel %vm668_vm1, %v5891_v30, %v2365_v53  ;;  %v1414_v59 = vmul.f32 %v6145_v8, %v6140_v0  ;;  %v6146_v27 = vld [vmem:[#allocation58_spill] sm:$0xff]  ;;  %v6148_v3 = vld [vmem:[#allocation37_spill] sm:$0xff] }
 0x37e   : > { %6142 = vst [vmem:[#allocation26_spill] sm:$0xff] %v5044_v35  ;;  %v1350_v56 = vrot.slane %v6146_v27, 6  ;;  %v6147_v7 = vld [vmem:[#allocation102_spill] sm:$0xff]  ;;  %v1421_v45 = vrot.slane %v5038_v57, 3  ;;  %v1473_v35 = vstv %s2749_s28  ;;  %v807_v53 = vadd.f32 %v4698_v13, %v787_v55  ;;  %v6150_v26 = vld [vmem:[#allocation33_spill] sm:$0xff]  ;;  %v6154_v13 = vld [vmem:[#allocation31_spill] sm:$0xff] }
 0x37f   : > { %6143 = vst [vmem:[#allocation117_spill] sm:$0xff] %v5049_v14  ;;  %v826_v42 = vadd.f32 %v6147_v7, %v806_v41  ;;  %v1420_v30 = vrot.slane %v1414_v59, 3  ;;  %v5061_v1 = vmul.f32 %v6141_v46, %v1473_v35  ;;  %v6149_v14 = vrot.slane %v6148_v3, 6  ;;  %v6153_v7 = vld [vmem:[#allocation27_spill] sm:$0xff] }
 0x380   : > { %v6151_v61 = vrot.slane %v6150_v26, 5  ;;  %v1396_v41 = vmul.f32 %v5005_v4, %v6152_v15  ;;  %v1376_v57 = vmul.f32 %v5005_v4, %v6153_v7  ;;  %v827_v18 = vadd.f32 %v823_v21, %v807_v53  ;;  %v6155_v21 = vld [vmem:[#allocation28_spill] sm:$0xff] }
 0x381   : > { %v1351_v22 = vsel %vm685_vm2, %v6149_v14, %v1350_v56  ;;  %v839_v55 = vadd.f32 %v6154_v13, %v826_v42  ;;  %v1422_v46 = vsel %vm635_vm15, %v1420_v30, %v1421_v45  ;;  %v1007_v14 = vpop.permute.xlu1 %1006  ;;  %v1481_v42 = vrot.slane %v5061_v1, 6  ;;  %v6156_v30 = vld [vmem:[#allocation118_spill] sm:$0xff]  ;;  %v6157_v7 = vld [vmem:[#allocation40_spill] sm:$0xff] }
 0x382   : > { %v1331_v27 = vsel %vm668_vm1, %v6151_v61, %v1330_v63  ;;  %v1474_v63 = vmul.f32 %v6145_v8, %v1473_v35  ;;  %v1403_v56 = vrot.slane %v1396_v41, 2  ;;  %v1383_v3 = vrot.slane %v1376_v57, 1  ;;  %v6162_v41 = vld [vmem:[#allocation36_spill] sm:$0xff] }
 0x383   : > { %1354 = vrot.lane.b32.xlu1 %v1351_v22, %s6041_s3  ;;  %1334 = vrot.lane.b32.xlu2 %v1331_v27, %s6041_s3  ;;  %v859_v26 = vadd.f32 %v854_v32, %v839_v55  ;;  %v5078_v61 = vpop.permute.xlu2 %1046  ;;  %v840_v53 = vadd.f32 %v6155_v21, %v827_v18  ;;  %v6158_v27 = vrot.slane %v6157_v7, 2  ;;  %v6159_v32 = vld [vmem:[#allocation35_spill] sm:$0xff]  ;;  %v1456_v8 = vmul.f32 %v5005_v4, %v6161_v38 }
 0x384   : > { %v876_v59 = vpop.permute.xlu0 %875  ;;  %v1480_v22 = vrot.slane %v1474_v63, 6  ;;  %v6160_v55 = vrot.slane %v6159_v32, 1  ;;  %v1436_v57 = vmul.f32 %v5005_v4, %v6162_v41 }
 0x385   : > { %1425 = vrot.lane.b32.xlu0 %v1422_v46, %s6084_s26  ;;  %v879_v15 = vadd.f32 %v6156_v30, %v859_v26  ;;  %v1404_v13 = vsel %vm618_vm14, %v6158_v27, %v1403_v56  ;;  %v860_v18 = vadd.f32 %v4806_v29, %v840_v53  ;;  %v1416_v26 = vmul.f32 %v5005_v4, %v6140_v0 }
 0x386   : > { %v1384_v46 = vsel %vm601_vm13, %v6160_v55, %v1383_v3  ;;  %v1482_v1 = vsel %vm685_vm2, %v1480_v22, %v1481_v42  ;;  %v1463_v21 = vrot.slane %v1456_v8, 5  ;;  %v1443_v53 = vrot.slane %v1436_v57, 4  ;;  %v6166_v8 = vld [vmem:[#allocation62_spill] sm:$0xff] }
 0x387   : > { %v880_v63 = vadd.f32 %v876_v59, %v860_v18  ;;  %v899_v56 = vadd.f32 %v4882_v40, %v879_v15  ;;  %v1423_v22 = vrot.slane %v1416_v26, 3  ;;  %v6163_v59 = vrot.slane %v6126_v31, 5  ;;  %v6164_v15 = vld [vmem:[#allocation38_spill] sm:$0xff] }
 0x388   : > { %v6165_v27 = vrot.slane %v6164_v15, 4  ;;  %v1863_v57 = vstv %s5104_s25  ;;  %v1597_v18 = vstv %s5106_s23 }
 0x389   : > { %v1029_v38 = vpop.permute.xlu1 %1028  ;;  %v900_v7 = vadd.f32 %v4700_v5, %v880_v63  ;;  %v1464_v40 = vsel %vm668_vm1, %v6163_v59, %v1463_v21  ;;  %v1424_v55 = vsel %vm635_vm15, %v1421_v45, %v1423_v22  ;;  %v1476_v5 = vmul.f32 %v5005_v4, %v1473_v35  ;;  %v6168_v21 = vld [vmem:[#allocation43_spill] sm:$0xff] }
 0x38a   : > { %v1730_v59 = vstv %s5133_s8 }
 0x38b   : > { %1407 = vrot.lane.b32.xlu1 %v1404_v13, %s6084_s26  ;;  %1387 = vrot.lane.b32.xlu2 %v1384_v46, %s6084_s26  ;;  %v5102_v3 = vpop.permute.xlu2 %1068  ;;  %v1444_v13 = vsel %vm5897_vm0, %v6165_v27, %v1443_v53  ;;  %v1483_v4 = vrot.slane %v1476_v5, 6 }
 0x38c   : > { %v914_v29 = vpop.permute.xlu0 %913 }
 0x38d   : > { %1485 = vrot.lane.b32.xlu0 %v1482_v1, %s6084_s26  ;;  %v919_v30 = vadd.f32 %v914_v29, %v899_v56  ;;  %v1484_v29 = vsel %vm685_vm2, %v1481_v42, %v1483_v4 }
 0x38f   : > { %v939_v0 = vadd.f32 %v4808_v16, %v919_v30  ;;  %v920_v16 = vadd.f32 %v4961_v58, %v900_v7  ;;  %v1996_v7 = vstv %s5131_s30 }
 0x391   : > { %v959_v32 = vadd.f32 %v954_v11, %v939_v0  ;;  %v1067_v31 = vpop.permute.xlu1 %1066  ;;  %v5127_v11 = vld [vmem:[#allocation2 + $0x18] sm:$0xff] }
 0x392   : > { %v1864_v26 = vmul.f32 %v1863_v57, %v5127_v11  ;;  %v1598_v63 = vmul.f32 %v1597_v18, %v5127_v11  ;;  %v1731_v15 = vmul.f32 %v1730_v59, %v5127_v11 }
 0x393   : > { %1467 = vrot.lane.b32.xlu1 %v1464_v40, %s6084_s26  ;;  %1447 = vrot.lane.b32.xlu2 %v1444_v13, %s6084_s26  ;;  %v5122_v46 = vpop.permute.xlu2 %1121  ;;  %v972_v41 = vadd.f32 %v6166_v8, %v959_v32  ;;  %v1997_v40 = vmul.f32 %v1996_v7, %v5127_v11 }
 0x394   : > { %v936_v45 = vpop.permute.xlu0 %935 }
 0x395   : > { %1427 = vrot.lane.b32.xlu0 %v1424_v55, %s6084_s26  ;;  %v940_v1 = vadd.f32 %v936_v45, %v920_v16  ;;  %v992_v58 = vadd.f32 %v4963_v25, %v972_v41  ;;  %v5159_v16 = vld [vmem:[#allocation2 + $0x20] sm:$0xff] }
 0x396   : > { %v1865_v8 = vmul.f32 %v5159_v16, %v1863_v57  ;;  %v1732_v41 = vmul.f32 %v5159_v16, %v1730_v59  ;;  %v1599_v45 = vmul.f32 %v5159_v16, %v1597_v18  ;;  %v1998_v18 = vmul.f32 %v5159_v16, %v1996_v7  ;;  %v6175_v7 = vld [vmem:[#allocation63_spill] sm:$0xff] }
 0x397   : > { %v960_v35 = vadd.f32 %v4884_v33, %v940_v1  ;;  %v1012_v56 = vadd.f32 %v1007_v14, %v992_v58  ;;  %v2129_v33 = vstv %s5124_s29  ;;  %v6170_v1 = vld [vmem:[#allocation49_spill] sm:$0xff]  ;;  %v1691_v59 = vmul.f32 %v6175_v7, %v5127_v11  ;;  %s2998_s29 = scalar_lea.hbm %s6346_s19, 16 }
 0x398   : > { %v2130_v42 = vmul.f32 %v2129_v33, %v5127_v11  ;;  %v1631_v4 = vmul.f32 %v6170_v1, %v5127_v11  ;;  %v6178_v1 = vld [vmem:[#allocation81_spill] sm:$0xff] }
 0x399   : > { %v973_v53 = vadd.f32 %v6168_v21, %v960_v35  ;;  %v1089_v30 = vpop.permute.xlu1 %1088 }
 0x39b   : > { %1868 = vrot.lane.b32.xlu1 %v1864_v26, %s5952_s13  ;;  %1602 = vrot.lane.b32.xlu2 %v1598_v63, %s6167_s9  ;;  %v5144_v25 = vpop.permute.xlu2 %1159  ;;  %v1637_v26 = vrot.slane %v1631_v4, 2  ;;  %v6179_v4 = vrot.slane %v6178_v1, 3 }
 0x39c   : > { %v989_v22 = vpop.permute.xlu0 %988 }
 0x39d   : > { %1487 = vrot.lane.b32.xlu0 %v1484_v29, %s6084_s26  ;;  %v993_v0 = vadd.f32 %v989_v22, %v973_v53 }
 0x39f   : > { %v1013_v14 = vadd.f32 %v5052_v43, %v993_v0  ;;  %v6174_v0 = vld [vmem:[#allocation61_spill] sm:$0xff] }
 0x3a1   : > { %v1033_v27 = vadd.f32 %v1029_v38, %v1013_v14  ;;  %v1120_v13 = vpop.permute.xlu1 %1119  ;;  %v6176_v14 = vld [vmem:[#allocation88_spill] sm:$0xff] }
 0x3a3   : > { %2134 = vrot.lane.b32.xlu1 %v2130_v42, %s6041_s3  ;;  %2001 = vrot.lane.b32.xlu2 %v1997_v40, %s5951_s4  ;;  %v5156_v32 = vpop.permute.xlu2 %1181 }
 0x3a4   : > { %v1027_v55 = vpop.permute.xlu0 %1026 }
 0x3a5   : > { %1735 = vrot.lane.b32.xlu0 %v1731_v15, %s6169_s11  ;;  %v1032_v5 = vadd.f32 %v1027_v55, %v1012_v56  ;;  %v6171_v56 = vld [vmem:[#allocation51_spill] sm:$0xff] }
 0x3a6   : > { %v6172_v29 = vrot.slane %v6171_v56, 2  ;;  %v5198_v56 = vstv %s2758_s18 }
 0x3a7   : > { %v1052_v43 = vadd.f32 %v5078_v61, %v1032_v5 }
 0x3a8   : > { %v1639_v21 = vsel %vm618_vm14, %v1637_v26, %v6172_v29 }
 0x3a9   : > { %v1072_v38 = vadd.f32 %v1067_v31, %v1052_v43  ;;  %v1142_v61 = vpop.permute.xlu1 %1141  ;;  %v6173_v31 = vstv %s3945_s17  ;;  %v1697_v43 = vrot.slane %v1691_v59, 5  ;;  %s2779_s17 = sld [smem:[#allocation9 + $0x4e]] }
 0x3aa   : > { %v2263_v53 = vmul.f32 %v6173_v31, %v5127_v11 }
 0x3ab   : > { %1870 = vrot.lane.b32.xlu1 %v1865_v8, %s5952_s13  ;;  %1737 = vrot.lane.b32.xlu2 %v1732_v41, %s6169_s11  ;;  %v5169_v58 = vpop.permute.xlu2 %1219  ;;  %v6177_v41 = vld [vmem:[#allocation29_spill] sm:$0xff] }
 0x3ac   : > { %v1049_v35 = vpop.permute.xlu0 %1048 }
 0x3ad   : > { %1604 = vrot.lane.b32.xlu0 %v1599_v45, %s6167_s9  ;;  %v1053_v57 = vadd.f32 %v1049_v35, %v1033_v27 }
 0x3af   : > { %v1073_v63 = vadd.f32 %v5102_v3, %v1053_v57  ;;  %v1651_v3 = vmul.f32 %v6174_v0, %v5127_v11  ;;  %v6180_v57 = vld [vmem:[#allocation73_spill] sm:$0xff] }
 0x3b0   : > { %v6181_v26 = vrot.slane %v6180_v57, 5  ;;  %v1804_v57 = vmul.f32 %v4330_v6, %v5127_v11  ;;  %v6189_v6 = vld [vmem:[#allocation95_spill] sm:$0xff] }
 0x3b1   : > { %v1093_v22 = vadd.f32 %v1089_v30, %v1073_v63  ;;  %v1180_v40 = vpop.permute.xlu1 %1179  ;;  %v1657_v5 = vrot.slane %v1651_v3, 3 }
 0x3b2   : > { %v1699_v63 = vsel %vm668_vm1, %v1697_v43, %v6181_v26 }
 0x3b3   : > { %2003 = vrot.lane.b32.xlu2 %v1998_v18, %s5951_s4  ;;  %1642 = vrot.lane.b32.xlu1 %v1639_v21, %s6167_s9  ;;  %v1106_v42 = vadd.f32 %v6176_v14, %v1093_v22  ;;  %v5187_v15 = vpop.permute.xlu2 %1272  ;;  %v1659_v35 = vsel %vm635_vm15, %v1657_v5, %v6179_v4  ;;  %v2131_v18 = vmul.f32 %v5159_v16, %v2129_v33  ;;  %v6183_v21 = vld [vmem:[#allocation65_spill] sm:$0xff]  ;;  %v6186_v5 = vld [vmem:[#allocation92_spill] sm:$0xff] }
 0x3b4   : > { %v1087_v27 = vpop.permute.xlu0 %1086  ;;  %v1744_v33 = vmul.f32 %v6183_v21, %v5127_v11  ;;  %v1611_v22 = vmul.f32 %v5198_v56, %v5127_v11  ;;  %v6187_v43 = vrot.slane %v6186_v5, 1 }
 0x3b5   : > { %2267 = vrot.lane.b32.xlu0 %v2263_v53, %s6084_s26  ;;  %v1126_v30 = vadd.f32 %v5122_v46, %v1106_v42  ;;  %v1092_v55 = vadd.f32 %v1087_v27, %v1072_v38  ;;  %v5204_v38 = vmul.f32 %v5159_v16, %v5198_v56  ;;  %v6184_v27 = vld [vmem:[#allocation89_spill] sm:$0xff] }
 0x3b6   : > { %v1750_v59 = vrot.slane %v1744_v33, 1  ;;  %v1617_v42 = vrot.slane %v1611_v22, 1 }
 0x3b7   : > { %v1146_v8 = vadd.f32 %v1142_v61, %v1126_v30  ;;  %v1105_v45 = vadd.f32 %v6177_v41, %v1092_v55  ;;  %v6182_v61 = vld [vmem:[#allocation64_spill] sm:$0xff]  ;;  %v1618_v3 = vrot.slane %v5204_v38, 1  ;;  %v6185_v30 = vrot.slane %v6184_v27, 6 }
 0x3b8   : > { %v1711_v29 = vmul.f32 %v6182_v61, %v5127_v11  ;;  %v1752_v41 = vsel %vm601_vm13, %v1750_v59, %v6187_v43  ;;  %v6192_v59 = vld [vmem:[#allocation67_spill] sm:$0xff] }
 0x3b9   : > { %v1125_v46 = vadd.f32 %v1120_v13, %v1105_v45  ;;  %v1202_v31 = vpop.permute.xlu1 %1201  ;;  %v5223_v45 = vstv %s2779_s17  ;;  %v1619_v1 = vsel %vm601_vm13, %v1617_v42, %v1618_v3 }
 0x3ba   : > { %v1717_v7 = vrot.slane %v1711_v29, 6 }
 0x3bb   : > { %1662 = vrot.lane.b32.xlu2 %v1659_v35, %s6167_s9  ;;  %1702 = vrot.lane.b32.xlu1 %v1699_v63, %s6167_s9  ;;  %v5211_v53 = vpop.permute.xlu2 %1294  ;;  %v1764_v35 = vmul.f32 %v4325_v51, %v5127_v11  ;;  %v6188_v51 = vrot.slane %v4452_v50, 2 }
 0x3bc   : > { %v1140_v0 = vpop.permute.xlu0 %1139  ;;  %v1719_v55 = vsel %vm685_vm2, %v1717_v7, %v6185_v30  ;;  %v6193_v30 = vld [vmem:[#allocation69_spill] sm:$0xff] }
 0x3bd   : > { %2136 = vrot.lane.b32.xlu0 %v2131_v18, %s6041_s3  ;;  %v1145_v13 = vadd.f32 %v1140_v0, %v1125_v46  ;;  %v1671_v18 = vmul.f32 %v5223_v45, %v5127_v11  ;;  %v1770_v29 = vrot.slane %v1764_v35, 2  ;;  %v6190_v0 = vrot.slane %v6189_v6, 4 }
 0x3bf   : > { %v1165_v14 = vadd.f32 %v5144_v25, %v1145_v13  ;;  %v5232_v25 = vmul.f32 %v5159_v16, %v5223_v45  ;;  %v1677_v33 = vrot.slane %v1671_v18, 4  ;;  %v1772_v22 = vsel %vm618_vm14, %v1770_v29, %v6188_v51 }
 0x3c1   : > { %v1185_v4 = vadd.f32 %v1180_v40, %v1165_v14  ;;  %v1255_v26 = vpop.permute.xlu1 %1254  ;;  %v1678_v16 = vrot.slane %v5232_v25, 4  ;;  %v1810_v40 = vrot.slane %v1804_v57, 4  ;;  %v1917_v14 = vmul.f32 %v6192_v59, %v5127_v11  ;;  %v6194_v57 = vld [vmem:[#allocation96_spill] sm:$0xff] }
 0x3c2   : > { %v6195_v18 = vrot.slane %v6194_v57, 6  ;;  %v2203_v25 = vmul.f32 %v4739_v39, %v5127_v11  ;;  %v6254_v39 = vrot.slane %v4751_v9, 4  ;;  %v6258_v9 = vld [vmem:[#allocation104_spill] sm:$0xff] }
 0x3c3   : > { %1722 = vrot.lane.b32.xlu2 %v1719_v55, %s6167_s9  ;;  %1755 = vrot.lane.b32.xlu1 %v1752_v41, %s6169_s11  ;;  %v5239_v63 = vpop.permute.xlu2 %1352  ;;  %v1812_v13 = vsel %vm5897_vm0, %v1810_v40, %v6190_v0  ;;  %v1784_v55 = vmul.f32 %v6193_v30, %v5127_v11 }
 0x3c4   : > { %v1162_v46 = vpop.permute.xlu0 %1161 }
 0x3c5   : > { %1622 = vrot.lane.b32.xlu0 %v1619_v1, %s6167_s9  ;;  %v1166_v61 = vadd.f32 %v1162_v46, %v1146_v8  ;;  %v1679_v8 = vsel %vm5897_vm0, %v1677_v33, %v1678_v16  ;;  %v1923_v1 = vrot.slane %v1917_v14, 3  ;;  %v1790_v35 = vrot.slane %v1784_v55, 3  ;;  %v6203_v55 = vld [vmem:[#allocation32_spill] sm:$0xff] }
 0x3c7   : > { %v1186_v21 = vadd.f32 %v5156_v32, %v1166_v61  ;;  %v6191_v32 = vld [vmem:[#allocation66_spill] sm:$0xff]  ;;  %v6196_v61 = vld [vmem:[#allocation97_spill] sm:$0xff] }
 0x3c8   : > { %v1844_v50 = vmul.f32 %v6191_v32, %v5127_v11  ;;  %v6197_v29 = vrot.slane %v6196_v61, 3 }
 0x3c9   : > { %v1206_v7 = vadd.f32 %v1202_v31, %v1186_v21  ;;  %v1293_v42 = vpop.permute.xlu1 %1292  ;;  %v6198_v21 = vld [vmem:[#allocation98_spill] sm:$0xff] }
 0x3ca   : > { %v1850_v41 = vrot.slane %v1844_v50, 6  ;;  %v1925_v40 = vsel %vm635_vm15, %v1923_v1, %v6197_v29  ;;  %v6199_v33 = vrot.slane %v6198_v21, 3  ;;  %v6208_v29 = vld [vmem:[#allocation74_spill] sm:$0xff] }
 0x3cb   : > { %1775 = vrot.lane.b32.xlu2 %v1772_v22, %s6169_s11  ;;  %1815 = vrot.lane.b32.xlu1 %v1812_v13, %s6169_s11  ;;  %v5261_v27 = vpop.permute.xlu2 %1405  ;;  %v6201_v22 = vld [vmem:[#allocation71_spill] sm:$0xff] }
 0x3cc   : > { %v1200_v5 = vpop.permute.xlu0 %1199  ;;  %v1852_v46 = vsel %vm685_vm2, %v1850_v41, %v6195_v18  ;;  %v1977_v6 = vmul.f32 %v6201_v22, %v5127_v11  ;;  %v6204_v41 = vrot.slane %v4478_v17, 2  ;;  %v6206_v18 = vld [vmem:[#allocation100_spill] sm:$0xff]  ;;  %v1957_v17 = vmul.f32 %v6208_v29, %v5127_v11  ;;  %v6219_v29 = vld [vmem:[#allocation79_spill] sm:$0xff] }
 0x3cd   : > { %1682 = vrot.lane.b32.xlu0 %v1679_v8, %s6167_s9  ;;  %v1205_v43 = vadd.f32 %v1200_v5, %v1185_v4  ;;  %v1792_v4 = vsel %vm635_vm15, %v1790_v35, %v6199_v33  ;;  %v6202_v8 = vld [vmem:[#allocation72_spill] sm:$0xff]  ;;  %v6205_v35 = vrot.slane %v4482_v49, 6  ;;  %v6210_v49 = vld [vmem:[#allocation59_spill] sm:$0xff] }
 0x3ce   : > { %v1824_v32 = vmul.f32 %v6202_v8, %v5127_v11  ;;  %v1983_v30 = vrot.slane %v1977_v6, 6 }
 0x3cf   : > { %v1225_v31 = vadd.f32 %v5169_v58, %v1205_v43  ;;  %v6200_v58 = vld [vmem:[#allocation70_spill] sm:$0xff] }
 0x3d0   : > { %v1897_v51 = vmul.f32 %v6200_v58, %v5127_v11  ;;  %v1830_v43 = vrot.slane %v1824_v32, 5  ;;  %v1985_v57 = vsel %vm685_vm2, %v1983_v30, %v6205_v35  ;;  %v1963_v32 = vrot.slane %v1957_v17, 5 }
 0x3d1   : > { %v1333_v0 = vpop.permute.xlu1 %1332  ;;  %v1238_v33 = vadd.f32 %v6210_v49, %v1225_v31  ;;  %v1937_v17 = vmul.f32 %v6219_v29, %v5127_v11 }
 0x3d2   : > { %v1903_v14 = vrot.slane %v1897_v51, 2  ;;  %v6211_v51 = vld [vmem:[#allocation76_spill] sm:$0xff] }
 0x3d3   : > { %1855 = vrot.lane.b32.xlu2 %v1852_v46, %s6169_s11  ;;  %1928 = vrot.lane.b32.xlu1 %v1925_v40, %s5952_s13  ;;  %v6207_v46 = vrot.slane %v6206_v18, 5  ;;  %v6209_v40 = vld [vmem:[#allocation75_spill] sm:$0xff]  ;;  %v1877_v22 = vmul.f32 %v6211_v51, %v5127_v11  ;;  %v1943_v51 = vrot.slane %v1937_v17, 4 }
 0x3d4   : > { %v1222_v50 = vpop.permute.xlu0 %1221  ;;  %v1905_v1 = vsel %vm618_vm14, %v1903_v14, %v6204_v41  ;;  %v2030_v21 = vmul.f32 %v6209_v40, %v5127_v11  ;;  %v6212_v14 = vrot.slane %v6091_v62, 5 }
 0x3d5   : > { %1795 = vrot.lane.b32.xlu0 %v1792_v4, %s6169_s11  ;;  %v5282_v13 = vpop.permute.xlu2 %1465  ;;  %v1226_v59 = vadd.f32 %v1222_v50, %v1206_v7  ;;  %v1832_v7 = vsel %vm668_vm1, %v1830_v43, %v6207_v46  ;;  %v6215_v43 = vld [vmem:[#allocation108_spill] sm:$0xff] }
 0x3d6   : > { %v2036_v50 = vrot.slane %v2030_v21, 2  ;;  %v1965_v30 = vsel %vm668_vm1, %v1963_v32, %v6212_v14  ;;  %v6216_v41 = vrot.slane %v6215_v43, 1 }
 0x3d7   : > { %v1239_v5 = vadd.f32 %v6203_v55, %v1226_v59  ;;  %v1883_v59 = vrot.slane %v1877_v22, 1  ;;  %v6213_v55 = vld [vmem:[#allocation107_spill] sm:$0xff]  ;;  %v6220_v22 = vrot.slane %v4557_v54, 3 }
 0x3d9   : > { %v1259_v61 = vadd.f32 %v1255_v26, %v1239_v5  ;;  %v1386_v4 = vpop.permute.xlu1 %1385  ;;  %v6214_v5 = vrot.slane %v6213_v55, 2 }
 0x3db   : > { %1908 = vrot.lane.b32.xlu2 %v1905_v1, %s5952_s13  ;;  %1988 = vrot.lane.b32.xlu1 %v1985_v57, %s5952_s13  ;;  %v2038_v31 = vsel %vm618_vm14, %v2036_v50, %v6214_v5  ;;  %v1885_v1 = vsel %vm601_vm13, %v1883_v59, %v6216_v41  ;;  %v6218_v57 = vld [vmem:[#allocation78_spill] sm:$0xff] }
 0x3dc   : > { %v1253_v6 = vpop.permute.xlu0 %1252  ;;  %v2090_v18 = vmul.f32 %v6218_v57, %v5127_v11  ;;  %v6222_v50 = vld [vmem:[#allocation110_spill] sm:$0xff] }
 0x3dd   : > { %1835 = vrot.lane.b32.xlu0 %v1832_v7, %s6169_s11  ;;  %v1335_v58 = vpop.permute.xlu2 %1334  ;;  %v1258_v8 = vadd.f32 %v1253_v6, %v1238_v33 }
 0x3de   : > { %v2096_v33 = vrot.slane %v2090_v18, 5  ;;  %v2917_v18 = vld [vmem:[#allocation2 + $0x28] sm:$0x3f] }
 0x3df   : > { %v1278_v26 = vadd.f32 %v5187_v15, %v1258_v8  ;;  %v6217_v15 = vld [vmem:[#allocation77_spill] sm:$0xff]  ;;  %v6221_v8 = vrot.slane %v4565_v20, 5  ;;  %v6225_v20 = vld [vmem:[#allocation82_spill] sm:$0xff]  ;;  %v1613_v29 = vmul.f32 %v2917_v18, %v5198_v56 }
 0x3e0   : > { %v2050_v62 = vmul.f32 %v6217_v15, %v5127_v11 }
 0x3e1   : > { %v1298_v35 = vadd.f32 %v1293_v42, %v1278_v26  ;;  %v1446_v46 = vpop.permute.xlu1 %1445  ;;  %v2098_v32 = vsel %vm668_vm1, %v2096_v33, %v6221_v8  ;;  %v6223_v26 = vrot.slane %v6222_v50, 4 }
 0x3e2   : > { %v2056_v49 = vrot.slane %v2050_v62, 3  ;;  %v6226_v62 = vrot.slane %v4585_v52, 6  ;;  %v2183_v52 = vmul.f32 %v4400_v2, %v5127_v11  ;;  %v6231_v2 = vrot.slane %v4708_v12, 3 }
 0x3e3   : > { %1968 = vrot.lane.b32.xlu2 %v1965_v30, %s5952_s13  ;;  %2041 = vrot.lane.b32.xlu1 %v2038_v31, %s5951_s4  ;;  %v2010_v30 = vmul.f32 %v6225_v20, %v5127_v11  ;;  %v2163_v12 = vmul.f32 %v4715_v10, %v5127_v11  ;;  %v6234_v20 = vld [vmem:[#allocation83_spill] sm:$0xff]  ;;  %v6236_v10 = vstv %s4265_s20  ;;  %s3075_s20 = smov 48  }
 0x3e4   : > { %v1275_v40 = vpop.permute.xlu0 %1274  ;;  %v2058_v6 = vsel %vm635_vm15, %v2056_v49, %v6220_v22  ;;  %v6230_v22 = vld [vmem:[#allocation120_spill] sm:$0xff]  ;;  %v2189_v8 = vrot.slane %v2183_v52, 3 }
 0x3e5   : > { %1888 = vrot.lane.b32.xlu0 %v1885_v1, %s5952_s13  ;;  %v1388_v7 = vpop.permute.xlu2 %1387  ;;  %v1279_v21 = vadd.f32 %v1275_v40, %v1259_v61  ;;  %v1945_v61 = vsel %vm5897_vm0, %v1943_v51, %v6223_v26  ;;  %v2016_v15 = vrot.slane %v2010_v30, 1  ;;  %v6227_v40 = vrot.slane %v4589_v44, 1 }
 0x3e6   : > { %v1620_v51 = vrot.slane %v1613_v29, 1  ;;  %v2191_v26 = vsel %vm635_vm15, %v2189_v8, %v6231_v2  ;;  %v1502_v30 = vmul.f32 %v6234_v20, %v5127_v11  ;;  %v6245_v2 = vld [vmem:[#allocation109_spill] sm:$0xff] }
 0x3e7   : > { %v1299_v42 = vadd.f32 %v5211_v53, %v1279_v21  ;;  %v6224_v53 = vld [vmem:[#allocation80_spill] sm:$0xff]  ;;  %v2018_v21 = vsel %vm601_vm13, %v2016_v15, %v6227_v40 }
 0x3e8   : > { %v2110_v59 = vmul.f32 %v6224_v53, %v5127_v11 }
 0x3ea   : > { %v2116_v43 = vrot.slane %v2110_v59, 6  ;;  %v6232_v59 = vrot.slane %v4704_v60, 4 }
 0x3eb   : > { %2061 = vrot.lane.b32.xlu2 %v2058_v6, %s5951_s4  ;;  %2101 = vrot.lane.b32.xlu1 %v2098_v32, %s5951_s4 }
 0x3ec   : > { %v2118_v57 = vsel %vm685_vm2, %v2116_v43, %v6226_v62  ;;  %v1508_v62 = vrot.slane %v1502_v30, 1 }
 0x3ed   : > { %1948 = vrot.lane.b32.xlu0 %v1945_v61, %s5952_s13  ;;  %v1315_v54 = vpop.permute.xlu1 %1314  ;;  %v5340_v14 = vpop.permute.xlu2 %1447  ;;  %v1621_v61 = vsel %vm601_vm13, %v1618_v3, %v1620_v51  ;;  %v6233_v3 = vld [vmem:[#allocation91_spill] sm:$0xff] }
 0x3ee   : > { %v1319_v5 = vadd.f32 %v1315_v54, %v1299_v42 }
 0x3ef   : > { %v1313_v55 = vpop.permute.xlu0 %1312 }
 0x3f0   : > { %v1318_v31 = vadd.f32 %v1313_v55, %v1298_v35  ;;  %v1339_v41 = vadd.f32 %v1335_v58, %v1319_v5  ;;  %v6228_v35 = vld [vmem:[#allocation68_spill] sm:$0xff] }
 0x3f2   : > { %v1338_v1 = vadd.f32 %v1333_v0, %v1318_v31  ;;  %v6229_v0 = vld [vmem:[#allocation105_spill] sm:$0xff]  ;;  %v6235_v31 = vld [vmem:[#allocation86_spill] sm:$0xff] }
 0x3f3   : > { %2121 = vrot.lane.b32.xlu2 %v2118_v57, %s5951_s4  ;;  %1644 = vrot.lane.b32.xlu1 %v6228_v35, %s6167_s9  ;;  %v1518_v43 = vmul.f32 %v6235_v31, %v5127_v11  ;;  %v6237_v57 = vld [vmem:[#allocation87_spill] sm:$0xff]  ;;  %v6239_v35 = vrot.slane %v4712_v47, 1  ;;  %v2209_v31 = vrot.slane %v2203_v25, 4 }
 0x3f4   : > { %v1358_v17 = vadd.f32 %v5239_v63, %v1338_v1  ;;  %v2070_v63 = vmul.f32 %v4397_v37, %v5127_v11  ;;  %v1534_v29 = vmul.f32 %v6237_v57, %v5127_v11 }
 0x3f5   : > { %2021 = vrot.lane.b32.xlu0 %v2018_v21, %s5951_s4  ;;  %v1355_v49 = vpop.permute.xlu1 %1354  ;;  %v5359_v56 = vpop.permute.xlu2 %1602  ;;  %v1673_v21 = vmul.f32 %v2917_v18, %v5223_v45 }
 0x3f6   : > { %v1371_v58 = vadd.f32 %v6229_v0, %v1358_v17  ;;  %v1359_v44 = vadd.f32 %v1355_v49, %v1339_v41  ;;  %v2076_v50 = vrot.slane %v2070_v63, 4  ;;  %v2169_v41 = vrot.slane %v2163_v12, 2  ;;  %v6240_v0 = vld [vmem:[#allocation94_spill] sm:$0xff] }
 0x3f7   : > { %v1426_v33 = vpop.permute.xlu0 %1425  ;;  %v6238_v17 = vrot.slane %v4732_v48, 2  ;;  %v2243_v48 = vmul.f32 %v4720_v24, %v5127_v11  ;;  %v1680_v8 = vrot.slane %v1673_v21, 4 }
 0x3f8   : > { %v1391_v42 = vadd.f32 %v1386_v4, %v1371_v58  ;;  %v1372_v6 = vadd.f32 %v6230_v22, %v1359_v44  ;;  %v2078_v4 = vsel %vm5897_vm0, %v2076_v50, %v6232_v59  ;;  %v6241_v58 = vld [vmem:[#allocation90_spill] sm:$0xff]  ;;  %v6243_v44 = vld [vmem:[#allocation93_spill] sm:$0xff]  ;;  %v1540_v22 = vrot.slane %v1534_v29, 3 }
 0x3f9   : > { %v2171_v40 = vsel %vm618_vm14, %v2169_v41, %v6238_v17  ;;  %v6242_v49 = vrot.slane %v6241_v58, 1  ;;  %v6244_v51 = vrot.slane %v6243_v44, 2  ;;  %v6247_v59 = vrot.slane %v4736_v34, 6  ;;  %v6256_v29 = vld [vmem:[#allocation114_spill] sm:$0xff]  ;;  %v6259_v58 = vld [vmem:[#allocation115_spill] sm:$0xff] }
 0x3fa   : > { %v1411_v32 = vadd.f32 %v5261_v27, %v1391_v42  ;;  %v1392_v53 = vadd.f32 %v1388_v7, %v1372_v6  ;;  %v2143_v7 = vmul.f32 %v6233_v3, %v5127_v11  ;;  %v1681_v12 = vsel %vm5897_vm0, %v1678_v16, %v1680_v8 }
 0x3fb   : > { %2194 = vrot.lane.b32.xlu1 %v2191_v26, %s6041_s3  ;;  %1624 = vrot.lane.b32.xlu2 %v1621_v61, %s6167_s9  ;;  %v1510_v63 = vsel %vm601_vm13, %v1508_v62, %v6242_v49  ;;  %v6246_v26 = vrot.slane %v6245_v2, 3  ;;  %v2223_v3 = vmul.f32 %v4742_v36, %v5127_v11  ;;  %v6252_v36 = vrot.slane %v4755_v28, 5  ;;  %v6255_v62 = vld [vmem:[#allocation106_spill] sm:$0xff]  ;;  %v6265_v2 = vld [vmem:[#allocation119_spill] sm:$0xff] }
 0x3fc   : > { %v1431_v37 = vadd.f32 %v1426_v33, %v1411_v32  ;;  %v2149_v15 = vrot.slane %v2143_v7, 1  ;;  %v1524_v33 = vrot.slane %v1518_v43, 2  ;;  %v6251_v43 = vld [vmem:[#allocation113_spill] sm:$0xff]  ;;  %v1582_v17 = vmul.f32 %v6256_v29, %v5127_v11 }
 0x3fd   : > { %2081 = vrot.lane.b32.xlu0 %v2078_v4, %s5951_s4  ;;  %v1408_v38 = vpop.permute.xlu1 %1407  ;;  %v5379_v54 = vpop.permute.xlu2 %2001  ;;  %v1542_v61 = vsel %vm635_vm15, %v1540_v22, %v6246_v26  ;;  %v2229_v30 = vrot.slane %v2223_v3, 5  ;;  %v1566_v41 = vmul.f32 %v6251_v43, %v5127_v11  ;;  %v2296_v28 = vmul.f32 %v4747_v23, %v5127_v11  ;;  %v6262_v23 = vld [vmem:[#allocation116_spill] sm:$0xff]  ;;  %v6271_v3 = vld [vmem:[#allocation111_spill] sm:$0xff] }
 0x3fe   : > { %v1451_v27 = vadd.f32 %v1446_v46, %v1431_v37  ;;  %v1412_v55 = vadd.f32 %v1408_v38, %v1392_v53  ;;  %v1497_v46 = vmul.f32 %v6236_v10, %v5127_v11  ;;  %v2151_v52 = vsel %vm601_vm13, %v2149_v15, %v6239_v35  ;;  %v6248_v38 = vld [vmem:[#allocation99_spill] sm:$0xff] }
 0x3ff   : > { %v1486_v60 = vpop.permute.xlu0 %1485  ;;  %v1526_v42 = vsel %vm618_vm14, %v1524_v33, %v6244_v51  ;;  %v2249_v53 = vrot.slane %v2243_v48, 6  ;;  %v6253_v10 = vld [vmem:[#allocation103_spill] sm:$0xff]  ;;  %v2211_v15 = vsel %vm5897_vm0, %v2209_v31, %v6254_v39  ;;  %v6260_v49 = vrot.slane %v6259_v58, 4  ;;  %v6275_v31 = vld [vmem:[#allocation125_spill] sm:$0xff] }
 0x400   : > { %v1471_v5 = vadd.f32 %v5282_v13, %v1451_v27  ;;  %v1588_v44 = vrot.slane %v1582_v17, 6  ;;  %v6263_v51 = vrot.slane %v6262_v23, 5  ;;  %v2302_v22 = vrot.slane %v2296_v28, 2  ;;  %v6276_v43 = vld [vmem:[#allocation135_spill] sm:$0xff]  ;;  %v6279_v17 = vld [vmem:[#allocation137_spill] sm:$0xff]  ;;  %v6287_v23 = vld [vmem:[#allocation130_spill] sm:$0xff] }
 0x401   : > { %v2251_v4 = vsel %vm685_vm2, %v2249_v53, %v6247_v59  ;;  %v6266_v26 = vrot.slane %v6265_v2, 6  ;;  %v6267_v53 = vrot.slane %v4759_v19, 2  ;;  %v6272_v19 = vld [vmem:[#allocation124_spill] sm:$0xff]  ;;  %v6280_v28 = vrot.slane %v6279_v17, 5 }
 0x402   : > { %v1491_v1 = vadd.f32 %v1486_v60, %v1471_v5  ;;  %v6249_v60 = vld [vmem:[#allocation112_spill] sm:$0xff] }
 0x403   : > { %1704 = vrot.lane.b32.xlu1 %v6240_v0, %s6167_s9  ;;  %2174 = vrot.lane.b32.xlu2 %v2171_v40, %s6041_s3  ;;  %v1550_v20 = vmul.f32 %v6249_v60, %v5127_v11  ;;  %v6257_v40 = vld [vmem:[#allocation128_spill] sm:$0xff]  ;;  %v1572_v0 = vrot.slane %v1566_v41, 5 }
 0x404   : > { %v1499_v13 = vadd.f32 %v1497_v46, %v1491_v1  ;;  %v2231_v1 = vsel %vm668_vm1, %v2229_v30, %v6252_v36  ;;  %v2276_v21 = vmul.f32 %v6257_v40, %v5127_v11  ;;  %v6277_v41 = vld [vmem:[#allocation136_spill] sm:$0xff] }
 0x405   : > { %2154 = vrot.lane.b32.xlu0 %v2151_v52, %s6041_s3  ;;  %v1468_v18 = vpop.permute.xlu1 %1467  ;;  %v5409_v47 = vpop.permute.xlu2 %1737  ;;  %v1556_v57 = vrot.slane %v1550_v20, 4  ;;  %v2336_v36 = vmul.f32 %v6277_v41, %v5127_v11  ;;  %v6298_v41 = vld [vmem:[#allocation52_spill] sm:$0xff] }
 0x406   : > { %v1515_v45 = vadd.f32 %v1510_v63, %v1499_v13  ;;  %v6301_v17 = vld [vmem:[#allocation60_spill] sm:$0xff] }
 0x407   : > { %v1428_v6 = vpop.permute.xlu0 %1427  ;;  %v1558_v63 = vsel %vm5897_vm0, %v1556_v57, %v6260_v49  ;;  %v2342_v57 = vrot.slane %v2336_v36, 4 }
 0x408   : > { %v1531_v32 = vadd.f32 %v1526_v42, %v1515_v45  ;;  %v1432_v50 = vadd.f32 %v1428_v6, %v1412_v55  ;;  %v6250_v55 = vld [vmem:[#allocation84_spill] sm:$0xff]  ;;  %v6261_v45 = vld [vmem:[#allocation121_spill] sm:$0xff]  ;;  %v1574_v42 = vsel %vm668_vm1, %v1572_v0, %v6263_v51  ;;  %v2282_v6 = vrot.slane %v2276_v21, 1  ;;  %v6281_v21 = vld [vmem:[#allocation138_spill] sm:$0xff] }
 0x409   : > { %v6283_v0 = vld [vmem:[#allocation134_spill] sm:$0xff] }
 0x40a   : > { %v1547_v37 = vadd.f32 %v1542_v61, %v1531_v32  ;;  %v1452_v24 = vadd.f32 %v5340_v14, %v1432_v50  ;;  %v6264_v32 = vld [vmem:[#allocation122_spill] sm:$0xff]  ;;  %v1590_v61 = vsel %vm685_vm2, %v1588_v44, %v6266_v26  ;;  %v6284_v58 = vrot.slane %v6283_v0, 3  ;;  %v6286_v44 = vld [vmem:[#allocation132_spill] sm:$0xff]  ;;  %v6302_v0 = vld [vmem:[#allocation55_spill] sm:$0xff] }
 0x40b   : > { %2254 = vrot.lane.b32.xlu1 %v2251_v4, %s6041_s3  ;;  %1684 = vrot.lane.b32.xlu2 %v1681_v12, %s6167_s9  ;;  %v6289_v26 = vld [vmem:[#allocation54_spill] sm:$0xff] }
 0x40c   : > { %v1472_v27 = vadd.f32 %v1468_v18, %v1452_v24  ;;  %v1563_v48 = vadd.f32 %v1558_v63, %v1547_v37  ;;  %v2304_v37 = vsel %vm618_vm14, %v2302_v22, %v6267_v53  ;;  %v6268_v24 = vld [vmem:[#allocation133_spill] sm:$0xff] }
 0x40d   : > { %1664 = vrot.lane.b32.xlu0 %v6248_v38, %s6167_s9  ;;  %v5430_v14 = vpop.permute.xlu1 %1868  ;;  %v5432_v34 = vpop.permute.xlu2 %2003  ;;  %v6269_v59 = vrot.slane %v6268_v24, 1  ;;  %v6292_v24 = vld [vmem:[#allocation140_spill] sm:$0xff] }
 0x40e   : > { %v1579_v8 = vadd.f32 %v1574_v42, %v1563_v48  ;;  %v6288_v42 = vld [vmem:[#allocation145_spill] sm:$0xff] }
 0x40f   : > { %v1488_v7 = vpop.permute.xlu0 %1487  ;;  %v2284_v4 = vsel %vm601_vm13, %v2282_v6, %v6269_v59  ;;  %v2376_v22 = vmul.f32 %v6288_v42, %v5127_v11  ;;  %v6306_v42 = vld [vmem:[#allocation148_spill] sm:$0xff] }
 0x410   : > { %v1492_v16 = vadd.f32 %v1488_v7, %v1472_v27  ;;  %v1595_v12 = vadd.f32 %v1590_v61, %v1579_v8  ;;  %v6270_v27 = vld [vmem:[#allocation123_spill] sm:$0xff]  ;;  %v6290_v61 = vrot.slane %v6289_v26, 6 }
 0x411   : > { %v2382_v2 = vrot.slane %v2376_v22, 6 }
 0x412   : > { %v1500_v5 = vadd.f32 %v6250_v55, %v1492_v16  ;;  %v1608_v25 = vadd.f32 %v5359_v56, %v1595_v12  ;;  %v6273_v55 = vld [vmem:[#allocation126_spill] sm:$0xff]  ;;  %v2356_v56 = vmul.f32 %v6276_v43, %v5127_v11 }
 0x413   : > { %1757 = vrot.lane.b32.xlu1 %v6255_v62, %s6169_s11  ;;  %2234 = vrot.lane.b32.xlu2 %v2231_v1, %s6041_s3  ;;  %v2384_v53 = vsel %vm685_vm2, %v2382_v2, %v6290_v61  ;;  %v6308_v61 = vld [vmem:[#allocation150_spill] sm:$0xff] }
 0x414   : > { %v1516_v46 = vadd.f32 %v6253_v10, %v1500_v5  ;;  %v6274_v5 = vld [vmem:[#allocation127_spill] sm:$0xff]  ;;  %v2362_v62 = vrot.slane %v2356_v56, 5  ;;  %v6296_v56 = vld [vmem:[#allocation34_spill] sm:$0xff] }
 0x415   : > { %2214 = vrot.lane.b32.xlu0 %v2211_v15, %s6041_s3  ;;  %v5459_v35 = vpop.permute.xlu1 %2134  ;;  %v1663_v52 = vpop.permute.xlu2 %1662 }
 0x416   : > { %v1532_v13 = vadd.f32 %v6258_v9, %v1516_v46  ;;  %v6278_v46 = vld [vmem:[#allocation129_spill] sm:$0xff]  ;;  %v2364_v40 = vsel %vm668_vm1, %v2362_v62, %v6280_v28  ;;  %v6282_v9 = vrot.slane %v6281_v21, 4 }
 0x417   : > { %v5464_v33 = vpop.permute.xlu0 %1735  ;;  %v2316_v39 = vmul.f32 %v6278_v46, %v5127_v11 }
 0x418   : > { %v1548_v18 = vadd.f32 %v6261_v45, %v1532_v13  ;;  %v2344_v13 = vsel %vm5897_vm0, %v2342_v57, %v6282_v9 }
 0x419   : > { %v2322_v29 = vrot.slane %v2316_v39, 3 }
 0x41a   : > { %v1564_v50 = vadd.f32 %v6264_v32, %v1548_v18  ;;  %v6285_v18 = vld [vmem:[#allocation131_spill] sm:$0xff] }
 0x41b   : > { %2307 = vrot.lane.b32.xlu1 %v2304_v37, %s6084_s26  ;;  %2287 = vrot.lane.b32.xlu2 %v2284_v4, %s6084_s26  ;;  %v2324_v49 = vsel %vm635_vm15, %v2322_v29, %v6284_v58  ;;  %v6291_v37 = vld [vmem:[#allocation139_spill] sm:$0xff]  ;;  %v6303_v58 = vld [vmem:[#allocation53_spill] sm:$0xff] }
 0x41c   : > { %v1580_v38 = vadd.f32 %v6270_v27, %v1564_v50 }
 0x41d   : > { %1724 = vrot.lane.b32.xlu0 %v6271_v3, %s6167_s9  ;;  %v5486_v7 = vpop.permute.xlu1 %1870  ;;  %v1723_v60 = vpop.permute.xlu2 %1722 }
 0x41e   : > { %v1596_v16 = vadd.f32 %v6272_v19, %v1580_v38  ;;  %v6294_v19 = vld [vmem:[#allocation50_spill] sm:$0xff] }
 0x41f   : > { %v1605_v20 = vpop.permute.xlu0 %1604 }
 0x420   : > { %v5489_v30 = vadd.f32 %v1605_v20, %v1596_v16  ;;  %v6295_v16 = vld [vmem:[#allocation141_spill] sm:$0xff] }
 0x423   : > { %1817 = vrot.lane.b32.xlu1 %v6273_v55, %s6169_s11  ;;  %1797 = vrot.lane.b32.xlu2 %v6274_v5, %s6169_s11 }
 0x425   : > { %1777 = vrot.lane.b32.xlu0 %v6275_v31, %s6169_s11  ;;  %v1643_v1 = vpop.permute.xlu1 %1642  ;;  %v1776_v10 = vpop.permute.xlu2 %1775 }
 0x427   : > { %v5503_v15 = vpop.permute.xlu0 %2267 }
 0x42b   : > { %2367 = vrot.lane.b32.xlu1 %v2364_v40, %s6084_s26  ;;  %2347 = vrot.lane.b32.xlu2 %v2344_v13, %s6084_s26 }
 0x42d   : > { %2327 = vrot.lane.b32.xlu0 %v2324_v49, %s6084_s26  ;;  %v1703_v63 = vpop.permute.xlu1 %1702  ;;  %v1856_v45 = vpop.permute.xlu2 %1855  ;;  %v6304_v49 = vld [vmem:[#allocation146_spill] sm:$0xff] }
 0x42f   : > { %v5517_v48 = vpop.permute.xlu0 %2136 }
 0x433   : > { %1930 = vrot.lane.b32.xlu1 %v6285_v18, %s5952_s13  ;;  %1857 = vrot.lane.b32.xlu2 %v6286_v44, %s6169_s11 }
 0x435   : > { %1837 = vrot.lane.b32.xlu0 %v6287_v23, %s6169_s11  ;;  %v1756_v51 = vpop.permute.xlu1 %1755  ;;  %v1909_v50 = vpop.permute.xlu2 %1908 }
 0x437   : > { %v1623_v6 = vpop.permute.xlu0 %1622 }
 0x438   : > { %v1628_v8 = vadd.f32 %v1623_v6, %v1608_v25  ;;  %v6293_v25 = vld [vmem:[#allocation142_spill] sm:$0xff]  ;;  %v6307_v6 = vld [vmem:[#allocation147_spill] sm:$0xff] }
 0x43a   : > { %v1648_v32 = vadd.f32 %v1643_v1, %v1628_v8 }
 0x43b   : > { %1990 = vrot.lane.b32.xlu1 %v6291_v37, %s5952_s13  ;;  %1890 = vrot.lane.b32.xlu2 %v6292_v24, %s5952_s13  ;;  %v6310_v37 = vld [vmem:[#allocation149_spill] sm:$0xff] }
 0x43c   : > { %v1668_v4 = vadd.f32 %v1663_v52, %v1648_v32 }
 0x43d   : > { %2387 = vrot.lane.b32.xlu0 %v2384_v53, %s6084_s26  ;;  %v1816_v59 = vpop.permute.xlu1 %1815  ;;  %v1969_v3 = vpop.permute.xlu2 %1968  ;;  %v6309_v53 = vld [vmem:[#allocation151_spill] sm:$0xff] }
 0x43f   : > { %v1683_v11 = vpop.permute.xlu0 %1682 }
 0x440   : > { %v1688_v12 = vadd.f32 %v1683_v11, %v1668_v4 }
 0x442   : > { %v1708_v27 = vadd.f32 %v1703_v63, %v1688_v12  ;;  %v6311_v12 = vld [vmem:[#allocation46_spill] sm:$0xff] }
 0x443   : > { %2043 = vrot.lane.b32.xlu1 %v6293_v25, %s5951_s4  ;;  %1950 = vrot.lane.b32.xlu2 %v6294_v19, %s5952_s13 }
 0x444   : > { %v1728_v38 = vadd.f32 %v1723_v60, %v1708_v27  ;;  %v6297_v60 = vld [vmem:[#allocation101_spill] sm:$0xff]  ;;  %v6313_v27 = vld [vmem:[#allocation48_spill] sm:$0xff] }
 0x445   : > { %1910 = vrot.lane.b32.xlu0 %v6295_v16, %s5952_s13  ;;  %v1929_v20 = vpop.permute.xlu1 %1928  ;;  %v2062_v36 = vpop.permute.xlu2 %2061 }
 0x446   : > { %v1741_v55 = vadd.f32 %v5464_v33, %v1728_v38  ;;  %v6299_v33 = vld [vmem:[#allocation143_spill] sm:$0xff] }
 0x447   : > { %v1796_v5 = vpop.permute.xlu0 %1795 }
 0x448   : > { %v1761_v31 = vadd.f32 %v1756_v51, %v1741_v55  ;;  %v6305_v51 = vld [vmem:[#allocation30_spill] sm:$0xff] }
 0x44a   : > { %v1781_v52 = vadd.f32 %v1776_v10, %v1761_v31  ;;  %v6300_v10 = vld [vmem:[#allocation144_spill] sm:$0xff] }
 0x44b   : > { %2103 = vrot.lane.b32.xlu1 %v6296_v56, %s5951_s4  ;;  %2063 = vrot.lane.b32.xlu2 %v6297_v60, %s5951_s4 }
 0x44c   : > { %v1801_v43 = vadd.f32 %v1796_v5, %v1781_v52 }
 0x44d   : > { %1970 = vrot.lane.b32.xlu0 %v6298_v41, %s5952_s13  ;;  %v1989_v1 = vpop.permute.xlu1 %1988  ;;  %v2122_v21 = vpop.permute.xlu2 %2121  ;;  %s3073_s13 = smov 16  }
 0x44e   : > { %v1821_v46 = vadd.f32 %v1816_v59, %v1801_v43 }
 0x44f   : > { %v1836_v39 = vpop.permute.xlu0 %1835 }
 0x450   : > { %v1841_v62 = vadd.f32 %v1836_v39, %v1821_v46 }
 0x452   : > { %v1861_v57 = vadd.f32 %v1856_v45, %v1841_v62 }
 0x453   : > { %2156 = vrot.lane.b32.xlu1 %v6299_v33, %s6041_s3  ;;  %2123 = vrot.lane.b32.xlu2 %v6300_v10, %s5951_s4 }
 0x454   : > { %v1874_v29 = vadd.f32 %v5430_v14, %v1861_v57 }
 0x455   : > { %2023 = vrot.lane.b32.xlu0 %v6301_v17, %s5951_s4  ;;  %v2042_v28 = vpop.permute.xlu1 %2041  ;;  %v1625_v44 = vpop.permute.xlu2 %1624 }
 0x456   : > { %v1629_v10 = vadd.f32 %v1625_v44, %v5489_v30 }
 0x457   : > { %v1889_v40 = vpop.permute.xlu0 %1888 }
 0x458   : > { %v1894_v9 = vadd.f32 %v1889_v40, %v1874_v29 }
 0x45a   : > { %v1914_v13 = vadd.f32 %v1909_v50, %v1894_v9 }
 0x45b   : > { %2216 = vrot.lane.b32.xlu1 %v6302_v0, %s6041_s3  ;;  %2176 = vrot.lane.b32.xlu2 %v6303_v58, %s6041_s3 }
 0x45c   : > { %v1934_v45 = vadd.f32 %v1929_v20, %v1914_v13  ;;  %v6314_v20 = vld [vmem:[#allocation117_spill] sm:$0xff] }
 0x45d   : > { %2083 = vrot.lane.b32.xlu0 %v6304_v49, %s5951_s4  ;;  %v2102_v63 = vpop.permute.xlu1 %2101  ;;  %v2175_v2 = vpop.permute.xlu2 %2174  ;;  %s3074_s4 = smov 32  }
 0x45f   : > { %v1949_v14 = vpop.permute.xlu0 %1948 }
 0x460   : > { %v1954_v18 = vadd.f32 %v1949_v14, %v1934_v45 }
 0x462   : > { %v1974_v23 = vadd.f32 %v1969_v3, %v1954_v18 }
 0x463   : > { %2269 = vrot.lane.b32.xlu1 %v6305_v51, %s6084_s26  ;;  %2236 = vrot.lane.b32.xlu2 %v6306_v42, %s6041_s3 }
 0x464   : > { %v1994_v22 = vadd.f32 %v1989_v1, %v1974_v23 }
 0x465   : > { %2196 = vrot.lane.b32.xlu0 %v6307_v6, %s6041_s3  ;;  %v1645_v32 = vpop.permute.xlu1 %1644  ;;  %v1685_v38 = vpop.permute.xlu2 %1684 }
 0x466   : > { %v2007_v50 = vadd.f32 %v5379_v54, %v1994_v22  ;;  %v6312_v54 = vld [vmem:[#allocation26_spill] sm:$0xff] }
 0x467   : > { %v2022_v8 = vpop.permute.xlu0 %2021 }
 0x468   : > { %v2027_v26 = vadd.f32 %v2022_v8, %v2007_v50 }
 0x46a   : > { %v2047_v59 = vadd.f32 %v2042_v28, %v2027_v26  ;;  %v1649_v28 = vadd.f32 %v1645_v32, %v1629_v10 }
 0x46b   : > { %2329 = vrot.lane.b32.xlu1 %v6308_v61, %s6084_s26  ;;  %2289 = vrot.lane.b32.xlu2 %v6309_v53, %s6084_s26 }
 0x46c   : > { %v2067_v11 = vadd.f32 %v2062_v36, %v2047_v59 }
 0x46d   : > { %2256 = vrot.lane.b32.xlu0 %v6310_v37, %s6041_s3  ;;  %v2195_v4 = vpop.permute.xlu1 %2194  ;;  %v2235_v31 = vpop.permute.xlu2 %2234  ;;  %s2807_s3 = sshll.u32 %s3121_s16, 3  ;;  %s2578_s16 = scalar_lea.sflag [#allocation7], %s3204_s7 }
 0x46e   : > { %s2589_s27 = scalar_lea.hbm %s6345_s15, %s2807_s3 }
 0x46f   : > { %v2082_v24 = vpop.permute.xlu0 %2081  ;;  %s2593_s22 = sshll.u32 %s2589_s27, 4  ;;  %s2594_s22 = int_to_ptr.hbm [resolvable:$true] %s2593_s22 }
 0x470   : > { %v2087_v3 = vadd.f32 %v2082_v24, %v2067_v11 }
 0x472   : > { %v2107_v19 = vadd.f32 %v2102_v63, %v2087_v3 }
 0x473   : > { %2389 = vrot.lane.b32.xlu1 %v6311_v12, %s6084_s26  ;;  %2349 = vrot.lane.b32.xlu2 %v6312_v54, %s6084_s26 }
 0x474   : > { %v2127_v55 = vadd.f32 %v2122_v21, %v2107_v19 }
 0x475   : > { %2309 = vrot.lane.b32.xlu0 %v6313_v27, %s6084_s26  ;;  %v1705_v16 = vpop.permute.xlu1 %1704  ;;  %v2288_v36 = vpop.permute.xlu2 %2287 }
 0x476   : > { %v2140_v52 = vadd.f32 %v5459_v35, %v2127_v55 }
 0x477   : > { %v2155_v25 = vpop.permute.xlu0 %2154 }
 0x478   : > { %v2160_v56 = vadd.f32 %v2155_v25, %v2140_v52 }
 0x47a   : > { %v2180_v41 = vadd.f32 %v2175_v2, %v2160_v56 }
 0x47c   : > { %v2200_v1 = vadd.f32 %v2195_v4, %v2180_v41 }
 0x47d   : > { %2369 = vrot.lane.b32.xlu0 %v6314_v20, %s6084_s26  ;;  %v2255_v43 = vpop.permute.xlu1 %2254  ;;  %v1798_v57 = vpop.permute.xlu2 %1797  ;;  %s2992_s26 = sshra.s32 %s2594_s22, 4  ;;  %s2993_s26 = int_to_ptr.hbm [resolvable:$true] %s2992_s26 }
 0x47e   : > { %s2994_s28 = scalar_lea.hbm %s2993_s26, 8  ;;  %p2999_p9 = scmp.lt.s32.totalorder %s2993_s26, %s6346_s19 }
 0x47f   : > { %v1665_v5 = vpop.permute.xlu0 %1664  ;;  %p2995_p1 = scmp.ne.s32.totalorder %s2993_s26, %s2994_s28  ;;  %p3000_p10 = scmp.lt.s32.totalorder %s2998_s29, %s2994_s28 }
 0x480   : > { %v1669_v21 = vadd.f32 %v1665_v5, %v1649_v28 }
 0x481   : > { %p2996_p4 = pnand %p2995_p1, %p3169_p5  ;;  %p3001_p2 = por %p3000_p10, %p2999_p9 }
 0x482   : > { %v1689_v13 = vadd.f32 %v1685_v38, %v1669_v21 }
 0x483   : > { %p2997_p8 = pneg %p2996_p4 }
 0x484   : > { %v1709_v49 = vadd.f32 %v1705_v16, %v1689_v13 }
 0x485   : > { %v1758_v46 = vpop.permute.xlu1 %1757  ;;  %v2348_v9 = vpop.permute.xlu2 %2347  ;;  %p3002_p11 = pnand %p3001_p2, %p2997_p8 }
 0x487   : > { %v2215_v60 = vpop.permute.xlu0 %2214 }
 0x488   : > { %v2220_v62 = vadd.f32 %v2215_v60, %v2200_v1 }
 0x48a   : > { %v2240_v33 = vadd.f32 %v2235_v31, %v2220_v62 }
 0x48c   : > { %v2260_v17 = vadd.f32 %v2255_v43, %v2240_v33 }
 0x48d   : > { %v2308_v40 = vpop.permute.xlu1 %2307  ;;  %v1858_v51 = vpop.permute.xlu2 %1857 }
 0x48e   : > { %v2273_v35 = vadd.f32 %v5503_v15, %v2260_v17 }
 0x48f   : > { %v1725_v39 = vpop.permute.xlu0 %1724 }
 0x490   : > { %v2293_v58 = vadd.f32 %v2288_v36, %v2273_v35  ;;  %v1729_v14 = vadd.f32 %v1725_v39, %v1709_v49 }
 0x492   : > { %v2313_v45 = vadd.f32 %v2308_v40, %v2293_v58  ;;  %v1742_v30 = vadd.f32 %v5409_v47, %v1729_v14 }
 0x494   : > { %v1762_v42 = vadd.f32 %v1758_v46, %v1742_v30 }
 0x495   : > { %v1818_v63 = vpop.permute.xlu1 %1817  ;;  %v1891_v50 = vpop.permute.xlu2 %1890 }
 0x497   : > { %v1778_v29 = vpop.permute.xlu0 %1777 }
 0x498   : > { %v1782_v8 = vadd.f32 %v1778_v29, %v1762_v42 }
 0x49a   : > { %v1802_v26 = vadd.f32 %v1798_v57, %v1782_v8 }
 0x49c   : > { %v1822_v37 = vadd.f32 %v1818_v63, %v1802_v26 }
 0x49d   : > { %v2368_v22 = vpop.permute.xlu1 %2367  ;;  %v1951_v4 = vpop.permute.xlu2 %1950 }
 0x49f   : > { %v2328_v0 = vpop.permute.xlu0 %2327 }
 0x4a0   : > { %v2333_v18 = vadd.f32 %v2328_v0, %v2313_v45 }
 0x4a2   : > { %v2353_v44 = vadd.f32 %v2348_v9, %v2333_v18 }
 0x4a4   : > { %v2373_v6 = vadd.f32 %v2368_v22, %v2353_v44 }
 0x4a5   : > { %v1931_v24 = vpop.permute.xlu1 %1930  ;;  %v2064_v16 = vpop.permute.xlu2 %2063 }
 0x4a7   : > { %v1838_v23 = vpop.permute.xlu0 %1837 }
 0x4a8   : > { %v1842_v59 = vadd.f32 %v1838_v23, %v1822_v37 }
 0x4aa   : > { %v1862_v47 = vadd.f32 %v1858_v51, %v1842_v59 }
 0x4ac   : > { %v1875_v27 = vadd.f32 %v5486_v7, %v1862_v47 }
 0x4ad   : > { %v1991_v54 = vpop.permute.xlu1 %1990  ;;  %v2124_v57 = vpop.permute.xlu2 %2123 }
 0x4ae   : > { %v1895_v3 = vadd.f32 %v1891_v50, %v1875_v27 }
 0x4af   : > { %v2388_v32 = vpop.permute.xlu0 %2387 }
 0x4b0   : > { %v2393_v15 = vadd.f32 %v2388_v32, %v2373_v6 }
 0x4b2   : > { %vm2395_vm3 = vcmp.ge.f32.partialorder %v2393_v15, 0.0  ;;  %v2397_v2 = vmul.f32 0.01, %v2393_v15 }
 0x4b4   : > { %v2399_v61 = vsel %vm2395_vm3, %v2393_v15, %v2397_v2 }
 0x4b5   : > { %v2799_v53 = vmul.f32 -1.442695, %v2399_v61  ;;  %v2044_v31 = vpop.permute.xlu1 %2043  ;;  %v2177_v9 = vpop.permute.xlu2 %2176 }
 0x4b7   : > { %2905 = vpow2.f32 %v2799_v53  ;;  %v1911_v38 = vpop.permute.xlu0 %1910 }
 0x4b8   : > { %v1915_v25 = vadd.f32 %v1911_v38, %v1895_v3 }
 0x4ba   : > { %v1935_v55 = vadd.f32 %v1931_v24, %v1915_v25 }
 0x4bc   : > { %v1955_v52 = vadd.f32 %v1951_v4, %v1935_v55 }
 0x4bd   : > { %v2906_v11 = vpop.eup %2905  ;;  %v2104_v33 = vpop.permute.xlu1 %2103 }
 0x4be   : > { %v2407_v12 = vadd.f32 1.0, %v2906_v11  ;;  %v2237_v23 = vpop.permute.xlu2 %2236 }
 0x4bf   : > { %v1971_v56 = vpop.permute.xlu0 %1970 }
 0x4c0   : > { %2907 = vrcp.f32 %v2407_v12  ;;  %v2420_v43 = vand.u32 2147483648, %v2407_v12  ;;  %v2418_v41 = vand.u32 2147483647, %v2407_v12  ;;  %v1975_v36 = vadd.f32 %v1971_v56, %v1955_v52 }
 0x4c1   : > { %vm2414_vm5 = vweird.f32 %v2407_v12 }
 0x4c2   : > { %v1995_v46 = vadd.f32 %v1991_v54, %v1975_v36  ;;  %v2421_v7 = vor.u32 1.1754944e-38, %v2420_v43  ;;  %vm2419_vm7 = vcmp.eq.f32.partialorder %v2418_v41, 8.507059e+37 }
 0x4c4   : > { %v2008_v10 = vadd.f32 %v5432_v34, %v1995_v46  ;;  %v2439_v46 = vlaneseq }
 0x4c5   : > { %v2157_v21 = vpop.permute.xlu1 %2156 }
 0x4c6   : > { %v2908_v19 = vpop.eup %2907  ;;  %vm2441_vm13 = vcmp.lt.s32.totalorder %v2439_v46, 16  ;;  %vm5607_vm14 = vcmp.ge.s32.totalorder %v2439_v46, 16  ;;  %vm5611_vm15 = vcmp.lt.s32.totalorder %v2439_v46, 32  ;;  %vm5628_vm2 = vcmp.ge.s32.totalorder %v2439_v46, 32 }
 0x4c7   : > { %v2410_v20 = vmul.f32 %v2908_v19, %v2407_v12  ;;  %vm2415_vm4 = vweird.f32 %v2908_v19  ;;  %v2024_v29 = vpop.permute.xlu0 %2023  ;;  %vm2453_vm1 = vmand %vm5607_vm14, %vm5611_vm15  ;;  %vm5632_vm3 = vcmp.lt.s32.totalorder %v2439_v46, 48  ;;  %vm5696_vm0 = vcmp.ge.s32.totalorder %v2439_v46, 96 }
 0x4c8   : > { %vm2416_vm6 = vmor %vm2414_vm5, %vm2415_vm4  ;;  %v2028_v17 = vadd.f32 %v2024_v29, %v2008_v10  ;;  %vm5645_vm5 = vcmp.ge.s32.totalorder %v2439_v46, 48 }
 0x4c9   : > { %v2411_v5 = vsub.f32 1.0, %v2410_v20  ;;  %vm2463_vm4 = vmand %vm5628_vm2, %vm5632_vm3 }
 0x4ca   : > { %v2048_v28 = vadd.f32 %v2044_v31, %v2028_v17 }
 0x4cb   : > { %v2412_v60 = vmul.f32 %v2908_v19, %v2411_v5 }
 0x4cc   : > { %v2068_v35 = vadd.f32 %v2064_v16, %v2048_v28 }
 0x4cd   : > { %v2413_v1 = vadd.f32 %v2908_v19, %v2412_v60  ;;  %v2217_v34 = vpop.permute.xlu1 %2216 }
 0x4cf   : > { %v2417_v39 = vsel %vm2416_vm6, %v2908_v19, %v2413_v1  ;;  %v2084_v13 = vpop.permute.xlu0 %2083  ;;  %vm5649_vm6 = vcmp.lt.s32.totalorder %v2439_v46, 64 }
 0x4d0   : > { %v5587_v62 = vsel %vm2419_vm7, %v2421_v7, %v2417_v39  ;;  %v2088_v0 = vadd.f32 %v2084_v13, %v2068_v35  ;;  %vm5653_vm7 = vcmp.ge.s32.totalorder %v2439_v46, 64 }
 0x4d1   : > { %2445 = vst [vmem:[#allocation1] sm:$0xff] %v5587_v62 }
 0x4d2   : > { %v2108_v58 = vadd.f32 %v2104_v33, %v2088_v0  ;;  %2443 = vst.msk [vmem:[#allocation4] sm:$0x1] %vm2441_vm13, %v5587_v62 }
 0x4d4   : > { %v2128_v49 = vadd.f32 %v2124_v57, %v2108_v58 }
 0x4d5   : > { %v2270_v22 = vpop.permute.xlu1 %2269 }
 0x4d6   : > { %v2141_v45 = vadd.f32 %v5517_v48, %v2128_v49  ;;  %v2290_v48 = vpop.permute.xlu2 %2289 }
 0x4d7   : > { %v2197_v14 = vpop.permute.xlu0 %2196 }
 0x4d8   : > { %v2447_v40 = vld [vmem:[#allocation1 + $0x1] ss:$9 sm:$0xff]  ;;  %v2161_v18 = vadd.f32 %v2157_v21, %v2141_v45 }
 0x4d9   : > { %2455 = vst [vmem:[#allocation1] sm:$0xff] %v5587_v62  ;;  %2448 = vrot.lane.b32.xlu2 %v2447_v40, %s3073_s13 }
 0x4da   : > { %v2181_v51 = vadd.f32 %v2177_v9, %v2161_v18 }
 0x4dc   : > { %v2201_v30 = vadd.f32 %v2197_v14, %v2181_v51  ;;  %v6333_v14 = vmov 0  ;;  %v6337_v51 = vmov 0 }
 0x4dd   : > { %v2330_v2 = vpop.permute.xlu1 %2329 }
 0x4de   : > { %v2221_v42 = vadd.f32 %v2217_v34, %v2201_v30  ;;  %v2350_v37 = vpop.permute.xlu2 %2349 }
 0x4df   : > { %v2257_v6 = vpop.permute.xlu0 %2256 }
 0x4e0   : > { %v2457_v63 = vld [vmem:[#allocation1 + $0x2] ss:$9 sm:$0xff]  ;;  %v2241_v8 = vadd.f32 %v2237_v23, %v2221_v42 }
 0x4e1   : > { %2465 = vst [vmem:[#allocation1] sm:$0xff] %v5587_v62  ;;  %2458 = vrot.lane.b32.xlu1 %v2457_v63, %s3074_s4 }
 0x4e2   : > { %v2261_v32 = vadd.f32 %v2257_v6, %v2241_v8 }
 0x4e4   : > { %v2274_v15 = vadd.f32 %v2270_v22, %v2261_v32 }
 0x4e5   : > { %v2390_v11 = vpop.permute.xlu1 %2389 }
 0x4e6   : > { %v2294_v50 = vadd.f32 %v2290_v48, %v2274_v15 }
 0x4e7   : > { %v2310_v26 = vpop.permute.xlu0 %2309 }
 0x4e8   : > { %v2467_v44 = vld [vmem:[#allocation1 + $0x3] ss:$9 sm:$0xff]  ;;  %v2314_v61 = vadd.f32 %v2310_v26, %v2294_v50 }
 0x4e9   : > { %2468 = vrot.lane.b32.xlu0 %v2467_v44, %s3075_s20  ;;  %2475 = vst [vmem:[#allocation1] sm:$0xff] %v5587_v62 }
 0x4ea   : > { %v2334_v53 = vadd.f32 %v2330_v2, %v2314_v61 }
 0x4ec   : > { %v2354_v24 = vadd.f32 %v2350_v37, %v2334_v53  ;;  %v6350_v37 = vld [vmem:[#allocation25_spill] sm:$0xff] }
 0x4ef   : > { %v2370_v59 = vpop.permute.xlu0 %2369 }
 0x4f0   : > { %v2374_v4 = vadd.f32 %v2370_v59, %v2354_v24  ;;  %v2477_v12 = vld [vmem:[#allocation1 + $0x4] ss:$9 sm:$0xff] }
 0x4f1   : > { %2478 = vrot.lane.b32.xlu2 %v2477_v12, %s3076_s24  ;;  %2485 = vst [vmem:[#allocation1] sm:$0xff] %v5587_v62 }
 0x4f2   : > { %v2394_v47 = vadd.f32 %v2390_v11, %v2374_v4 }
 0x4f4   : > { %vm2396_vm8 = vcmp.ge.f32.partialorder %v2394_v47, 0.0  ;;  %v2398_v54 = vmul.f32 0.01, %v2394_v47 }
 0x4f6   : > { %v2400_v27 = vsel %vm2396_vm8, %v2394_v47, %v2398_v54  ;;  %vm5657_vm8 = vcmp.lt.s32.totalorder %v2439_v46, 80 }
 0x4f7   : > { %v2800_v38 = vmul.f32 -1.442695, %v2400_v27  ;;  %vm6340_vm14 = vmand %vm5653_vm7, %vm5657_vm8 }
 0x4f8   : > { %v2487_v3 = vld [vmem:[#allocation1 + $0x5] ss:$9 sm:$0xff] }
 0x4f9   : > { %2909 = vpow2.f32 %v2800_v38  ;;  %2488 = vrot.lane.b32.xlu1 %v2487_v3, %s3077_s0  ;;  %2495 = vst [vmem:[#allocation1] sm:$0xff] %v5587_v62 }
 0x4ff   : > { %v2910_v25 = vpop.eup %2909 }
 0x500   : > { %v2408_v19 = vadd.f32 1.0, %v2910_v25  ;;  %v2497_v16 = vld [vmem:[#allocation1 + $0x6] ss:$9 sm:$0xff] }
 0x501   : > { %2498 = vrot.lane.b32.xlu0 %v2497_v16, %s3078_s1  ;;  %2505 = vst [vmem:[#allocation1] sm:$0xff] %v5587_v62 }
 0x502   : > { %2911 = vrcp.f32 %v2408_v19  ;;  %v2435_v31 = vand.u32 2147483648, %v2408_v19  ;;  %v2433_v43 = vand.u32 2147483647, %v2408_v19  ;;  %vm2429_vm10 = vweird.f32 %v2408_v19 }
 0x504   : > { %v2436_v60 = vor.u32 1.1754944e-38, %v2435_v31  ;;  %vm2434_vm12 = vcmp.eq.f32.partialorder %v2433_v43, 8.507059e+37 }
 0x508   : > { %v2912_v20 = vpop.eup %2911  ;;  %v2507_v1 = vld [vmem:[#allocation1 + $0x7] ss:$9 sm:$0xff] }
 0x509   : > { %v2425_v55 = vmul.f32 %v2912_v20, %v2408_v19  ;;  %vm2430_vm9 = vweird.f32 %v2912_v20 }
 0x50a   : > { %vm2431_vm11 = vmor %vm2429_vm10, %vm2430_vm9 }
 0x50b   : > { %v2426_v5 = vsub.f32 1.0, %v2425_v55  ;;  %vm5899_vm9 = vmand %vm5645_vm5, %vm5649_vm6 }
 0x50c   : > { %vm5898_vm10 = vmand %vm5653_vm7, %vm5657_vm8 }
 0x50d   : > { %v2427_v52 = vmul.f32 %v2912_v20, %v2426_v5 }
 0x50f   : > { %v2428_v56 = vadd.f32 %v2912_v20, %v2427_v52 }
 0x511   : > { %v2432_v41 = vsel %vm2431_vm11, %v2912_v20, %v2428_v56  ;;  %vm5679_vm11 = vcmp.ge.s32.totalorder %v2439_v46, 80 }
 0x512   : > { %v2437_v36 = vsel %vm2434_vm12, %v2436_v60, %v2432_v41  ;;  %vm5683_vm12 = vcmp.lt.s32.totalorder %v2439_v46, 96 }
 0x513   : > { %2517 = vst [vmem:[#allocation1] sm:$0xff] %v2437_v36  ;;  %v6334_v14 = vsel %vm5683_vm12, 4294967295, %v6333_v14 }
 0x514   : > { %2515 = vst.msk [vmem:[#allocation4 + $0x1] sm:$0x1] %vm2441_vm13, %v2437_v36  ;;  %vm5900_vm13 = vmand %vm5679_vm11, %vm5683_vm12  ;;  %vm2512_vm12 = vcmp.lt.s32.totalorder %v2439_v46, 128  ;;  %vm6341_vm15 = vnez %v6334_v14 }
 0x51a   : > { %v2519_v7 = vld [vmem:[#allocation1 + $0x1] ss:$9 sm:$0xff] }
 0x51b   : > { %2520 = vrot.lane.b32.xlu0 %v2519_v7, %s3073_s13  ;;  %2524 = vst [vmem:[#allocation1] sm:$0xff] %v2437_v36 }
 0x522   : > { %v2526_v39 = vld [vmem:[#allocation1 + $0x2] ss:$9 sm:$0xff] }
 0x523   : > { %2527 = vrot.lane.b32.xlu2 %v2526_v39, %s3074_s4  ;;  %2531 = vst [vmem:[#allocation1] sm:$0xff] %v2437_v36 }
 0x52a   : > { %v2533_v10 = vld [vmem:[#allocation1 + $0x3] ss:$9 sm:$0xff] }
 0x52b   : > { %2534 = vrot.lane.b32.xlu1 %v2533_v10, %s3075_s20  ;;  %2538 = vst [vmem:[#allocation1] sm:$0xff] %v2437_v36 }
 0x532   : > { %v2540_v29 = vld [vmem:[#allocation1 + $0x4] ss:$9 sm:$0xff] }
 0x533   : > { %v2449_v62 = vpop.permute.xlu2 %2448  ;;  %2541 = vrot.lane.b32.xlu0 %v2540_v29, %s3076_s24  ;;  %2545 = vst [vmem:[#allocation1] sm:$0xff] %v2437_v36 }
 0x534   : > { %2454 = vst.msk [vmem:[#allocation4] sm:$0x1] %vm2453_vm1, %v2449_v62 }
 0x53a   : > { %v2547_v17 = vld [vmem:[#allocation1 + $0x5] ss:$9 sm:$0xff] }
 0x53b   : > { %2548 = vrot.lane.b32.xlu2 %v2547_v17, %s3077_s0  ;;  %2552 = vst [vmem:[#allocation1] sm:$0xff] %v2437_v36 }
 0x542   : > { %v2554_v28 = vld [vmem:[#allocation1 + $0x6] ss:$9 sm:$0xff] }
 0x543   : > { %2508 = vrot.lane.b32.xlu2 %v2507_v1, %s3079_s2  ;;  %2555 = vrot.lane.b32.xlu1 %v2554_v28, %s3078_s1  ;;  %2559 = vst [vmem:[#allocation1] sm:$0xff] %v2437_v36 }
 0x54a   : > { %v2561_v9 = vld [vmem:[#allocation1 + $0x7] ss:$9 sm:$0xff] }
 0x54b   : > { %2562 = vrot.lane.b32.xlu0 %v2561_v9, %s3079_s2  ;;  %v2479_v34 = vpop.permute.xlu2 %2478 }
 0x553   : > { %v2459_v35 = vpop.permute.xlu1 %2458 }
 0x554   : > { %2464 = vst.msk [vmem:[#allocation4] sm:$0x1] %vm2463_vm4, %v2459_v35 }
 0x55b   : > { %v2469_v63 = vpop.permute.xlu0 %2468 }
 0x55c   : > { %2474 = vst.msk [vmem:[#allocation4] sm:$0x1] %vm5899_vm9, %v2469_v63 }
 0x55d   : > { %2484 = vst.msk [vmem:[#allocation4] sm:$0x1] %vm5898_vm10, %v2479_v34  ;;  %vm5700_vm10 = vcmp.lt.s32.totalorder %v2439_v46, 112 }
 0x55e   : > { %v6338_v51 = vsel %vm5700_vm10, 4294967295, %v6337_v51  ;;  %vm5903_vm9 = vmand %vm5696_vm0, %vm5700_vm10 }
 0x55f   : > { %vm6343_vm2 = vnez %v6338_v51 }
 0x560   : > { %vm6344_vm3 = vmand %vm5696_vm0, %vm6343_vm2 }
 0x56b   : > { %v2489_v18 = vpop.permute.xlu1 %2488 }
 0x56c   : > { %2494 = vst.msk [vmem:[#allocation4] sm:$0x1] %vm5900_vm13, %v2489_v18  ;;  %vm2511_vm13 = vcmp.ge.s32.totalorder %v2439_v46, 112 }
 0x56d   : > { %vm2513_vm10 = vmand %vm2511_vm13, %vm2512_vm12 }
 0x573   : > { %v2499_v30 = vpop.permute.xlu0 %2498 }
 0x574   : > { %2504 = vst.msk [vmem:[#allocation4] sm:$0x1] %vm5903_vm9, %v2499_v30  ;;  %vm6339_vm9 = vmand %vm5645_vm5, %vm5649_vm6 }
 0x57d   : > { %v2528_v44 = vpop.permute.xlu2 %2527 }
 0x58d   : > { %v2521_v42 = vpop.permute.xlu0 %2520 }
 0x58e   : > { %2523 = vst.msk [vmem:[#allocation4 + $0x1] sm:$0x1] %vm2453_vm1, %v2521_v42  ;;  %vm6342_vm1 = vmand %vm5679_vm11, %vm6341_vm15 }
 0x58f   : > { %2530 = vst.msk [vmem:[#allocation4 + $0x1] sm:$0x1] %vm2463_vm4, %v2528_v44  ;;  %vm6349_vm4 = vcmask 1043456  }
 0x595   : > { %v2549_v22 = vpop.permute.xlu2 %2548 }
 0x59d   : > { %v2535_v6 = vpop.permute.xlu1 %2534  ;;  %v2509_v8 = vpop.permute.xlu2 %2508 }
 0x59e   : > { %2537 = vst.msk [vmem:[#allocation4 + $0x1] sm:$0x1] %vm6339_vm9, %v2535_v6 }
 0x59f   : > { %2514 = vst.msk [vmem:[#allocation4] sm:$0x1] %vm2513_vm10, %v2509_v8 }
 0x5a5   : > { %v2542_v32 = vpop.permute.xlu0 %2541 }
 0x5a6   : > { %2544 = vst.msk [vmem:[#allocation4 + $0x1] sm:$0x1] %vm6340_vm14, %v2542_v32 }
 0x5a7   : > { %2551 = vst.msk [vmem:[#allocation4 + $0x1] sm:$0x1] %vm6342_vm1, %v2549_v22 }
 0x5b5   : > { %v2556_v48 = vpop.permute.xlu1 %2555 }
 0x5b6   : > { %2558 = vst.msk [vmem:[#allocation4 + $0x1] sm:$0x1] %vm6344_vm3, %v2556_v48 }
 0x5bd   : > { %v2563_v15 = vpop.permute.xlu0 %2562 }
 0x5be   : > { %2565 = vst.msk [vmem:[#allocation4 + $0x1] sm:$0x1] %vm2513_vm10, %v2563_v15 }
 0x5c5   : > { %v2566_v50 = vld [vmem:[#allocation4] sm:$0x3] }
 0x5c6   : > { %v2571_v2 = vperm.slane %v2566_v50, 1  ;;  %v2570_v26 = vperm.slane %v2566_v50, 0 }
 0x5c8   : > { %v2572_v61 = vrot.slane %v2571_v2, 4 }
 0x5ca   : > { %v2573_v53 = vsel %vm6349_vm4, %v2570_v26, %v2572_v61 }
 0x5cb   : > { %v2575_v24 = vmul.f32 %v2573_v53, %v6350_v37 }
 0x5cd   : > { %2576 = vst [vmem:[%s215_s21] sm:$0xff] %v2575_v24 }
 0x5ce   : > { %3005 = shalt.err (!%p3002_p11)
}
 0x5cf   : > { %2818 = dma.vmem_to_hbm [thread:$0]  (%p3169_p5), %s2592_s10, 128, %s2594_s22, %s2578_s16  }
 0x5d0 PF: > { %s6351_s7 = sld [smem:[#allocation17_spill]] }
 0x5d1   : > { %s6353_s11 = sld [smem:[#allocation20_spill]] }
 0x5d6   : > { %s2605_s18 = sand.u32 1, %s6351_s7  }
 0x5d7   : > { %p6354_p12 = scmp.ge.s32.totalorder %s6353_s11, 2  ;;  %s2606_s17 = scalar_lea.sflag [#allocation7], %s2605_s18 }
 0x5d9   : > { %p2832_p13 = pnand %p6354_p12, %p3135_p6 }
 0x5db   : > { %p2833_p0 = pneg %p2832_p13 }
 0x5dd   : > { %3035 = dma.done.wait (%p2833_p0), %s2606_s17, 128  }
 0x5de   : > { %3037 = vsyncadd (%p2833_p0), %s2606_s17, 4294967168  ;;  %s6355_s15 = sld [smem:[#allocation22_spill]] }
 0x5df   : > { %s6356_s12 = sld [smem:[#allocation18_spill]] }
 0x5e0   : > { %s6357_s13 = sld [smem:[#allocation19_spill]] }
 0x5e1   : > { %s6358_s14 = sld [smem:[#allocation23_spill]] }
 0x5e4   : > { %p18_p3 = scmp.ge.s32.totalorder %s6355_s15, 4  }
 0x5e6   :  { %20 = sbr.rel (!%p18_p3) target bundleno = 12 (0xc), region = 101 }
 0x5eb   :  { %2612 = vsyncpa [#allocation6], 1 }
 0x5ec   :  { %2614 = vsyncpa [#allocation6 + $0x1], 1 }
 0x5ed   :  { %2615 = vsyncpa [#allocation7], 1 }
 0x5ee   :  { %2617 = vsyncpa [#allocation7 + $0x1], 1 }
 0x5ef   :  { %2618 = vsyncpa [#allocation8], 1 }
 0x5f0   :  { %2620 = vsyncpa [#allocation8 + $0x1], 1 }
 0x5f1   :  { %2621 = vsyncpa [#allocation10], 1 }

</bundles_post_ra>
